<compile_context>
chip_gen: v7x
topology: tpu7x:2x2x1
jax: 0.10.0
libtpu: 0.0.40
codegen_flags: <defaults>
</compile_context>

<pallas_src>
import numpy as np
import jax
import jax.numpy as jnp
from jax import lax
from jax.experimental import pallas as pl
from jax.experimental.pallas import tpu as pltpu

LRELU_SLOPE = 0.2
BN_EPS = 1e-5

T0, T1, T2, T3 = 13, 10, 7, 4            # conv output heights: 16 -> 13 -> 10 -> 7 -> 4
C0, C1, C2, C3 = 14, 24, 51, 77          # conv output channels
N0P, N1P, N2P, N3P = 256, 256, 384, 384  # lane-padded flattened widths (T*C -> mult of 128)
CPAD = 128                               # channel-space pad for BN statistics
YW = 128                                 # padded [y(13) | 1 | 0...] tail width


def _round_up(v, m):
    return ((v + m - 1) // m) * m


# ----------------------------------------------------------------------------
# Kernel
# ----------------------------------------------------------------------------
def _disc_kernel(xy_ref, w0_ref, w1_ref, w2_ref, w3_ref, wl1_ref, wl2_ref,
                 s_ref, st_ref, gb_ref, fm_ref, tail_ref):
    f32 = jnp.float32
    mm = w0_ref.dtype                     # matmul operand dtype (bf16)
    B = xy_ref.shape[0]
    K0 = xy_ref.shape[1]

    def lrelu(v):
        # LeakyReLU(0.2): for slope < 1 this is max(x, slope*x)
        return jnp.maximum(v, LRELU_SLOPE * v)

    def bn_lrelu(pre, s, st, goff, n):
        # Train-mode BatchNorm2d over columns t*C+c (biased variance, eps=1e-5),
        # fused into two small MXU trips (see header).  Padded columns/channels
        # carry zeros end-to-end (zero weight rows/cols in S, St).
        gamma = gb_ref[0:1, goff:goff + CPAD]                            # (1, 128)
        beta = gb_ref[1:2, goff:goff + CPAD]
        colsum = jnp.sum(pre, axis=0, keepdims=True)                     # (1, N)
        colsq = jnp.sum(pre * pre, axis=0, keepdims=True)                # (1, N)
        stats = jnp.concatenate([colsum, colsq], axis=0).astype(mm)      # (2, N)
        ch = jnp.dot(stats, s, preferred_element_type=f32) * (1.0 / n)   # (2, 128)
        mean = ch[0:1]
        var = jnp.maximum(ch[1:2] - mean * mean, 0.0)
        a = gamma * lax.rsqrt(var + BN_EPS)                              # (1, 128)
        b = beta - mean * a
        ab = jnp.concatenate([a, b], axis=0).astype(mm)                  # (2, 128)
        ab_t = jnp.dot(ab, st, preferred_element_type=f32)               # (2, N)
        return lrelu(pre * ab_t[0:1] + ab_t[1:2])

    xy = xy_ref[...]                       # (B, K0) bf16 : [x | pad | y | 1 | pad]
    ytail = xy[:, K0 - YW:]                # (B, 128)     : [y(13) | 1 | 0...]

    # ---- stage 0: conv_cond_concat + conv(14->14,(4,P)) (+bias via ones lane); fm = h0
    h0 = lrelu(jnp.dot(xy, w0_ref[...], preferred_element_type=f32))     # (B, 256)
    fm_ref[...] = h0                                                     # lane-dense store

    # ---- stage 1: conv(14->24,(4,1)) + bn1 + lrelu (conv bias cancels in BN)
    pre1 = jnp.dot(h0.astype(mm), w1_ref[...], preferred_element_type=f32)   # (B, 256)
    h1 = bn_lrelu(pre1, s_ref[0:N1P, 0:CPAD], st_ref[:, 0:N1P], 0, float(B * T1))

    # ---- stage 2: conv_cond_concat + conv(37->51,(4,1)) + bn2 + lrelu
    h1y = jnp.concatenate([h1.astype(mm), ytail], axis=1)                    # (B, 384)
    pre2 = jnp.dot(h1y, w2_ref[...], preferred_element_type=f32)             # (B, 384)
    h2 = bn_lrelu(pre2, s_ref[:, CPAD:2 * CPAD], st_ref[:, N1P:N1P + N2P],
                  CPAD, float(B * T2))

    # ---- stage 3: conv(51->77,(4,1)) + bn3 + lrelu
    pre3 = jnp.dot(h2.astype(mm), w3_ref[...], preferred_element_type=f32)   # (B, 384)
    h3 = bn_lrelu(pre3, s_ref[:, 2 * CPAD:3 * CPAD],
                  st_ref[:, N1P + N2P:N1P + N2P + N3P], 2 * CPAD, float(B * T3))

    # ---- linear1(308->1024) + bn1d + lrelu (linear bias cancels in BN)
    pre4 = jnp.dot(h3.astype(mm), wl1_ref[...], preferred_element_type=f32)  # (B, 1024)
    g1d = gb_ref[0:1, 3 * CPAD:3 * CPAD + 1024]
    be1d = gb_ref[1:2, 3 * CPAD:3 * CPAD + 1024]
    mean4 = jnp.sum(pre4, axis=0, keepdims=True) * (1.0 / B)
    ex2 = jnp.sum(pre4 * pre4, axis=0, keepdims=True) * (1.0 / B)
    var4 = jnp.maximum(ex2 - mean4 * mean4, 0.0)
    a4 = g1d * lax.rsqrt(var4 + BN_EPS)
    b4 = be1d - mean4 * a4
    h4 = lrelu(pre4 * a4 + b4)

    # ---- linear2 on cat([h4, y]) (+bias via ones lane); lane0 = h5, lane1 = sigmoid(h5)
    h4y = jnp.concatenate([h4.astype(mm), ytail], axis=1)                    # (B, 1152)
    t = jnp.dot(h4y, wl2_ref[...], preferred_element_type=f32)               # (B, 128)
    col = lax.broadcasted_iota(jnp.int32, t.shape, 1)
    tail_ref[...] = jnp.where(col == 1, 1.0 / (1.0 + jnp.exp(-t)), t)


# ----------------------------------------------------------------------------
# One-time (host-side) weight packing — hoisted out of the per-forward path
# ----------------------------------------------------------------------------
def _toeplitz(w_ock, t_in, t_out):
    """w_ock: (C_out, C_in, KH) -> block-Toeplitz (T_in*C_in, T_out*C_out).
    Input flattened per-sample as col = s*C_in + c, output as col = t*C_out + o,
    so a valid, stride-1 (KH,1) conv becomes a single matmul."""
    c_out, c_in, kh = w_ock.shape
    w_km = np.transpose(w_ock, (2, 1, 0)).reshape(kh * c_in, c_out)
    sup = np.zeros((t_in * c_in, t_out * c_out), np.float32)
    for t in range(t_out):
        sup[t * c_in:(t + kh) * c_in, t * c_out:(t + 1) * c_out] = w_km
    return sup


def build_discriminator(params, pitch_range, matmul_dtype=jnp.bfloat16):
    """Builds the packed, lane-padded weight slabs once. Call once per param set."""
    P = pitch_range
    Kx = _round_up(16 * P, 128)
    K0 = Kx + 128
    g = lambda k: np.asarray(params[k], np.float32)

    # stage 0: conv(14->14,(4,P)); x-channel Toeplitz + y fold + bias row
    W0 = g("h0_w")                                                      # (14,14,4,P)
    w0 = np.zeros((K0, N0P), np.float32)
    sup0 = _toeplitz(np.transpose(W0[:, 0, :, :], (0, 2, 1)), 16, T0)   # (16P, 182)
    w0[:sup0.shape[0], :sup0.shape[1]] = sup0
    w0y = np.transpose(W0[:, 1:, :, :].sum(axis=(2, 3)), (1, 0))        # (13, 14)
    w0[Kx:Kx + 13, :T0 * C0] = np.tile(w0y, (1, T0))
    w0[Kx + 13, :T0 * C0] = np.tile(g("h0_b").reshape(1, C0), (1, T0))

    # stage 1: conv(14->24,(4,1)); bias cancels in train-mode bn1
    w1 = np.zeros((N0P, N1P), np.float32)
    w1[:T0 * C0, :T1 * C1] = _toeplitz(g("h1_w")[:, :, :, 0], T0, T1)   # (182, 240)

    # stage 2: conv(37->51,(4,1)); y-channels folded; bias cancels in bn2
    W2 = g("h2_w")[:, :, :, 0]                                          # (51, 37, 4)
    w2 = np.zeros((N1P + YW, N2P), np.float32)                          # (384, 384)
    w2[:T1 * C1, :T2 * C2] = _toeplitz(W2[:, :C1, :], T1, T2)           # (240, 357)
    w2y = np.transpose(W2[:, C1:, :].sum(axis=2), (1, 0))               # (13, 51)
    w2[N1P:N1P + 13, :T2 * C2] = np.tile(w2y, (1, T2))

    # stage 3: conv(51->77,(4,1)); bias cancels in bn3
    w3 = np.zeros((N2P, N3P), np.float32)
    w3[:T2 * C2, :T3 * C3] = _toeplitz(g("h3_w")[:, :, :, 0], T2, T3)   # (357, 308)

    # linear1: re-index so in-kernel time-major flatten of h3 matches PyTorch's
    # channel-major h3.view(B,-1) (col = c*4 + t); bias cancels in bn1d.
    Wl1 = g("l1_w")                                                     # (1024, 308)
    wl1 = np.zeros((N3P, 1024), np.float32)
    wl1[:T3 * C3, :] = np.transpose(Wl1.reshape(1024, C3, T3),
                                    (2, 1, 0)).reshape(T3 * C3, 1024)

    # linear2 on cat([h4, y]); h5 weights duplicated into lanes 0 and 1 so the
    # kernel can emit [h5, sigmoid(h5)] in one lane-dense store; bias on ones lane.
    Wl2 = g("l2_w")                                                     # (1, 1037)
    wl2 = np.zeros((1024 + YW, 128), np.float32)
    for lane in (0, 1):
        wl2[:1024, lane] = Wl2[0, :1024]
        wl2[1024:1037, lane] = Wl2[0, 1024:]
        wl2[1037, lane] = g("l2_b").reshape(())

    # BN select (S) / broadcast (S^T) matrices — 0/1, exact in bf16 — and gamma/beta
    s_all = np.zeros((N2P, 3 * CPAD), np.float32)                       # (384, 384)
    st_all = np.zeros((CPAD, N1P + N2P + N3P), np.float32)              # (128, 1024)
    gb = np.zeros((2, 3 * CPAD + 1024), np.float32)                     # (2, 1408)
    for C, T, soff, stoff, name in ((C1, T1, 0, 0, "bn1"),
                                    (C2, T2, CPAD, N1P, "bn2"),
                                    (C3, T3, 2 * CPAD, N1P + N2P, "bn3")):
        for t in range(T):
            for c in range(C):
                s_all[t * C + c, soff + c] = 1.0
                st_all[c, stoff + t * C + c] = 1.0
        gb[0, soff:soff + C] = g(name + "_g")
        gb[1, soff:soff + C] = g(name + "_b")
    gb[0, 3 * CPAD:] = g("bn1d_g")
    gb[1, 3 * CPAD:] = g("bn1d_b")

    md = matmul_dtype
    to = lambda a: jnp.asarray(a, md)
    return (to(w0), to(w1), to(w2), to(w3), to(wl1), to(wl2),
            to(s_all), to(st_all), jnp.asarray(gb, jnp.float32))


# ----------------------------------------------------------------------------
# Per-call forward (cheap: flatten x, append [y | 1], one pallas_call)
# ----------------------------------------------------------------------------
def _discriminator_forward(x, y, packed):
    w0 = packed[0]
    mm = w0.dtype
    f32 = jnp.float32
    B, _, H, P = x.shape
    assert H == 16, "linear1(308) requires input height 16 (77 * 4 = 308)"
    Kx = _round_up(H * P, 128)

    xflat = x[:, 0, :, :].reshape(B, H * P).astype(f32)                 # col = h*P + p
    ytail = jnp.concatenate([y.astype(f32), jnp.ones((B, 1), f32),
                             jnp.zeros((B, YW - 14), f32)], axis=1)     # (B, 128)
    parts = [xflat]
    if Kx > H * P:
        parts.append(jnp.zeros((B, Kx - H * P), f32))
    parts.append(ytail)
    xy = jnp.concatenate(parts, axis=1).astype(mm)                      # (B, Kx + 128)

    vmem = pl.BlockSpec(memory_space=pltpu.MemorySpace.VMEM)
    fm_pad, tail = pl.pallas_call(
        _disc_kernel,
        out_shape=(jax.ShapeDtypeStruct((B, N0P), f32),
                   jax.ShapeDtypeStruct((B, YW), f32)),
        in_specs=[vmem] * (1 + len(packed)),
        out_specs=(vmem, vmem),
    )(xy, *packed)

    h5 = tail[:, 0:1]
    h5_sigmoid = tail[:, 1:2]
    # fm back to PyTorch NCHW: (B, 14, 13, 1)
    fm = jnp.transpose(fm_pad[:, :T0 * C0].reshape(B, T0, C0), (0, 2, 1))[..., None]
    return h5_sigmoid, h5, fm


discriminator_forward = jax.jit(_discriminator_forward)


# ----------------------------------------------------------------------------
# Parameter init + demo
# ----------------------------------------------------------------------------
def init_params(key, pitch_range):
    ks = jax.random.split(key, 20)

    def n(k, shape, scale=0.05):
        return scale * jax.random.normal(k, shape, dtype=jnp.float32)

    return {
        "h0_w": n(ks[0], (14, 14, 4, pitch_range)),
        "h0_b": n(ks[1], (14,)),
        "h1_w": n(ks[2], (24, 14, 4, 1)),
        "h1_b": n(ks[3], (24,)),
        "h2_w": n(ks[4], (51, 37, 4, 1)),
        "h2_b": n(ks[5], (51,)),
        "h3_w": n(ks[6], (77, 51, 4, 1)),
        "h3_b": n(ks[7], (77,)),
        "l1_w": n(ks[8], (1024, 308)),
        "l1_b": n(ks[9], (1024,)),
        "l2_w": n(ks[10], (1, 1037)),
        "l2_b": n(ks[11], (1,)),
        "bn1_g": 1.0 + n(ks[12], (24,)),
        "bn1_b": n(ks[13], (24,)),
        "bn2_g": 1.0 + n(ks[14], (51,)),
        "bn2_b": n(ks[15], (51,)),
        "bn3_g": 1.0 + n(ks[16], (77,)),
        "bn3_b": n(ks[17], (77,)),
        "bn1d_g": 1.0 + n(ks[18], (1024,)),
        "bn1d_b": n(ks[19], (1024,)),
    }


if __name__ == "__main__":
    key = jax.random.PRNGKey(0)
    kx, ky, kp = jax.random.split(key, 3)

    batch_size = 8              # multiple of 8 sublanes; scales to >=128 for MXU fill
    pitch_range = 16            # small synthetic pitch range; H must be 16
    x = jax.random.normal(kx, (batch_size, 1, 16, pitch_range), dtype=jnp.float32)
    y = jax.random.normal(ky, (batch_size, 13), dtype=jnp.float32)
    params = init_params(kp, pitch_range)

    packed = build_discriminator(params, pitch_range)   # one-time weight packing (hoisted)
    h5_sigmoid, h5, fm = discriminator_forward(x, y, packed)
    jax.block_until_ready((h5_sigmoid, h5, fm))

    assert h5_sigmoid.shape == (batch_size, 1)
    assert h5.shape == (batch_size, 1)
    assert fm.shape == (batch_size, 14, 13, 1)
    assert bool(jnp.all(jnp.isfinite(h5_sigmoid)))
    assert bool(jnp.all(jnp.isfinite(fm)))
    print("KERNEL_OK")
</pallas_src>

<mosaic_0001>
module attributes {stable_mosaic.version = 11 : i64} {
  func.func @_disc_kernel(%arg0: memref<8x384xbf16, #tpu.memory_space<vmem>>, %arg1: memref<384x256xbf16, #tpu.memory_space<vmem>>, %arg2: memref<256x256xbf16, #tpu.memory_space<vmem>>, %arg3: memref<384x384xbf16, #tpu.memory_space<vmem>>, %arg4: memref<384x384xbf16, #tpu.memory_space<vmem>>, %arg5: memref<384x1024xbf16, #tpu.memory_space<vmem>>, %arg6: memref<1152x128xbf16, #tpu.memory_space<vmem>>, %arg7: memref<384x384xbf16, #tpu.memory_space<vmem>>, %arg8: memref<128x1024xbf16, #tpu.memory_space<vmem>>, %arg9: memref<2x1408xf32, #tpu.memory_space<vmem>>, %arg10: memref<8x256xf32, #tpu.memory_space<vmem>>, %arg11: memref<8x128xf32, #tpu.memory_space<vmem>>) attributes {dimension_semantics = [], scalar_prefetch = 0 : i64, scratch_operands = 0 : i64, tpu.core_type = #tpu.core_type<tc>} {
    %c0 = arith.constant 0 : index
    %c0_0 = arith.constant 0 : index
    %0 = vector.load %arg0[%c0, %c0_0] : memref<8x384xbf16, #tpu.memory_space<vmem>>, vector<8x384xbf16>
    %1 = vector.extract_strided_slice %0 {offsets = [0, 256], sizes = [8, 128], strides = [1, 1]} : vector<8x384xbf16> to vector<8x128xbf16>
    %c0_1 = arith.constant 0 : index
    %c0_2 = arith.constant 0 : index
    %2 = vector.load %arg1[%c0_1, %c0_2] : memref<384x256xbf16, #tpu.memory_space<vmem>>, vector<384x256xbf16>
    %cst = arith.constant dense<0.000000e+00> : vector<8x256xf32>
    %3 = tpu.matmul %0, %2, %cst {dimension_numbers = #tpu.dot_dimension_numbers<[1], [0], [0], [1], [0, 0, 1, 1], [], []>} : vector<8x384xbf16>, vector<384x256xbf16>, vector<8x256xf32> -> vector<8x256xf32>
    %cst_3 = arith.constant 2.000000e-01 : f32
    %4 = vector.broadcast %cst_3 : f32 to vector<8x256xf32>
    %5 = arith.mulf %4, %3 : vector<8x256xf32>
    %6 = arith.maximumf %3, %5 : vector<8x256xf32>
    %c0_4 = arith.constant 0 : index
    %c0_5 = arith.constant 0 : index
    %7 = vector.load %arg10[%c0_4, %c0_5] : memref<8x256xf32, #tpu.memory_space<vmem>>, vector<8x256xf32>
    tpu.vector_store %arg10[%c0_4, %c0_5], %6 {strides = array<i32>} : memref<8x256xf32, #tpu.memory_space<vmem>>, vector<8x256xf32>,
    %8 = arith.truncf %6 : vector<8x256xf32> to vector<8x256xbf16>
    %c0_6 = arith.constant 0 : index
    %c0_7 = arith.constant 0 : index
    %9 = vector.load %arg2[%c0_6, %c0_7] : memref<256x256xbf16, #tpu.memory_space<vmem>>, vector<256x256xbf16>
    %cst_8 = arith.constant dense<0.000000e+00> : vector<8x256xf32>
    %10 = tpu.matmul %8, %9, %cst_8 {dimension_numbers = #tpu.dot_dimension_numbers<[1], [0], [0], [1], [0, 0, 1, 1], [], []>} : vector<8x256xbf16>, vector<256x256xbf16>, vector<8x256xf32> -> vector<8x256xf32>
    %c0_9 = arith.constant 0 : index
    %c0_10 = arith.constant 0 : index
    %11 = vector.load %arg7[%c0_9, %c0_10] : memref<384x384xbf16, #tpu.memory_space<vmem>>, vector<256x128xbf16>
    %c0_11 = arith.constant 0 : index
    %c0_12 = arith.constant 0 : index
    %12 = vector.load %arg8[%c0_11, %c0_12] : memref<128x1024xbf16, #tpu.memory_space<vmem>>, vector<128x256xbf16>
    %c0_13 = arith.constant 0 : index
    %c0_14 = arith.constant 0 : index
    %13 = vector.load %arg9[%c0_13, %c0_14] : memref<2x1408xf32, #tpu.memory_space<vmem>>, vector<1x128xf32>
    %c1 = arith.constant 1 : index
    %c0_15 = arith.constant 0 : index
    %14 = vector.load %arg9[%c1, %c0_15] : memref<2x1408xf32, #tpu.memory_space<vmem>>, vector<1x128xf32>
    %cst_16 = arith.constant dense<0.000000e+00> : vector<256xf32>
    %15 = vector.multi_reduction <add>, %10, %cst_16 [0] : vector<8x256xf32> to vector<256xf32>
    %16 = vector.shape_cast %15 : vector<256xf32> to vector<1x256xf32>
    %17 = arith.mulf %10, %10 : vector<8x256xf32>
    %cst_17 = arith.constant dense<0.000000e+00> : vector<256xf32>
    %18 = vector.multi_reduction <add>, %17, %cst_17 [0] : vector<8x256xf32> to vector<256xf32>
    %19 = vector.shape_cast %18 : vector<256xf32> to vector<1x256xf32>
    %20 = tpu.concatenate %16, %19 in 0 : vector<1x256xf32>, vector<1x256xf32> -> vector<2x256xf32>
    %21 = arith.truncf %20 : vector<2x256xf32> to vector<2x256xbf16>
    %cst_18 = arith.constant dense<0.000000e+00> : vector<2x128xf32>
    %22 = tpu.matmul %21, %11, %cst_18 {dimension_numbers = #tpu.dot_dimension_numbers<[1], [0], [0], [1], [0, 0, 1, 1], [], []>} : vector<2x256xbf16>, vector<256x128xbf16>, vector<2x128xf32> -> vector<2x128xf32>
    %cst_19 = arith.constant 1.250000e-02 : f32
    %23 = vector.broadcast %cst_19 : f32 to vector<2x128xf32>
    %24 = arith.mulf %22, %23 : vector<2x128xf32>
    %25 = vector.extract_strided_slice %24 {offsets = [0, 0], sizes = [1, 128], strides = [1, 1]} : vector<2x128xf32> to vector<1x128xf32>
    %26 = vector.extract_strided_slice %24 {offsets = [1, 0], sizes = [1, 128], strides = [1, 1]} : vector<2x128xf32> to vector<1x128xf32>
    %27 = arith.mulf %25, %25 : vector<1x128xf32>
    %28 = arith.subf %26, %27 : vector<1x128xf32>
    %cst_20 = arith.constant 0.000000e+00 : f32
    %29 = vector.broadcast %cst_20 : f32 to vector<1x128xf32>
    %30 = arith.maximumf %28, %29 : vector<1x128xf32>
    %cst_21 = arith.constant 9.99999974E-6 : f32
    %31 = vector.broadcast %cst_21 : f32 to vector<1x128xf32>
    %32 = arith.addf %30, %31 : vector<1x128xf32>
    %33 = math.rsqrt %32 : vector<1x128xf32>
    %34 = arith.mulf %13, %33 : vector<1x128xf32>
    %35 = arith.mulf %25, %34 : vector<1x128xf32>
    %36 = arith.subf %14, %35 : vector<1x128xf32>
    %37 = tpu.concatenate %34, %36 in 0 : vector<1x128xf32>, vector<1x128xf32> -> vector<2x128xf32>
    %38 = arith.truncf %37 : vector<2x128xf32> to vector<2x128xbf16>
    %cst_22 = arith.constant dense<0.000000e+00> : vector<2x256xf32>
    %39 = tpu.matmul %38, %12, %cst_22 {dimension_numbers = #tpu.dot_dimension_numbers<[1], [0], [0], [1], [0, 0, 1, 1], [], []>} : vector<2x128xbf16>, vector<128x256xbf16>, vector<2x256xf32> -> vector<2x256xf32>
    %40 = vector.extract_strided_slice %39 {offsets = [0, 0], sizes = [1, 256], strides = [1, 1]} : vector<2x256xf32> to vector<1x256xf32>
    %41 = vector.broadcast %40 : vector<1x256xf32> to vector<8x256xf32>
    %42 = arith.mulf %10, %41 : vector<8x256xf32>
    %43 = vector.extract_strided_slice %39 {offsets = [1, 0], sizes = [1, 256], strides = [1, 1]} : vector<2x256xf32> to vector<1x256xf32>
    %44 = vector.broadcast %43 : vector<1x256xf32> to vector<8x256xf32>
    %45 = arith.addf %42, %44 : vector<8x256xf32>
    %cst_23 = arith.constant 2.000000e-01 : f32
    %46 = vector.broadcast %cst_23 : f32 to vector<8x256xf32>
    %47 = arith.mulf %46, %45 : vector<8x256xf32>
    %48 = arith.maximumf %45, %47 : vector<8x256xf32>
    %49 = arith.truncf %48 : vector<8x256xf32> to vector<8x256xbf16>
    %50 = tpu.concatenate %49, %1 in 1 : vector<8x256xbf16>, vector<8x128xbf16> -> vector<8x384xbf16>
    %c0_24 = arith.constant 0 : index
    %c0_25 = arith.constant 0 : index
    %51 = vector.load %arg3[%c0_24, %c0_25] : memref<384x384xbf16, #tpu.memory_space<vmem>>, vector<384x384xbf16>
    %cst_26 = arith.constant dense<0.000000e+00> : vector<8x384xf32>
    %52 = tpu.matmul %50, %51, %cst_26 {dimension_numbers = #tpu.dot_dimension_numbers<[1], [0], [0], [1], [0, 0, 1, 1], [], []>} : vector<8x384xbf16>, vector<384x384xbf16>, vector<8x384xf32> -> vector<8x384xf32>
    %c0_27 = arith.constant 0 : index
    %c128 = arith.constant 128 : index
    %53 = vector.load %arg7[%c0_27, %c128] : memref<384x384xbf16, #tpu.memory_space<vmem>>, vector<384x128xbf16>
    %c0_28 = arith.constant 0 : index
    %c256 = arith.constant 256 : index
    %54 = vector.load %arg8[%c0_28, %c256] : memref<128x1024xbf16, #tpu.memory_space<vmem>>, vector<128x384xbf16>
    %c0_29 = arith.constant 0 : index
    %c128_30 = arith.constant 128 : index
    %55 = vector.load %arg9[%c0_29, %c128_30] : memref<2x1408xf32, #tpu.memory_space<vmem>>, vector<1x128xf32>
    %c1_31 = arith.constant 1 : index
    %c128_32 = arith.constant 128 : index
    %56 = vector.load %arg9[%c1_31, %c128_32] : memref<2x1408xf32, #tpu.memory_space<vmem>>, vector<1x128xf32>
    %cst_33 = arith.constant dense<0.000000e+00> : vector<384xf32>
    %57 = vector.multi_reduction <add>, %52, %cst_33 [0] : vector<8x384xf32> to vector<384xf32>
    %58 = vector.shape_cast %57 : vector<384xf32> to vector<1x384xf32>
    %59 = arith.mulf %52, %52 : vector<8x384xf32>
    %cst_34 = arith.constant dense<0.000000e+00> : vector<384xf32>
    %60 = vector.multi_reduction <add>, %59, %cst_34 [0] : vector<8x384xf32> to vector<384xf32>
    %61 = vector.shape_cast %60 : vector<384xf32> to vector<1x384xf32>
    %62 = tpu.concatenate %58, %61 in 0 : vector<1x384xf32>, vector<1x384xf32> -> vector<2x384xf32>
    %63 = arith.truncf %62 : vector<2x384xf32> to vector<2x384xbf16>
    %cst_35 = arith.constant dense<0.000000e+00> : vector<2x128xf32>
    %64 = tpu.matmul %63, %53, %cst_35 {dimension_numbers = #tpu.dot_dimension_numbers<[1], [0], [0], [1], [0, 0, 1, 1], [], []>} : vector<2x384xbf16>, vector<384x128xbf16>, vector<2x128xf32> -> vector<2x128xf32>
    %cst_36 = arith.constant 0.0178571437 : f32
    %65 = vector.broadcast %cst_36 : f32 to vector<2x128xf32>
    %66 = arith.mulf %64, %65 : vector<2x128xf32>
    %67 = vector.extract_strided_slice %66 {offsets = [0, 0], sizes = [1, 128], strides = [1, 1]} : vector<2x128xf32> to vector<1x128xf32>
    %68 = vector.extract_strided_slice %66 {offsets = [1, 0], sizes = [1, 128], strides = [1, 1]} : vector<2x128xf32> to vector<1x128xf32>
    %69 = arith.mulf %67, %67 : vector<1x128xf32>
    %70 = arith.subf %68, %69 : vector<1x128xf32>
    %cst_37 = arith.constant 0.000000e+00 : f32
    %71 = vector.broadcast %cst_37 : f32 to vector<1x128xf32>
    %72 = arith.maximumf %70, %71 : vector<1x128xf32>
    %cst_38 = arith.constant 9.99999974E-6 : f32
    %73 = vector.broadcast %cst_38 : f32 to vector<1x128xf32>
    %74 = arith.addf %72, %73 : vector<1x128xf32>
    %75 = math.rsqrt %74 : vector<1x128xf32>
    %76 = arith.mulf %55, %75 : vector<1x128xf32>
    %77 = arith.mulf %67, %76 : vector<1x128xf32>
    %78 = arith.subf %56, %77 : vector<1x128xf32>
    %79 = tpu.concatenate %76, %78 in 0 : vector<1x128xf32>, vector<1x128xf32> -> vector<2x128xf32>
    %80 = arith.truncf %79 : vector<2x128xf32> to vector<2x128xbf16>
    %cst_39 = arith.constant dense<0.000000e+00> : vector<2x384xf32>
    %81 = tpu.matmul %80, %54, %cst_39 {dimension_numbers = #tpu.dot_dimension_numbers<[1], [0], [0], [1], [0, 0, 1, 1], [], []>} : vector<2x128xbf16>, vector<128x384xbf16>, vector<2x384xf32> -> vector<2x384xf32>
    %82 = vector.extract_strided_slice %81 {offsets = [0, 0], sizes = [1, 384], strides = [1, 1]} : vector<2x384xf32> to vector<1x384xf32>
    %83 = vector.broadcast %82 : vector<1x384xf32> to vector<8x384xf32>
    %84 = arith.mulf %52, %83 : vector<8x384xf32>
    %85 = vector.extract_strided_slice %81 {offsets = [1, 0], sizes = [1, 384], strides = [1, 1]} : vector<2x384xf32> to vector<1x384xf32>
    %86 = vector.broadcast %85 : vector<1x384xf32> to vector<8x384xf32>
    %87 = arith.addf %84, %86 : vector<8x384xf32>
    %cst_40 = arith.constant 2.000000e-01 : f32
    %88 = vector.broadcast %cst_40 : f32 to vector<8x384xf32>
    %89 = arith.mulf %88, %87 : vector<8x384xf32>
    %90 = arith.maximumf %87, %89 : vector<8x384xf32>
    %91 = arith.truncf %90 : vector<8x384xf32> to vector<8x384xbf16>
    %c0_41 = arith.constant 0 : index
    %c0_42 = arith.constant 0 : index
    %92 = vector.load %arg4[%c0_41, %c0_42] : memref<384x384xbf16, #tpu.memory_space<vmem>>, vector<384x384xbf16>
    %cst_43 = arith.constant dense<0.000000e+00> : vector<8x384xf32>
    %93 = tpu.matmul %91, %92, %cst_43 {dimension_numbers = #tpu.dot_dimension_numbers<[1], [0], [0], [1], [0, 0, 1, 1], [], []>} : vector<8x384xbf16>, vector<384x384xbf16>, vector<8x384xf32> -> vector<8x384xf32>
    %c0_44 = arith.constant 0 : index
    %c256_45 = arith.constant 256 : index
    %94 = vector.load %arg7[%c0_44, %c256_45] : memref<384x384xbf16, #tpu.memory_space<vmem>>, vector<384x128xbf16>
    %c0_46 = arith.constant 0 : index
    %c640 = arith.constant 640 : index
    %95 = vector.load %arg8[%c0_46, %c640] : memref<128x1024xbf16, #tpu.memory_space<vmem>>, vector<128x384xbf16>
    %c0_47 = arith.constant 0 : index
    %c256_48 = arith.constant 256 : index
    %96 = vector.load %arg9[%c0_47, %c256_48] : memref<2x1408xf32, #tpu.memory_space<vmem>>, vector<1x128xf32>
    %c1_49 = arith.constant 1 : index
    %c256_50 = arith.constant 256 : index
    %97 = vector.load %arg9[%c1_49, %c256_50] : memref<2x1408xf32, #tpu.memory_space<vmem>>, vector<1x128xf32>
    %cst_51 = arith.constant dense<0.000000e+00> : vector<384xf32>
    %98 = vector.multi_reduction <add>, %93, %cst_51 [0] : vector<8x384xf32> to vector<384xf32>
    %99 = vector.shape_cast %98 : vector<384xf32> to vector<1x384xf32>
    %100 = arith.mulf %93, %93 : vector<8x384xf32>
    %cst_52 = arith.constant dense<0.000000e+00> : vector<384xf32>
    %101 = vector.multi_reduction <add>, %100, %cst_52 [0] : vector<8x384xf32> to vector<384xf32>
    %102 = vector.shape_cast %101 : vector<384xf32> to vector<1x384xf32>
    %103 = tpu.concatenate %99, %102 in 0 : vector<1x384xf32>, vector<1x384xf32> -> vector<2x384xf32>
    %104 = arith.truncf %103 : vector<2x384xf32> to vector<2x384xbf16>
    %cst_53 = arith.constant dense<0.000000e+00> : vector<2x128xf32>
    %105 = tpu.matmul %104, %94, %cst_53 {dimension_numbers = #tpu.dot_dimension_numbers<[1], [0], [0], [1], [0, 0, 1, 1], [], []>} : vector<2x384xbf16>, vector<384x128xbf16>, vector<2x128xf32> -> vector<2x128xf32>
    %cst_54 = arith.constant 3.125000e-02 : f32
    %106 = vector.broadcast %cst_54 : f32 to vector<2x128xf32>
    %107 = arith.mulf %105, %106 : vector<2x128xf32>
    %108 = vector.extract_strided_slice %107 {offsets = [0, 0], sizes = [1, 128], strides = [1, 1]} : vector<2x128xf32> to vector<1x128xf32>
    %109 = vector.extract_strided_slice %107 {offsets = [1, 0], sizes = [1, 128], strides = [1, 1]} : vector<2x128xf32> to vector<1x128xf32>
    %110 = arith.mulf %108, %108 : vector<1x128xf32>
    %111 = arith.subf %109, %110 : vector<1x128xf32>
    %cst_55 = arith.constant 0.000000e+00 : f32
    %112 = vector.broadcast %cst_55 : f32 to vector<1x128xf32>
    %113 = arith.maximumf %111, %112 : vector<1x128xf32>
    %cst_56 = arith.constant 9.99999974E-6 : f32
    %114 = vector.broadcast %cst_56 : f32 to vector<1x128xf32>
    %115 = arith.addf %113, %114 : vector<1x128xf32>
    %116 = math.rsqrt %115 : vector<1x128xf32>
    %117 = arith.mulf %96, %116 : vector<1x128xf32>
    %118 = arith.mulf %108, %117 : vector<1x128xf32>
    %119 = arith.subf %97, %118 : vector<1x128xf32>
    %120 = tpu.concatenate %117, %119 in 0 : vector<1x128xf32>, vector<1x128xf32> -> vector<2x128xf32>
    %121 = arith.truncf %120 : vector<2x128xf32> to vector<2x128xbf16>
    %cst_57 = arith.constant dense<0.000000e+00> : vector<2x384xf32>
    %122 = tpu.matmul %121, %95, %cst_57 {dimension_numbers = #tpu.dot_dimension_numbers<[1], [0], [0], [1], [0, 0, 1, 1], [], []>} : vector<2x128xbf16>, vector<128x384xbf16>, vector<2x384xf32> -> vector<2x384xf32>
    %123 = vector.extract_strided_slice %122 {offsets = [0, 0], sizes = [1, 384], strides = [1, 1]} : vector<2x384xf32> to vector<1x384xf32>
    %124 = vector.broadcast %123 : vector<1x384xf32> to vector<8x384xf32>
    %125 = arith.mulf %93, %124 : vector<8x384xf32>
    %126 = vector.extract_strided_slice %122 {offsets = [1, 0], sizes = [1, 384], strides = [1, 1]} : vector<2x384xf32> to vector<1x384xf32>
    %127 = vector.broadcast %126 : vector<1x384xf32> to vector<8x384xf32>
    %128 = arith.addf %125, %127 : vector<8x384xf32>
    %cst_58 = arith.constant 2.000000e-01 : f32
    %129 = vector.broadcast %cst_58 : f32 to vector<8x384xf32>
    %130 = arith.mulf %129, %128 : vector<8x384xf32>
    %131 = arith.maximumf %128, %130 : vector<8x384xf32>
    %132 = arith.truncf %131 : vector<8x384xf32> to vector<8x384xbf16>
    %c0_59 = arith.constant 0 : index
    %c0_60 = arith.constant 0 : index
    %133 = vector.load %arg5[%c0_59, %c0_60] : memref<384x1024xbf16, #tpu.memory_space<vmem>>, vector<384x1024xbf16>
    %cst_61 = arith.constant dense<0.000000e+00> : vector<8x1024xf32>
    %134 = tpu.matmul %132, %133, %cst_61 {dimension_numbers = #tpu.dot_dimension_numbers<[1], [0], [0], [1], [0, 0, 1, 1], [], []>} : vector<8x384xbf16>, vector<384x1024xbf16>, vector<8x1024xf32> -> vector<8x1024xf32>
    %c0_62 = arith.constant 0 : index
    %c384 = arith.constant 384 : index
    %135 = vector.load %arg9[%c0_62, %c384] : memref<2x1408xf32, #tpu.memory_space<vmem>>, vector<1x1024xf32>
    %c1_63 = arith.constant 1 : index
    %c384_64 = arith.constant 384 : index
    %136 = vector.load %arg9[%c1_63, %c384_64] : memref<2x1408xf32, #tpu.memory_space<vmem>>, vector<1x1024xf32>
    %cst_65 = arith.constant dense<0.000000e+00> : vector<1024xf32>
    %137 = vector.multi_reduction <add>, %134, %cst_65 [0] : vector<8x1024xf32> to vector<1024xf32>
    %138 = vector.shape_cast %137 : vector<1024xf32> to vector<1x1024xf32>
    %cst_66 = arith.constant 1.250000e-01 : f32
    %139 = vector.broadcast %cst_66 : f32 to vector<1x1024xf32>
    %140 = arith.mulf %138, %139 : vector<1x1024xf32>
    %141 = arith.mulf %134, %134 : vector<8x1024xf32>
    %cst_67 = arith.constant dense<0.000000e+00> : vector<1024xf32>
    %142 = vector.multi_reduction <add>, %141, %cst_67 [0] : vector<8x1024xf32> to vector<1024xf32>
    %143 = vector.shape_cast %142 : vector<1024xf32> to vector<1x1024xf32>
    %cst_68 = arith.constant 1.250000e-01 : f32
    %144 = vector.broadcast %cst_68 : f32 to vector<1x1024xf32>
    %145 = arith.mulf %143, %144 : vector<1x1024xf32>
    %146 = arith.mulf %140, %140 : vector<1x1024xf32>
    %147 = arith.subf %145, %146 : vector<1x1024xf32>
    %cst_69 = arith.constant 0.000000e+00 : f32
    %148 = vector.broadcast %cst_69 : f32 to vector<1x1024xf32>
    %149 = arith.maximumf %147, %148 : vector<1x1024xf32>
    %cst_70 = arith.constant 9.99999974E-6 : f32
    %150 = vector.broadcast %cst_70 : f32 to vector<1x1024xf32>
    %151 = arith.addf %149, %150 : vector<1x1024xf32>
    %152 = math.rsqrt %151 : vector<1x1024xf32>
    %153 = arith.mulf %135, %152 : vector<1x1024xf32>
    %154 = arith.mulf %140, %153 : vector<1x1024xf32>
    %155 = arith.subf %136, %154 : vector<1x1024xf32>
    %156 = vector.broadcast %153 : vector<1x1024xf32> to vector<8x1024xf32>
    %157 = arith.mulf %134, %156 : vector<8x1024xf32>
    %158 = vector.broadcast %155 : vector<1x1024xf32> to vector<8x1024xf32>
    %159 = arith.addf %157, %158 : vector<8x1024xf32>
    %cst_71 = arith.constant 2.000000e-01 : f32
    %160 = vector.broadcast %cst_71 : f32 to vector<8x1024xf32>
    %161 = arith.mulf %160, %159 : vector<8x1024xf32>
    %162 = arith.maximumf %159, %161 : vector<8x1024xf32>
    %163 = arith.truncf %162 : vector<8x1024xf32> to vector<8x1024xbf16>
    %164 = tpu.concatenate %163, %1 in 1 : vector<8x1024xbf16>, vector<8x128xbf16> -> vector<8x1152xbf16>
    %c0_72 = arith.constant 0 : index
    %c0_73 = arith.constant 0 : index
    %165 = vector.load %arg6[%c0_72, %c0_73] : memref<1152x128xbf16, #tpu.memory_space<vmem>>, vector<1152x128xbf16>
    %cst_74 = arith.constant dense<0.000000e+00> : vector<8x128xf32>
    %166 = tpu.matmul %164, %165, %cst_74 {dimension_numbers = #tpu.dot_dimension_numbers<[1], [0], [0], [1], [0, 0, 1, 1], [], []>} : vector<8x1152xbf16>, vector<1152x128xbf16>, vector<8x128xf32> -> vector<8x128xf32>
    %167 = tpu.iota {dimensions = array<i32: 1>} : vector<8x128xi32>
    %c1_i32 = arith.constant 1 : i32
    %168 = vector.broadcast %c1_i32 : i32 to vector<8x128xi32>
    %169 = arith.cmpi eq, %167, %168 : vector<8x128xi32>
    %cst_75 = arith.constant 0.000000e+00 : f32
    %170 = vector.broadcast %cst_75 : f32 to vector<8x128xf32>
    %171 = arith.subf %170, %166 : vector<8x128xf32>
    %172 = math.exp %171 : vector<8x128xf32>
    %cst_76 = arith.constant 1.000000e+00 : f32
    %173 = vector.broadcast %cst_76 : f32 to vector<8x128xf32>
    %174 = arith.addf %173, %172 : vector<8x128xf32>
    %cst_77 = arith.constant 1.000000e+00 : f32
    %175 = vector.broadcast %cst_77 : f32 to vector<8x128xf32>
    %176 = arith.divf %175, %174 : vector<8x128xf32>
    %177 = arith.select %169, %176, %166 : vector<8x128xi1>, vector<8x128xf32>
    %c0_78 = arith.constant 0 : index
    %c0_79 = arith.constant 0 : index
    %178 = vector.load %arg11[%c0_78, %c0_79] : memref<8x128xf32, #tpu.memory_space<vmem>>, vector<8x128xf32>
    tpu.vector_store %arg11[%c0_78, %c0_79], %177 {strides = array<i32>} : memref<8x128xf32, #tpu.memory_space<vmem>>, vector<8x128xf32>,
    return
  }
}

</mosaic_0001>

<bundles_post_ra>
// kernel: squeeze.0
= control target key start
LH: loop header
LB: loop body
LE: loop exit
PB: predicated region body
PF: predicated region fallthrough
CT: control target
= control target key end

     0   :  { %s755_s12 = smov 3  ;;  %s766_s19 = smov 12  ;;  %vm290_vm0 = vcmask 1043458   ;;  %vm295_vm1 = vcmask 1045508   ;;  %vm300_vm2 = vcmask 1047558   ;;  %vm259_vm3 = vcmask 1047556   ;;  %s894_s0 = inlined_call_operand.vmem [shape: bf16[8,1,16,16], index: 0, kind: input, shape index: {}]   ;;  %s895_s1 = inlined_call_operand.vmem [shape: bf16[8,256], index: 1, kind: output, shape index: {}]  }
   0x1   :  { %v680_v0 = vld [vmem:[%s894_s0 + $0x38] sm:$0xff]   ;;  %v681_v1 = vld [vmem:[%s894_s0 + $0x30] sm:$0xff]   ;;  %v682_v2 = vld [vmem:[%s894_s0 + $0x28] sm:$0xff]   ;;  %s768_s20 = smov 48  ;;  %s778_s25 = smov 3  ;;  %vm261_vm4 = vcmask 130048  }
   0x2   :  { %v645_v3 = vunpack.c.l.bf16 %v680_v0  ;;  %v646_v4 = vunpack.c.h.bf16 %v680_v0  ;;  %v649_v5 = vunpack.c.l.bf16 %v681_v1  ;;  %v650_v6 = vunpack.c.h.bf16 %v681_v1  ;;  %v683_v7 = vld [vmem:[%s894_s0 + $0x20] sm:$0xff]   ;;  %v684_v8 = vld [vmem:[%s894_s0 + $0x18] sm:$0xff]   ;;  %v685_v9 = vld [vmem:[%s894_s0 + $0x10] sm:$0xff]   ;;  %s780_s26 = smov 12  ;;  %s782_s27 = smov 48 }
   0x3   :  { %v653_v10 = vunpack.c.l.bf16 %v682_v2  ;;  %v654_v11 = vunpack.c.h.bf16 %v682_v2  ;;  %v657_v12 = vunpack.c.l.bf16 %v683_v7  ;;  %v658_v13 = vunpack.c.h.bf16 %v683_v7  ;;  %v686_v14 = vld [vmem:[%s894_s0 + $0x8] sm:$0xff]   ;;  %v672_v15 = vld [vmem:[%s894_s0] sm:$0xff]   ;;  %s776_s0 = smov 192  ;;  %s784_s28 = smov 192 }
   0x4   :  { %20 = vst [vmem:[#allocation1 + $0x78] sm:$0xff] %v646_v4  ;;  %36 = vst [vmem:[#allocation1 + $0x70] sm:$0xff] %v645_v3  ;;  %v661_v16 = vunpack.c.l.bf16 %v684_v8  ;;  %v662_v17 = vunpack.c.h.bf16 %v684_v8  ;;  %v665_v18 = vunpack.c.l.bf16 %v685_v9  ;;  %v666_v19 = vunpack.c.h.bf16 %v685_v9  ;;  %s786_s29 = smov 3  ;;  %s788_s30 = smov 12 }
   0x5   :  { %52 = vst [vmem:[#allocation1 + $0x68] sm:$0xff] %v650_v6  ;;  %68 = vst [vmem:[#allocation1 + $0x60] sm:$0xff] %v649_v5  ;;  %v669_v20 = vunpack.c.l.bf16 %v686_v14  ;;  %v670_v21 = vunpack.c.h.bf16 %v686_v14  ;;  %v673_v22 = vunpack.c.l.bf16 %v672_v15  ;;  %v674_v23 = vunpack.c.h.bf16 %v672_v15  ;;  %s790_s2 = smov 48  ;;  %s792_s3 = smov 192 }
   0x6   :  { %84 = vst [vmem:[#allocation1 + $0x58] sm:$0xff] %v654_v11  ;;  %100 = vst [vmem:[#allocation1 + $0x50] sm:$0xff] %v653_v10  ;;  %s794_s4 = smov 3  ;;  %s796_s5 = smov 12  ;;  %vm304_vm5 = vcmask 1048448   ;;  %vm349_vm6 = vcmask 917248  }
   0x7   :  { %116 = vst [vmem:[#allocation1 + $0x48] sm:$0xff] %v658_v13  ;;  %132 = vst [vmem:[#allocation1 + $0x40] sm:$0xff] %v657_v12  ;;  %s798_s6 = smov 48  ;;  %s800_s7 = smov 192  ;;  %vm394_vm7 = vcmask 786048   ;;  %vm439_vm8 = vcmask 654848  }
   0x8   :  { %148 = vst [vmem:[#allocation1 + $0x38] sm:$0xff] %v662_v17  ;;  %164 = vst [vmem:[#allocation1 + $0x30] sm:$0xff] %v661_v16  ;;  %s802_s8 = smov 3  ;;  %s804_s9 = smov 12  ;;  %vm484_vm9 = vcmask 523648   ;;  %vm529_vm10 = vcmask 392448  }
   0x9   :  { %180 = vst [vmem:[#allocation1 + $0x28] sm:$0xff] %v666_v19  ;;  %196 = vst [vmem:[#allocation1 + $0x20] sm:$0xff] %v665_v18  ;;  %s806_s10 = smov 48  ;;  %s808_s11 = smov 192  ;;  %vm574_vm11 = vcmask 261248  }
   0xa   :  { %212 = vst [vmem:[#allocation1 + $0x18] sm:$0xff] %v670_v21  ;;  %228 = vst [vmem:[#allocation1 + $0x10] sm:$0xff] %v669_v20  ;;  %s810_s13 = smov 3  ;;  %s812_s14 = smov 12 }
   0xb   :  { %243 = vst [vmem:[#allocation1 + $0x8] sm:$0xff] %v674_v23  ;;  %256 = vst [vmem:[#allocation1] sm:$0xff] %v673_v22  ;;  %s814_s15 = smov 48  ;;  %s365_s16 = smov 192 }
   0xc   :  { %s420_s17 = smov 3  ;;  %s423_s18 = smov 12 }
   0xd   :  { %s730_s21 = smov 80   ;;  %s442_s22 = smov 3 }
   0xe   :  { %s445_s23 = smov 12  ;;  %s450_s24 = smov 48 }
  0x12   :  { %v286_v24 = vld [vmem:[#allocation1 + $0x7] ss:$16 sm:%s755_s12]   ;;  %v308_v29 = vld [vmem:[#allocation1 + $0xf] ss:$16 sm:%s778_s25]   ;;  %v376_v35 = vld [vmem:[#allocation1 + $0x5] ss:$16 sm:%s786_s29]  }
  0x13   :  { %v289_v25 = vld [vmem:[#allocation1 + $0x7] ss:$16 sm:%s766_s19]   ;;  %v311_v30 = vld [vmem:[#allocation1 + $0xf] ss:$16 sm:%s780_s26]   ;;  %v379_v38 = vld [vmem:[#allocation1 + $0x5] ss:$16 sm:%s788_s30]  }
  0x14   :  { %v294_v26 = vld [vmem:[#allocation1 + $0x7] ss:$16 sm:%s768_s20]   ;;  %v291_v27 = vsel %vm290_vm0, %v289_v25, %v286_v24  ;;  %v313_v32 = vsel %vm290_vm0, %v311_v30, %v308_v29  ;;  %v316_v33 = vld [vmem:[#allocation1 + $0xf] ss:$16 sm:%s782_s27]   ;;  %v384_v39 = vld [vmem:[#allocation1 + $0x5] ss:$16 sm:%s790_s2]   ;;  %v381_v42 = vsel %vm290_vm0, %v379_v38, %v376_v35 }
  0x15   :  { %v299_v28 = vld [vmem:[#allocation1 + $0x7] ss:$16 sm:%s776_s0]   ;;  %v296_v31 = vsel %vm295_vm1, %v294_v26, %v291_v27  ;;  %v321_v34 = vld [vmem:[#allocation1 + $0xf] ss:$16 sm:%s784_s28]   ;;  %v318_v37 = vsel %vm295_vm1, %v316_v33, %v313_v32  ;;  %v389_v40 = vld [vmem:[#allocation1 + $0x5] ss:$16 sm:%s792_s3]   ;;  %v386_v47 = vsel %vm295_vm1, %v384_v39, %v381_v42 }
  0x16   :  { %v301_v36 = vsel %vm300_vm2, %v299_v28, %v296_v31  ;;  %v323_v41 = vsel %vm300_vm2, %v321_v34, %v318_v37  ;;  %v398_v43 = vld [vmem:[#allocation1 + $0xd] ss:$16 sm:%s794_s4]   ;;  %v331_v50 = vld [vmem:[#allocation1 + $0x6] ss:$16 sm:%s802_s8]   ;;  %v391_v52 = vsel %vm300_vm2, %v389_v40, %v386_v47  ;;  %v353_v57 = vld [vmem:[#allocation1 + $0xe] ss:$16 sm:%s810_s13]  }
  0x17   :  { %v401_v44 = vld [vmem:[#allocation1 + $0xd] ss:$16 sm:%s796_s5]   ;;  %v694_v46 = vpack.i.bf16 %v323_v41, %v301_v36  ;;  %v334_v51 = vld [vmem:[#allocation1 + $0x6] ss:$16 sm:%s804_s9]   ;;  %s729_s12 = smov 112   ;;  %s428_s19 = smov 48 }
  0x18   :  { %v406_v45 = vld [vmem:[#allocation1 + $0xd] ss:$16 sm:%s798_s6]   ;;  %v403_v48 = vsel %vm290_vm0, %v401_v44, %v398_v43  ;;  %v336_v54 = vsel %vm290_vm0, %v334_v51, %v331_v50  ;;  %v339_v55 = vld [vmem:[#allocation1 + $0x6] ss:$16 sm:%s806_s10]   ;;  %v356_v60 = vld [vmem:[#allocation1 + $0xe] ss:$16 sm:%s812_s14]  }
  0x19   :  { %v411_v49 = vld [vmem:[#allocation1 + $0xd] ss:$16 sm:%s800_s7]   ;;  %v408_v53 = vsel %vm295_vm1, %v406_v45, %v403_v48  ;;  %v344_v56 = vld [vmem:[#allocation1 + $0x6] ss:$16 sm:%s808_s11]   ;;  %695 = vrot.lane.b32.xlu0 %v694_v46, %s729_s12  ;;  %v341_v59 = vsel %vm295_vm1, %v339_v55, %v336_v54  ;;  %v361_v61 = vld [vmem:[#allocation1 + $0xe] ss:$16 sm:%s814_s15]   ;;  %v358_v0 = vsel %vm290_vm0, %v356_v60, %v353_v57 }
  0x1a   :  { %v413_v58 = vsel %vm300_vm2, %v411_v49, %v408_v53  ;;  %v346_v63 = vsel %vm300_vm2, %v344_v56, %v341_v59  ;;  %v366_v1 = vld [vmem:[#allocation1 + $0xe] ss:$16 sm:%s365_s16]   ;;  %v421_v2 = vld [vmem:[#allocation1 + $0x4] ss:$16 sm:%s420_s17]   ;;  %v363_v3 = vsel %vm295_vm1, %v361_v61, %v358_v0  ;;  %s433_s20 = smov 192  ;;  %s455_s0 = smov 192 }
  0x1b   :  { %v704_v62 = vpack.i.bf16 %v413_v58, %v391_v52  ;;  %v424_v4 = vld [vmem:[#allocation1 + $0x4] ss:$16 sm:%s423_s18]   ;;  %v368_v6 = vsel %vm300_vm2, %v366_v1, %v363_v3  ;;  %v443_v11 = vld [vmem:[#allocation1 + $0xc] ss:$16 sm:%s442_s22]   ;;  %s465_s25 = smov 3  ;;  %s468_s26 = smov 12 }
  0x1c   :  { %v429_v5 = vld [vmem:[#allocation1 + $0x4] ss:$16 sm:%s428_s19]   ;;  %v426_v7 = vsel %vm290_vm0, %v424_v4, %v421_v2  ;;  %v699_v9 = vpack.i.bf16 %v368_v6, %v346_v63  ;;  %v446_v12 = vld [vmem:[#allocation1 + $0xc] ss:$16 sm:%s445_s23]   ;;  %s731_s27 = smov 96   ;;  %s473_s28 = smov 48 }
  0x1d   :  { %705 = vrot.lane.b32.xlu1 %v704_v62, %s730_s21  ;;  %v434_v8 = vld [vmem:[#allocation1 + $0x4] ss:$16 sm:%s433_s20]   ;;  %v431_v10 = vsel %vm295_vm1, %v429_v5, %v426_v7  ;;  %v448_v14 = vsel %vm290_vm0, %v446_v12, %v443_v11  ;;  %v451_v15 = vld [vmem:[#allocation1 + $0xc] ss:$16 sm:%s450_s24]   ;;  %v466_v18 = vld [vmem:[#allocation1 + $0x3] ss:$16 sm:%s465_s25]  }
  0x1e   :  { %v436_v13 = vsel %vm300_vm2, %v434_v8, %v431_v10  ;;  %v456_v16 = vld [vmem:[#allocation1 + $0xc] ss:$16 sm:%s455_s0]   ;;  %700 = vrot.lane.b32.xlu0 %v699_v9, %s731_s27  ;;  %v453_v17 = vsel %vm295_vm1, %v451_v15, %v448_v14  ;;  %v469_v19 = vld [vmem:[#allocation1 + $0x3] ss:$16 sm:%s468_s26]   ;;  %s478_s29 = smov 192  ;;  %s487_s30 = smov 3 }
  0x1f   :  { %v458_v20 = vsel %vm300_vm2, %v456_v16, %v453_v17  ;;  %v471_v21 = vsel %vm290_vm0, %v469_v19, %v466_v18  ;;  %v474_v22 = vld [vmem:[#allocation1 + $0x3] ss:$16 sm:%s473_s28]   ;;  %v488_v26 = vld [vmem:[#allocation1 + $0xb] ss:$16 sm:%s487_s30]   ;;  %s490_s2 = smov 12  ;;  %s495_s3 = smov 48 }
  0x20   :  { %v479_v23 = vld [vmem:[#allocation1 + $0x3] ss:$16 sm:%s478_s29]   ;;  %v709_v24 = vpack.i.bf16 %v458_v20, %v436_v13  ;;  %v476_v25 = vsel %vm295_vm1, %v474_v22, %v471_v21  ;;  %v491_v27 = vld [vmem:[#allocation1 + $0xb] ss:$16 sm:%s490_s2]   ;;  %s500_s4 = smov 192  ;;  %s510_s5 = smov 3 }
  0x21   :  { %v496_v28 = vld [vmem:[#allocation1 + $0xb] ss:$16 sm:%s495_s3]   ;;  %s732_s6 = smov 64   ;;  %v481_v29 = vsel %vm300_vm2, %v479_v23, %v476_v25  ;;  %v493_v30 = vsel %vm290_vm0, %v491_v27, %v488_v26  ;;  %v511_v32 = vld [vmem:[#allocation1 + $0x2] ss:$16 sm:%s510_s5]   ;;  %s513_s7 = smov 12 }
  0x22   :  { %710 = vrot.lane.b32.xlu1 %v709_v24, %s732_s6  ;;  %v501_v31 = vld [vmem:[#allocation1 + $0xb] ss:$16 sm:%s500_s4]   ;;  %s518_s8 = smov 48  ;;  %v498_v33 = vsel %vm295_vm1, %v496_v28, %v493_v30  ;;  %v514_v34 = vld [vmem:[#allocation1 + $0x2] ss:$16 sm:%s513_s7]   ;;  %s523_s9 = smov 192 }
  0x23   :  { %v519_v35 = vld [vmem:[#allocation1 + $0x2] ss:$16 sm:%s518_s8]   ;;  %v503_v36 = vsel %vm300_vm2, %v501_v31, %v498_v33  ;;  %v516_v37 = vsel %vm290_vm0, %v514_v34, %v511_v32  ;;  %s532_s10 = smov 3  ;;  %s535_s11 = smov 12 }
  0x24   :  { %v524_v38 = vld [vmem:[#allocation1 + $0x2] ss:$16 sm:%s523_s9]   ;;  %v714_v39 = vpack.i.bf16 %v503_v36, %v481_v29  ;;  %v521_v40 = vsel %vm295_vm1, %v519_v35, %v516_v37  ;;  %v533_v41 = vld [vmem:[#allocation1 + $0xa] ss:$16 sm:%s532_s10]   ;;  %s540_s13 = smov 48  ;;  %s545_s14 = smov 192 }
  0x25   :  { %v536_v42 = vld [vmem:[#allocation1 + $0xa] ss:$16 sm:%s535_s11]   ;;  %v526_v43 = vsel %vm300_vm2, %v524_v38, %v521_v40  ;;  %s555_s15 = smov 3  ;;  %s558_s12 = smov 12 }
  0x26   :  { %v538_v44 = vsel %vm290_vm0, %v536_v42, %v533_v41  ;;  %v541_v45 = vld [vmem:[#allocation1 + $0xa] ss:$16 sm:%s540_s13]   ;;  %s733_s16 = smov 48   ;;  %v556_v48 = vld [vmem:[#allocation1 + $0x1] ss:$16 sm:%s555_s15]   ;;  %s563_s17 = smov 48 }
  0x27   :  { %v546_v46 = vld [vmem:[#allocation1 + $0xa] ss:$16 sm:%s545_s14]   ;;  %715 = vrot.lane.b32.xlu0 %v714_v39, %s733_s16  ;;  %v543_v47 = vsel %vm295_vm1, %v541_v45, %v538_v44  ;;  %v559_v49 = vld [vmem:[#allocation1 + $0x1] ss:$16 sm:%s558_s12]   ;;  %s568_s18 = smov 192  ;;  %s577_s19 = smov 3 }
  0x28   :  { %v258_v50 = vld [vmem:[#allocation1] ss:$8 sm:$0xf0]   ;;  %v548_v51 = vsel %vm300_vm2, %v546_v46, %v543_v47  ;;  %v561_v52 = vsel %vm290_vm0, %v559_v49, %v556_v48  ;;  %v564_v53 = vld [vmem:[#allocation1 + $0x1] ss:$16 sm:%s563_s17]   ;;  %s580_s20 = smov 12 }
  0x29   :  { %v569_v54 = vld [vmem:[#allocation1 + $0x1] ss:$16 sm:%s568_s18]   ;;  %v270_v55 = vld [vmem:[#allocation1 + $0x40] ss:$8 sm:$0xf]   ;;  %v719_v56 = vpack.i.bf16 %v548_v51, %v526_v43  ;;  %v566_v57 = vsel %vm295_vm1, %v564_v53, %v561_v52  ;;  %s585_s21 = smov 48 }
  0x2a   :  { %v578_v58 = vld [vmem:[#allocation1 + $0x9] ss:$16 sm:%s577_s19]   ;;  %s590_s22 = smov 192  ;;  %s734_s23 = smov 32   ;;  %v571_v61 = vsel %vm300_vm2, %v569_v54, %v566_v57 }
  0x2b   :  { %v581_v59 = vld [vmem:[#allocation1 + $0x9] ss:$16 sm:%s580_s20]   ;;  %720 = vrot.lane.b32.xlu1 %v719_v56, %s734_s23  ;;  %v257_v0 = vld [vmem:[#allocation1] ss:$8 sm:$0xf]   ;;  %s735_s24 = smov 16  }
  0x2c   :  { %v586_v60 = vld [vmem:[#allocation1 + $0x9] ss:$16 sm:%s585_s21]   ;;  %v583_v62 = vsel %vm290_vm0, %v581_v59, %v578_v58  ;;  %v260_v2 = vsel %vm259_vm3, %v258_v50, %v257_v0  ;;  %v272_v3 = vld [vmem:[#allocation1 + $0x40] ss:$8 sm:$0xf0]  }
  0x2d   :  { %v591_v63 = vld [vmem:[#allocation1 + $0x9] ss:$16 sm:%s590_s22]   ;;  %v588_v1 = vsel %vm295_vm1, %v586_v60, %v583_v62  ;;  %262 = vst.msk [vmem:[#allocation0] ss:$8 sm:$0x3] %vm261_vm4, %v260_v2   ;;  %v274_v5 = vsel %vm259_vm3, %v272_v3, %v270_v55 }
  0x2e   :  { %v593_v4 = vsel %vm300_vm2, %v591_v63, %v588_v1  ;;  %264 = vst.msk [vmem:[#allocation0 - $0xf] ss:$8 sm:$0xc] %vm261_vm4, %v260_v2   ;;  %266 = vst.msk [vmem:[#allocation0 - $0x1e] ss:$8 sm:$0x30] %vm261_vm4, %v260_v2  }
  0x2f   :  { %268 = vst.msk [vmem:[#allocation0 - $0x2d] ss:$8 sm:$0xc0] %vm261_vm4, %v260_v2   ;;  %v724_v6 = vpack.i.bf16 %v593_v4, %v571_v61  ;;  %277 = vst.msk [vmem:[#allocation0 + $0x4] ss:$8 sm:$0x3] %vm261_vm4, %v274_v5  }
  0x30   :  { %279 = vst.msk [vmem:[#allocation0 - $0xb] ss:$8 sm:$0xc] %vm261_vm4, %v274_v5   ;;  %281 = vst.msk [vmem:[#allocation0 - $0x1a] ss:$8 sm:$0x30] %vm261_vm4, %v274_v5  }
  0x31   :  { %283 = vst.msk [vmem:[#allocation0 - $0x29] ss:$8 sm:$0xc0] %vm261_vm4, %v274_v5   ;;  %725 = vrot.lane.b32.xlu0 %v724_v6, %s735_s24 }
  0x8b   :  { %v696_v7 = vpop.permute.xlu0 %695 }
  0x8c   :  { %v698_v8 = vunpack.i.h.bf16 %v696_v7  ;;  %v697_v9 = vunpack.i.l.bf16 %v696_v7 }
  0x8e   :  { %305 = vst.msk [vmem:[#allocation0] sm:$0xff] %vm304_vm5, %v697_v9   ;;  %328 = vst.msk [vmem:[#allocation0 + $0x8] sm:$0xff] %vm304_vm5, %v698_v8  }
  0x8f   :  { %v706_v10 = vpop.permute.xlu1 %705 }
  0x90   :  { %v701_v11 = vpop.permute.xlu0 %700  ;;  %v708_v14 = vunpack.i.h.bf16 %v706_v10  ;;  %v707_v15 = vunpack.i.l.bf16 %v706_v10 }
  0x91   :  { %v703_v12 = vunpack.i.h.bf16 %v701_v11  ;;  %v702_v13 = vunpack.i.l.bf16 %v701_v11 }
  0x93   :  { %350 = vst.msk [vmem:[#allocation0] sm:$0xff] %vm349_vm6, %v702_v13   ;;  %373 = vst.msk [vmem:[#allocation0 + $0x8] sm:$0xff] %vm349_vm6, %v703_v12  }
  0x94   :  { %395 = vst.msk [vmem:[#allocation0] sm:$0xff] %vm394_vm7, %v707_v15   ;;  %418 = vst.msk [vmem:[#allocation0 + $0x8] sm:$0xff] %vm394_vm7, %v708_v14   ;;  %v711_v16 = vpop.permute.xlu1 %710 }
  0x95   :  { %v713_v17 = vunpack.i.h.bf16 %v711_v16  ;;  %v712_v18 = vunpack.i.l.bf16 %v711_v16 }
  0x97   :  { %440 = vst.msk [vmem:[#allocation0] sm:$0xff] %vm439_vm8, %v712_v18   ;;  %463 = vst.msk [vmem:[#allocation0 + $0x8] sm:$0xff] %vm439_vm8, %v713_v17  }
  0x99   :  { %v716_v19 = vpop.permute.xlu0 %715 }
  0x9a   :  { %v718_v20 = vunpack.i.h.bf16 %v716_v19  ;;  %v717_v21 = vunpack.i.l.bf16 %v716_v19 }
  0x9c   :  { %485 = vst.msk [vmem:[#allocation0] sm:$0xff] %vm484_vm9, %v717_v21   ;;  %508 = vst.msk [vmem:[#allocation0 + $0x8] sm:$0xff] %vm484_vm9, %v718_v20  }
  0x9d   :  { %v721_v22 = vpop.permute.xlu1 %720 }
  0x9e   :  { %v723_v23 = vunpack.i.h.bf16 %v721_v22  ;;  %v722_v24 = vunpack.i.l.bf16 %v721_v22 }
  0xa0   :  { %530 = vst.msk [vmem:[#allocation0] sm:$0xff] %vm529_vm10, %v722_v24   ;;  %553 = vst.msk [vmem:[#allocation0 + $0x8] sm:$0xff] %vm529_vm10, %v723_v23  }
  0xa3   :  { %v726_v25 = vpop.permute.xlu0 %725 }
  0xa4   :  { %v728_v26 = vunpack.i.h.bf16 %v726_v25  ;;  %v727_v27 = vunpack.i.l.bf16 %v726_v25 }
  0xa6   :  { %575 = vst.msk [vmem:[#allocation0] sm:$0xff] %vm574_vm11, %v727_v27   ;;  %598 = vst.msk [vmem:[#allocation0 + $0x8] sm:$0xff] %vm574_vm11, %v728_v26  }
  0xad   :  { %v603_v28 = vld [vmem:[#allocation0] sm:$0xff]  ;;  %v608_v29 = vld [vmem:[#allocation0 + $0x8] sm:$0xff] }
  0xae   :  { %v678_v30 = vpack.c.bf16 %v608_v29, %v603_v28 }
  0xb0   :  { %679 = vst [vmem:[%s895_s1] sm:$0xff] %v678_v30  }

// kernel: _discriminator_forward.1
= control target key start
LH: loop header
LB: loop body
LE: loop exit
PB: predicated region body
PF: predicated region fallthrough
CT: control target
= control target key end

     0   :  { %17 = vsyncpa [#allocation3], 0  ;;  %s8767_s0 = inlined_call_operand.vmem [shape: bf16[8,384], index: 0, kind: input, shape index: {}]   ;;  %s8768_s1 = inlined_call_operand.hbm [shape: bf16[384,256], index: 1, kind: input, shape index: {}]   ;;  %s8769_s2 = inlined_call_operand.vmem [shape: bf16[256,256], index: 2, kind: input, shape index: {}]   ;;  %s8770_s3 = inlined_call_operand.hbm [shape: bf16[384,384], index: 3, kind: input, shape index: {}]   ;;  %s8771_s4 = inlined_call_operand.hbm [shape: bf16[384,384], index: 4, kind: input, shape index: {}]   ;;  %s8772_s5 = inlined_call_operand.hbm [shape: bf16[384,1024], index: 5, kind: input, shape index: {}]   ;;  %s8773_s6 = inlined_call_operand.hbm [shape: bf16[1152,128], index: 6, kind: input, shape index: {}]   ;;  %s8774_s7 = inlined_call_operand.hbm [shape: bf16[384,384], index: 7, kind: input, shape index: {}]   ;;  %s8775_s8 = inlined_call_operand.hbm [shape: bf16[128,1024], index: 8, kind: input, shape index: {}]   ;;  %s8776_s9 = inlined_call_operand.vmem [shape: f32[2,1408], index: 9, kind: input, shape index: {}]   ;;  %s8777_s10 = inlined_call_operand.vmem [shape: f32[8,256], index: 10, kind: output, shape index: {0}]   ;;  %s8778_s11 = inlined_call_operand.vmem [shape: f32[8,128], index: 11, kind: output, shape index: {1}]  }
   0x1   :  { %18 = vsyncpa [#allocation5], 0 }
   0x2   :  { %19 = vsyncpa [#allocation8], 0 }
   0x3   :  { %20 = vsyncpa [#allocation11], 0  ;;  %s8101_s17 = smov [#allocation4]   ;;  %s7939_s21 = scalar_lea.hbm %s8770_s3, 9216 }
   0x4   :  { %s42_s18 = sshll.u32 %s8101_s17, 4  ;;  %p7940_p0 = scmp.ne.s32.totalorder %s8770_s3, %s7939_s21  ;;  %s43_s18 = int_to_ptr.vmem [resolvable:$true] %s42_s18 }
   0x5   :  { %p7943_p1 = scmp.lt.u32.totalorder %s7939_s21, %s8770_s3 }
   0x7   :  { %p7945_p2 = pnand %p7943_p1, %p7940_p0 }
   0x9   :  { %7948 = shalt.err (!%p7945_p2)
}
   0xa   :  { %s7949_s26 = scalar_lea.vmem %s43_s18, 9216  ;;  %p7954_p4 = scmp.lt.s32.totalorder %s43_s18, %s43_s18 }
   0xb   :  { %p7950_p3 = scmp.ne.s32.totalorder %s43_s18, %s7949_s26  ;;  %p7955_p5 = scmp.lt.s32.totalorder %s7949_s26, %s7949_s26 }
   0xd   :  { %p7956_p6 = por %p7955_p5, %p7954_p4 }
   0xf   :  { %p7957_p7 = pnand %p7956_p6, %p7950_p3 }
  0x11   :  { %7960 = shalt.err (!%p7957_p7)
}
  0x12   :  { %s8102_s27 = smov 192   ;;  %s8103_s28 = smov 12  }
  0x13   :  { %48 = dma.hbm_to_vmem [thread:$0]  %s8770_s3, 9216, %s43_s18, [#allocation5], %s8102_s27, %s8102_s27, %s8103_s28  }
  0x14   :  { %s8104_s12 = smov [#allocation7]   ;;  %s7961_s16 = scalar_lea.hbm %s8772_s5, 24576 }
  0x15   :  { %s66_s13 = sshll.u32 %s8104_s12, 4  ;;  %p7962_p8 = scmp.ne.s32.totalorder %s8772_s5, %s7961_s16  ;;  %s67_s13 = int_to_ptr.vmem [resolvable:$true] %s66_s13 }
  0x16   :  { %p7965_p9 = scmp.lt.u32.totalorder %s7961_s16, %s8772_s5 }
  0x18   :  { %p7967_p10 = pnand %p7965_p9, %p7962_p8 }
  0x1a   :  { %7970 = shalt.err (!%p7967_p10)
}
  0x1b   :  { %s7971_s22 = scalar_lea.vmem %s67_s13, 24576  ;;  %p7976_p12 = scmp.lt.s32.totalorder %s67_s13, %s67_s13 }
  0x1c   :  { %p7972_p11 = scmp.ne.s32.totalorder %s67_s13, %s7971_s22  ;;  %p7977_p13 = scmp.lt.s32.totalorder %s7971_s22, %s7971_s22 }
  0x1e   :  { %p7978_p0 = por %p7977_p13, %p7976_p12 }
  0x20   :  { %p7979_p1 = pnand %p7978_p0, %p7972_p11 }
  0x22   :  { %7982 = shalt.err (!%p7979_p1)
}
  0x23   :  { %s8105_s3 = smov 512   ;;  %s8106_s18 = smov 32  }
  0x24   :  { %72 = dma.hbm_to_vmem [thread:$0]  %s8772_s5, 24576, %s67_s13, [#allocation8], %s8105_s3, %s8105_s3, %s8106_s18  }
  0x25   :  { %s8107_s25 = smov [#allocation10]   ;;  %s8108_s29 = smov [#allocation2]  }
  0x26   :  { %s90_s26 = sshll.u32 %s8107_s25, 4  ;;  %s28_s30 = sshll.u32 %s8108_s29, 4  ;;  %s91_s26 = int_to_ptr.vmem [resolvable:$true] %s90_s26  ;;  %s8211_s30 = int_to_ptr.vmem [resolvable:$true] %s28_s30 }
  0x27   :  { %s7983_s15 = scalar_lea.hbm %s8774_s7, 9216 }
  0x28   :  { %p7984_p2 = scmp.ne.s32.totalorder %s8774_s7, %s7983_s15  ;;  %p7987_p3 = scmp.lt.u32.totalorder %s7983_s15, %s8774_s7 }
  0x2a   :  { %p7989_p4 = pnand %p7987_p3, %p7984_p2 }
  0x2c   :  { %7992 = shalt.err (!%p7989_p4)
}
  0x2d   :  { %s7993_s5 = scalar_lea.vmem %s91_s26, 9216  ;;  %p7998_p6 = scmp.lt.s32.totalorder %s91_s26, %s91_s26 }
  0x2e   :  { %p7994_p5 = scmp.ne.s32.totalorder %s91_s26, %s7993_s5  ;;  %p7999_p7 = scmp.lt.s32.totalorder %s7993_s5, %s7993_s5 }
  0x30   :  { %p8000_p8 = por %p7999_p7, %p7998_p6 }
  0x32   :  { %p8001_p9 = pnand %p8000_p8, %p7994_p5 }
  0x34   :  { %8004 = shalt.err (!%p8001_p9)
}
  0x35   :  { %96 = dma.hbm_to_vmem [thread:$0]  %s8774_s7, 9216, %s91_s26, [#allocation11], %s8102_s27, %s8102_s27, %s8103_s28  }
  0x36   :  { %s8005_s24 = scalar_lea.hbm %s8768_s1, 6144 }
  0x37   :  { %p8006_p10 = scmp.ne.s32.totalorder %s8768_s1, %s8005_s24  ;;  %p8009_p11 = scmp.lt.u32.totalorder %s8005_s24, %s8768_s1 }
  0x39   :  { %p8011_p12 = pnand %p8009_p11, %p8006_p10 }
  0x3b   :  { %8014 = shalt.err (!%p8011_p12)
}
  0x3c   :  { %s8015_s15 = scalar_lea.vmem %s8211_s30, 6144  ;;  %p8020_p0 = scmp.lt.s32.totalorder %s8211_s30, %s8211_s30 }
  0x3d   :  { %p8016_p13 = scmp.ne.s32.totalorder %s8211_s30, %s8015_s15  ;;  %p8021_p1 = scmp.lt.s32.totalorder %s8015_s15, %s8015_s15 }
  0x3f   :  { %p8022_p2 = por %p8021_p1, %p8020_p0 }
  0x41   :  { %p8023_p3 = pnand %p8022_p2, %p8016_p13 }
  0x43   :  { %8026 = shalt.err (!%p8023_p3)
}
  0x44   :  { %s8109_s7 = smov 128   ;;  %s8110_s26 = smov 8  }
  0x45   :  { %34 = dma.hbm_to_vmem [thread:$0]  %s8768_s1, 6144, %s8211_s30, [#allocation3], %s8109_s7, %s8109_s7, %s8110_s26  }
  0x46   :  { %s8111_s19 = smov [#allocation6]   ;;  %s8112_s5 = smov [#allocation9]  }
  0x47   :  { %s54_s20 = sshll.u32 %s8111_s19, 4  ;;  %s78_s13 = sshll.u32 %s8112_s5, 4  ;;  %s55_s20 = int_to_ptr.vmem [resolvable:$true] %s54_s20  ;;  %s8245_s13 = int_to_ptr.vmem [resolvable:$true] %s78_s13 }
  0x48   :  { %s8027_s23 = scalar_lea.hbm %s8771_s4, 9216 }
  0x49   :  { %p8028_p4 = scmp.ne.s32.totalorder %s8771_s4, %s8027_s23  ;;  %p8031_p5 = scmp.lt.u32.totalorder %s8027_s23, %s8771_s4 }
  0x4b   :  { %p8033_p6 = pnand %p8031_p5, %p8028_p4 }
  0x4d   :  { %8036 = shalt.err (!%p8033_p6)
}
  0x4e   :  { %s8037_s1 = scalar_lea.vmem %s55_s20, 9216  ;;  %p8042_p8 = scmp.lt.s32.totalorder %s55_s20, %s55_s20 }
  0x4f   :  { %p8038_p7 = scmp.ne.s32.totalorder %s55_s20, %s8037_s1  ;;  %p8043_p9 = scmp.lt.s32.totalorder %s8037_s1, %s8037_s1 }
  0x51   :  { %p8044_p10 = por %p8043_p9, %p8042_p8 }
  0x53   :  { %p8045_p11 = pnand %p8044_p10, %p8038_p7 }
  0x55   :  { %8048 = shalt.err (!%p8045_p11)
}
  0x56   :  { %60 = dma.hbm_to_vmem [thread:$0]  %s8771_s4, 9216, %s55_s20, [#allocation5], %s8102_s27, %s8102_s27, %s8103_s28  }
  0x57   :  { %s8049_s26 = scalar_lea.hbm %s8773_s6, 9216 }
  0x58   :  { %p8050_p12 = scmp.ne.s32.totalorder %s8773_s6, %s8049_s26  ;;  %p8053_p13 = scmp.lt.u32.totalorder %s8049_s26, %s8773_s6 }
  0x5a   :  { %p8055_p0 = pnand %p8053_p13, %p8050_p12 }
  0x5c   :  { %8058 = shalt.err (!%p8055_p0)
}
  0x5d   :  { %s8059_s21 = scalar_lea.vmem %s8245_s13, 9216  ;;  %p8064_p2 = scmp.lt.s32.totalorder %s8245_s13, %s8245_s13 }
  0x5e   :  { %p8060_p1 = scmp.ne.s32.totalorder %s8245_s13, %s8059_s21  ;;  %p8065_p3 = scmp.lt.s32.totalorder %s8059_s21, %s8059_s21 }
  0x60   :  { %p8066_p4 = por %p8065_p3, %p8064_p2 }
  0x62   :  { %p8067_p5 = pnand %p8066_p4, %p8060_p1 }
  0x64   :  { %8070 = shalt.err (!%p8067_p5)
}
  0x65   :  { %s8113_s4 = smov 64   ;;  %s8114_s27 = smov 4  }
  0x66   :  { %84 = dma.hbm_to_vmem [thread:$0]  %s8773_s6, 9216, %s8245_s13, [#allocation8], %s8113_s4, %s8113_s4, %s8114_s27  }
  0x67   :  { %s8115_s22 = smov [#allocation12]   ;;  %s8071_s29 = scalar_lea.hbm %s8775_s8, 8192 }
  0x68   :  { %s102_s23 = sshll.u32 %s8115_s22, 4  ;;  %p8072_p6 = scmp.ne.s32.totalorder %s8775_s8, %s8071_s29  ;;  %s103_s23 = int_to_ptr.vmem [resolvable:$true] %s102_s23 }
  0x69   :  { %p8075_p7 = scmp.lt.u32.totalorder %s8071_s29, %s8775_s8 }
  0x6b   :  { %p8077_p8 = pnand %p8075_p7, %p8072_p6 }
  0x6d   :  { %8080 = shalt.err (!%p8077_p8)
}
  0x6e   :  { %s8081_s15 = scalar_lea.vmem %s103_s23, 8192  ;;  %p8086_p10 = scmp.lt.s32.totalorder %s103_s23, %s103_s23 }
  0x6f   :  { %p8082_p9 = scmp.ne.s32.totalorder %s103_s23, %s8081_s15  ;;  %p8087_p11 = scmp.lt.s32.totalorder %s8081_s15, %s8081_s15 }
  0x71   :  { %p8088_p12 = por %p8087_p11, %p8086_p10 }
  0x73   :  { %p8089_p13 = pnand %p8088_p12, %p8082_p9 }
  0x75   :  { %8092 = shalt.err (!%p8089_p13)
}
  0x76   :  { %108 = dma.hbm_to_vmem [thread:$0]  %s8775_s8, 8192, %s103_s23, [#allocation11], %s8105_s3, %s8105_s3, %s8106_s18  }
  0x77   :  { %8093 = dma.done.wait [#allocation3], 6144  }
  0x78   :  { %8094 = vsyncadd [#allocation3], 4294961152 }
  0x79   :  { %8095 = dma.done.wait [#allocation5], 18432  }
  0x7a   :  { %8096 = vsyncadd [#allocation5], 4294948864 }
  0x7b   :  { %8097 = dma.done.wait [#allocation8], 33792  }
  0x7c   :  { %8098 = vsyncadd [#allocation8], 4294933504 }
  0x7d   :  { %8099 = dma.done.wait [#allocation11], 17408  }
  0x7e   :  { %8100 = vsyncadd [#allocation11], 4294949888  ;;  %v7460_v0 = vld [vmem:[#allocation2 + $0x4] ss:$8 sps:$4 sm:$0xff]   ;;  %v7462_v1 = vld [vmem:[#allocation2] ss:$8 sps:$4 sm:$0xff]  }
  0x7f   :  { %434 = vmatprep.subr.bf16.mxu0 %v7460_v0  ;;  %v7463_v2 = vld [vmem:[#allocation2 + $0x14] ss:$8 sps:$4 sm:$0xff]   ;;  %v7465_v3 = vld [vmem:[#allocation2 + $0x10] ss:$8 sps:$4 sm:$0xff]   ;;  %v7466_v4 = vld [vmem:[#allocation2 + $0x24] ss:$8 sps:$4 sm:$0xff]  }
  0x80   :  { %435 = vmatpush1.bf16.msra.mxu0 %v7462_v1  ;;  %v7468_v5 = vld [vmem:[#allocation2 + $0x20] ss:$8 sps:$4 sm:$0xff]   ;;  %v7469_v6 = vld [vmem:[#allocation2 + $0x34] ss:$8 sps:$4 sm:$0xff]   ;;  %v7471_v7 = vld [vmem:[#allocation2 + $0x30] ss:$8 sps:$4 sm:$0xff]  }
  0x81   :  { %436 = vmatprep.subr.bf16.mxu0 %v7463_v2  ;;  %v7472_v8 = vld [vmem:[#allocation2 + $0x44] ss:$8 sps:$4 sm:$0xff]   ;;  %v7474_v9 = vld [vmem:[#allocation2 + $0x40] ss:$8 sps:$4 sm:$0xff]   ;;  %v7475_v10 = vld [vmem:[#allocation2 + $0x54] ss:$8 sps:$4 sm:$0xff]  }
  0x82   :  { %v7477_v11 = vld [vmem:[#allocation2 + $0x50] ss:$8 sps:$4 sm:$0xff]   ;;  %v7478_v12 = vld [vmem:[#allocation2 + $0x64] ss:$8 sps:$4 sm:$0xff]   ;;  %v7480_v15 = vld [vmem:[#allocation2 + $0x60] ss:$8 sps:$4 sm:$0xff]  }
  0x83   :  { %v8297_v13 = vld [vmem:[%s8767_s0] sm:$0xff]  ;;  %v7481_v16 = vld [vmem:[#allocation2 + $0x74] ss:$8 sps:$4 sm:$0xff]   ;;  %v7483_v17 = vld [vmem:[#allocation2 + $0x70] ss:$8 sps:$4 sm:$0xff]   ;;  %v8116_v60 = vmov 0  }
  0x84   :  { %437 = vmatpush1.bf16.msra.mxu0 %v7465_v3  ;;  %v6388_v14 = vcombine.high %v8297_v13, %v8297_v13  ;;  %v7484_v18 = vld [vmem:[#allocation2 + $0x84] ss:$8 sps:$4 sm:$0xff]   ;;  %v7486_v19 = vld [vmem:[#allocation2 + $0x80] ss:$8 sps:$4 sm:$0xff]   ;;  %v7487_v20 = vld [vmem:[#allocation2 + $0x94] ss:$8 sps:$4 sm:$0xff]   ;;  %v6387_v53 = vcombine.low %v8297_v13, %v8297_v13 }
  0x85   :  { %438 = vmatprep.subr.bf16.mxu0 %v7466_v4  ;;  %v7535_v21 = vld [vmem:[%s8769_s2 + $0x4] ss:$8 sps:$4 sm:$0xff]   ;;  %v7537_v22 = vld [vmem:[%s8769_s2] ss:$8 sps:$4 sm:$0xff]   ;;  %v7538_v23 = vld [vmem:[%s8769_s2 + $0x14] ss:$8 sps:$4 sm:$0xff]  }
  0x86   :  { %466 = vmatprep.mubr.bf16.mxu0 %v6388_v14  ;;  %v7489_v24 = vld [vmem:[#allocation2 + $0x90] ss:$8 sps:$4 sm:$0xff]   ;;  %716 = vmatprep.subr.bf16.mxu1 %v7535_v21  ;;  %v7490_v25 = vld [vmem:[#allocation2 + $0xa4] ss:$8 sps:$4 sm:$0xff]   ;;  %v7492_v28 = vld [vmem:[#allocation2 + $0xa0] ss:$8 sps:$4 sm:$0xff]  }
  0x87   :  { %717 = vmatpush1.bf16.msra.mxu1 %v7537_v22  ;;  %v7540_v26 = vld [vmem:[%s8769_s2 + $0x10] ss:$8 sps:$4 sm:$0xff]   ;;  %v7541_v27 = vld [vmem:[%s8769_s2 + $0x24] ss:$8 sps:$4 sm:$0xff]   ;;  %v7493_v29 = vld [vmem:[#allocation2 + $0xb4] ss:$8 sps:$4 sm:$0xff]  }
  0x88   :  { %439 = vmatpush1.bf16.msra.mxu0 %v7468_v5  ;;  %718 = vmatprep.subr.bf16.mxu1 %v7538_v23  ;;  %v7543_v30 = vld [vmem:[%s8769_s2 + $0x20] ss:$8 sps:$4 sm:$0xff]   ;;  %v7544_v31 = vld [vmem:[%s8769_s2 + $0x34] ss:$8 sps:$4 sm:$0xff]   ;;  %v7495_v32 = vld [vmem:[#allocation2 + $0xb0] ss:$8 sps:$4 sm:$0xff]  }
  0x89   :  { %440 = vmatprep.subr.bf16.mxu0 %v7469_v6  ;;  %v7496_v33 = vld [vmem:[#allocation2 + $0xc4] ss:$8 sps:$4 sm:$0xff]   ;;  %v7546_v34 = vld [vmem:[%s8769_s2 + $0x30] ss:$8 sps:$4 sm:$0xff]   ;;  %v7498_v36 = vld [vmem:[#allocation2 + $0xc0] ss:$8 sps:$4 sm:$0xff]  }
  0x8a   :  { %v7547_v35 = vld [vmem:[%s8769_s2 + $0x44] ss:$8 sps:$4 sm:$0xff]   ;;  %v7499_v37 = vld [vmem:[#allocation2 + $0xd4] ss:$8 sps:$4 sm:$0xff]   ;;  %v7549_v38 = vld [vmem:[%s8769_s2 + $0x40] ss:$8 sps:$4 sm:$0xff]  }
  0x8b   :  { %719 = vmatpush1.bf16.msra.mxu1 %v7540_v26  ;;  %v7501_v39 = vld [vmem:[#allocation2 + $0xd0] ss:$8 sps:$4 sm:$0xff]   ;;  %v7550_v40 = vld [vmem:[%s8769_s2 + $0x54] ss:$8 sps:$4 sm:$0xff]   ;;  %v7502_v41 = vld [vmem:[#allocation2 + $0xe4] ss:$8 sps:$4 sm:$0xff]  }
  0x8c   :  { %441 = vmatpush1.bf16.msra.mxu0 %v7471_v7  ;;  %720 = vmatprep.subr.bf16.mxu1 %v7541_v27  ;;  %v7552_v42 = vld [vmem:[%s8769_s2 + $0x50] ss:$8 sps:$4 sm:$0xff]   ;;  %v7553_v43 = vld [vmem:[%s8769_s2 + $0x64] ss:$8 sps:$4 sm:$0xff]   ;;  %v7504_v44 = vld [vmem:[#allocation2 + $0xe0] ss:$8 sps:$4 sm:$0xff]  }
  0x8d   :  { %442 = vmatprep.subr.bf16.mxu0 %v7472_v8  ;;  %v7505_v45 = vld [vmem:[#allocation2 + $0xf4] ss:$8 sps:$4 sm:$0xff]   ;;  %v7555_v46 = vld [vmem:[%s8769_s2 + $0x60] ss:$8 sps:$4 sm:$0xff]   ;;  %v7507_v48 = vld [vmem:[#allocation2 + $0xf0] ss:$8 sps:$4 sm:$0xff]  }
  0x8e   :  { %v7556_v47 = vld [vmem:[%s8769_s2 + $0x74] ss:$8 sps:$4 sm:$0xff]   ;;  %v7512_v49 = vld [vmem:[#allocation2 + $0x104] ss:$8 sps:$4 sm:$0xff]   ;;  %v7558_v50 = vld [vmem:[%s8769_s2 + $0x70] ss:$8 sps:$4 sm:$0xff]  }
  0x8f   :  { %721 = vmatpush1.bf16.msra.mxu1 %v7543_v30  ;;  %v7559_v51 = vld [vmem:[%s8769_s2 + $0x84] ss:$8 sps:$4 sm:$0xff]   ;;  %v7510_v52 = vld [vmem:[#allocation2 + $0x100] ss:$8 sps:$4 sm:$0xff]   ;;  %v7515_v54 = vld [vmem:[#allocation2 + $0x114] ss:$8 sps:$4 sm:$0xff]  }
  0x90   :  { %443 = vmatpush1.bf16.msra.mxu0 %v7474_v9  ;;  %722 = vmatprep.subr.bf16.mxu1 %v7544_v31  ;;  %v7561_v55 = vld [vmem:[%s8769_s2 + $0x80] ss:$8 sps:$4 sm:$0xff]   ;;  %v7562_v56 = vld [vmem:[%s8769_s2 + $0x94] ss:$8 sps:$4 sm:$0xff]   ;;  %v7513_v57 = vld [vmem:[#allocation2 + $0x110] ss:$8 sps:$4 sm:$0xff]  }
  0x91   :  { %444 = vmatprep.subr.bf16.mxu0 %v7475_v10  ;;  %v7518_v58 = vld [vmem:[#allocation2 + $0x124] ss:$8 sps:$4 sm:$0xff]   ;;  %v7564_v59 = vld [vmem:[%s8769_s2 + $0x90] ss:$8 sps:$4 sm:$0xff]   ;;  %v7516_v62 = vld [vmem:[#allocation2 + $0x120] ss:$8 sps:$4 sm:$0xff]  }
  0x92   :  { %v7565_v61 = vld [vmem:[%s8769_s2 + $0xa4] ss:$8 sps:$4 sm:$0xff]   ;;  %v7521_v63 = vld [vmem:[#allocation2 + $0x134] ss:$8 sps:$4 sm:$0xff]   ;;  %v7567_v0 = vld [vmem:[%s8769_s2 + $0xa0] ss:$8 sps:$4 sm:$0xff]  }
  0x93   :  { %723 = vmatpush1.bf16.msra.mxu1 %v7546_v34  ;;  %v7568_v1 = vld [vmem:[%s8769_s2 + $0xb4] ss:$8 sps:$4 sm:$0xff]   ;;  %v7519_v2 = vld [vmem:[#allocation2 + $0x130] ss:$8 sps:$4 sm:$0xff]   ;;  %v7524_v3 = vld [vmem:[#allocation2 + $0x144] ss:$8 sps:$4 sm:$0xff]  }
  0x94   :  { %445 = vmatpush1.bf16.msra.mxu0 %v7477_v11  ;;  %724 = vmatprep.subr.bf16.mxu1 %v7547_v35  ;;  %v7570_v4 = vld [vmem:[%s8769_s2 + $0xb0] ss:$8 sps:$4 sm:$0xff]   ;;  %v7571_v5 = vld [vmem:[%s8769_s2 + $0xc4] ss:$8 sps:$4 sm:$0xff]   ;;  %v7522_v6 = vld [vmem:[#allocation2 + $0x140] ss:$8 sps:$4 sm:$0xff]  }
  0x95   :  { %446 = vmatprep.subr.bf16.mxu0 %v7478_v12  ;;  %v7527_v7 = vld [vmem:[#allocation2 + $0x154] ss:$8 sps:$4 sm:$0xff]   ;;  %v7573_v8 = vld [vmem:[%s8769_s2 + $0xc0] ss:$8 sps:$4 sm:$0xff]   ;;  %v7525_v10 = vld [vmem:[#allocation2 + $0x150] ss:$8 sps:$4 sm:$0xff]  }
  0x96   :  { %v7574_v9 = vld [vmem:[%s8769_s2 + $0xd4] ss:$8 sps:$4 sm:$0xff]   ;;  %v7530_v11 = vld [vmem:[#allocation2 + $0x164] ss:$8 sps:$4 sm:$0xff]   ;;  %v7576_v12 = vld [vmem:[%s8769_s2 + $0xd0] ss:$8 sps:$4 sm:$0xff]  }
  0x97   :  { %725 = vmatpush1.bf16.msra.mxu1 %v7549_v38  ;;  %v7528_v13 = vld [vmem:[#allocation2 + $0x160] ss:$8 sps:$4 sm:$0xff]   ;;  %v7533_v14 = vld [vmem:[#allocation2 + $0x174] ss:$8 sps:$4 sm:$0xff]   ;;  %v7582_v21 = vld [vmem:[%s8769_s2 + $0xf0] ss:$8 sps:$4 sm:$0xff]  }
  0x98   :  { %447 = vmatpush1.bf16.msra.mxu0 %v7480_v15  ;;  %726 = vmatprep.subr.bf16.mxu1 %v7550_v40  ;;  %v7531_v15 = vld [vmem:[#allocation2 + $0x170] ss:$8 sps:$4 sm:$0xff]   ;;  %v7583_v22 = vld [vmem:[#allocation10 + $0xc0] ss:$12 sps:$4 sm:$0xff]   ;;  %v7589_v38 = vld [vmem:[#allocation10 + $0x108] ss:$12 sps:$4 sm:$0xff]  }
  0x99   :  { %448 = vmatprep.subr.bf16.mxu0 %v7481_v16  ;;  %v134_v16 = vld [vmem:[%s8767_s0 + $0x8] sm:$0xf]  ;;  %v7585_v34 = vld [vmem:[#allocation10 + $0xd8] ss:$12 sps:$4 sm:$0xff]   ;;  %v7591_v40 = vld [vmem:[#allocation10 + $0x120] ss:$12 sps:$4 sm:$0xff]  }
  0x9a   :  { %v7586_v35 = vld [vmem:[#allocation10 + $0x18] ss:$12 sps:$4 sm:$0xff]   ;;  %vm833_vm0 = vcmask 1040384   ;;  %vm8119_vm1 = vmmov 0  }
  0x9b   :  { %727 = vmatpush1.bf16.msra.mxu1 %v7552_v42  ;;  %v7593_v42 = vld [vmem:[#allocation10 + $0x138] ss:$12 sps:$4 sm:$0xff]  }
  0x9c   :  { %449 = vmatpush1.bf16.msra.mxu0 %v7483_v17  ;;  %728 = vmatprep.subr.bf16.mxu1 %v7553_v43  ;;  %v6389_v17 = vcombine.low %v134_v16, %v134_v16  ;;  %v7594_v43 = vld [vmem:[#allocation10 + $0x78] ss:$12 sps:$4 sm:$0xff]  }
  0x9d   :  { %450 = vmatprep.subr.bf16.mxu0 %v7484_v18  ;;  %v7577_v18 = vld [vmem:[%s8769_s2 + $0xe4] ss:$8 sps:$4 sm:$0xff]  }
  0x9f   :  { %729 = vmatpush1.bf16.msra.mxu1 %v7555_v46  ;;  %v7597_v46 = vld [vmem:[#allocation10 + $0x168] ss:$12 sps:$4 sm:$0xff]  }
  0xa0   :  { %451 = vmatpush1.bf16.msra.mxu0 %v7486_v19  ;;  %730 = vmatprep.subr.bf16.mxu1 %v7556_v47  ;;  %v7579_v19 = vld [vmem:[%s8769_s2 + $0xe0] ss:$8 sps:$4 sm:$0xff]  }
  0xa1   :  { %452 = vmatprep.subr.bf16.mxu0 %v7487_v20  ;;  %v7580_v20 = vld [vmem:[%s8769_s2 + $0xf4] ss:$8 sps:$4 sm:$0xff]  }
  0xa2   :  { %v7598_v47 = vld [vmem:[#allocation10 + $0xa8] ss:$12 sps:$4 sm:$0xff]  }
  0xa3   :  { %731 = vmatpush1.bf16.msra.mxu1 %v7558_v50 }
  0xa4   :  { %453 = vmatpush1.bf16.msra.mxu0 %v7489_v24  ;;  %732 = vmatprep.subr.bf16.mxu1 %v7559_v51 }
  0xa5   :  { %454 = vmatprep.subr.bf16.mxu0 %v7490_v25 }
  0xa7   :  { %733 = vmatpush1.bf16.msra.mxu1 %v7561_v55 }
  0xa8   :  { %455 = vmatpush1.bf16.msra.mxu0 %v7492_v28  ;;  %734 = vmatprep.subr.bf16.mxu1 %v7562_v56 }
  0xa9   :  { %456 = vmatprep.subr.bf16.mxu0 %v7493_v29 }
  0xab   :  { %735 = vmatpush1.bf16.msra.mxu1 %v7564_v59 }
  0xac   :  { %457 = vmatpush1.bf16.msra.mxu0 %v7495_v32  ;;  %736 = vmatprep.subr.bf16.mxu1 %v7565_v61  ;;  %v7584_v32 = vld [vmem:[#allocation10] ss:$12 sps:$4 sm:$0xff]  }
  0xad   :  { %458 = vmatprep.subr.bf16.mxu0 %v7496_v33 }
  0xaf   :  { %737 = vmatpush1.bf16.msra.mxu1 %v7567_v0 }
  0xb0   :  { %459 = vmatpush1.bf16.msra.mxu0 %v7498_v36  ;;  %738 = vmatprep.subr.bf16.mxu1 %v7568_v1  ;;  %v7587_v36 = vld [vmem:[#allocation10 + $0xf0] ss:$12 sps:$4 sm:$0xff]  }
  0xb1   :  { %460 = vmatprep.subr.bf16.mxu0 %v7499_v37  ;;  %v7588_v37 = vld [vmem:[#allocation10 + $0x30] ss:$12 sps:$4 sm:$0xff]  }
  0xb3   :  { %739 = vmatpush1.bf16.msra.mxu1 %v7570_v4 }
  0xb4   :  { %461 = vmatpush1.bf16.msra.mxu0 %v7501_v39  ;;  %740 = vmatprep.subr.bf16.mxu1 %v7571_v5  ;;  %v7590_v39 = vld [vmem:[#allocation10 + $0x48] ss:$12 sps:$4 sm:$0xff]  }
  0xb5   :  { %462 = vmatprep.subr.bf16.mxu0 %v7502_v41  ;;  %v7592_v41 = vld [vmem:[#allocation10 + $0x60] ss:$12 sps:$4 sm:$0xff]  }
  0xb7   :  { %741 = vmatpush1.bf16.msra.mxu1 %v7573_v8 }
  0xb8   :  { %463 = vmatpush1.bf16.msra.mxu0 %v7504_v44  ;;  %742 = vmatprep.subr.bf16.mxu1 %v7574_v9  ;;  %v7595_v44 = vld [vmem:[#allocation10 + $0x150] ss:$12 sps:$4 sm:$0xff]  }
  0xb9   :  { %464 = vmatprep.subr.bf16.mxu0 %v7505_v45  ;;  %v7596_v45 = vld [vmem:[#allocation10 + $0x90] ss:$12 sps:$4 sm:$0xff]  }
  0xbb   :  { %743 = vmatpush1.bf16.msra.mxu1 %v7576_v12 }
  0xbc   :  { %465 = vmatpush1.bf16.msra.mxu0 %v7507_v48  ;;  %744 = vmatprep.subr.bf16.mxu1 %v7577_v18 }
  0xbd   :  { %475 = vmatprep.subr.bf16.mxu0 %v7512_v49 }
  0xbf   :  { %467 = vmatmul.mubr.bf16.vlgmr.msra.gmra.mrb[0].mxu0 %v6387_v53  ;;  %745 = vmatpush1.bf16.msra.mxu1 %v7579_v19  ;;  %v789_v19 = vld [vmem:[#allocation12] sm:$0xff] }
  0xc0   :  { %476 = vmatpush1.bf16.msra.mxu0 %v7510_v52  ;;  %507 = vmatprep.mubr.bf16.mxu0 %v8116_v60 }
  0xc1   :  { %477 = vmatprep.subr.bf16.mxu0 %v7515_v54  ;;  %746 = vmatprep.subr.bf16.mxu1 %v7580_v20  ;;  %v790_v20 = vld [vmem:[#allocation12 + $0x20] sm:$0xff] }
  0xc3   :  { %747 = vmatpush1.bf16.msra.mxu1 %v7582_v21  ;;  %v6488_v21 = vcombine.high %v789_v19, %v790_v20 }
  0xc4   :  { %478 = vmatpush1.bf16.msra.mxu0 %v7513_v57  ;;  %7011 = vmatprep.subr.bf16.mxu1 %v7583_v22  ;;  %v6487_v22 = vcombine.low %v789_v19, %v790_v20 }
  0xc5   :  { %479 = vmatprep.subr.bf16.mxu0 %v7518_v58 }
  0xc8   :  { %480 = vmatpush1.bf16.msra.mxu0 %v7516_v62 }
  0xc9   :  { %481 = vmatprep.subr.bf16.mxu0 %v7521_v63 }
  0xcc   :  { %482 = vmatpush1.bf16.msra.mxu0 %v7519_v2 }
  0xcd   :  { %483 = vmatprep.subr.bf16.mxu0 %v7524_v3 }
  0xd0   :  { %484 = vmatpush1.bf16.msra.mxu0 %v7522_v6 }
  0xd1   :  { %485 = vmatprep.subr.bf16.mxu0 %v7527_v7 }
  0xd4   :  { %486 = vmatpush1.bf16.msra.mxu0 %v7525_v10 }
  0xd5   :  { %487 = vmatprep.subr.bf16.mxu0 %v7530_v11 }
  0xd8   :  { %488 = vmatpush1.bf16.msra.mxu0 %v7528_v13 }
  0xd9   :  { %489 = vmatprep.subr.bf16.mxu0 %v7533_v14 }
  0xdc   :  { %490 = vmatpush1.bf16.msra.mxu0 %v7531_v15 }
  0xdd   :  { %1085 = vmatprep.subr.bf16.mxu0 %v6488_v21 }
  0xdf   :  { %508 = vmatmul.mubr.bf16.vlgmr.msra.gmra.mrb[0].mxu0 %v6389_v17 }
  0xe0   :  { %1117 = vmatprep.mubr.bf16.mxu0 %v8116_v60  ;;  %1086 = vmatpush1.bf16.msra.mxu0 %v6487_v22 }
 0x1b2   :  { %v509_v23 = vpop.f32.mrb[0].mxu0 }
 0x1b3   :  { %v516_v24 = vmul.f32 0.2, %v509_v23  ;;  %v511_v25 = vpop.f32.mrb[1].mxu0 }
 0x1b4   :  { %v517_v26 = vmul.f32 0.2, %v511_v25  ;;  %v513_v27 = vpop.f32.mrb[2].mxu0 }
 0x1b5   :  { %v518_v28 = vmax.f32 %v509_v23, %v516_v24  ;;  %v514_v29 = vpop.f32.mrb[3].mxu0  ;;  %v791_v23 = vld [vmem:[#allocation12 + $0x40] sm:$0xff] }
 0x1b6   :  { %v519_v30 = vmax.f32 %v511_v25, %v517_v26  ;;  %v792_v24 = vld [vmem:[#allocation12 + $0x60] sm:$0xff] }
 0x1b7   :  { %520 = vst [vmem:[%s8777_s10] sm:$0xff] %v518_v28  ;;  %v522_v33 = vpack.c.bf16 %v518_v28, %v518_v28  ;;  %v6490_v25 = vcombine.high %v791_v23, %v792_v24  ;;  %v6489_v26 = vcombine.low %v791_v23, %v792_v24  ;;  %v793_v27 = vld [vmem:[#allocation12 + $0x80] sm:$0xff] }
 0x1b8   :  { %521 = vst [vmem:[%s8777_s10 + $0x8] sm:$0xff] %v519_v30  ;;  %v523_v31 = vpack.c.bf16 %v519_v30, %v519_v30  ;;  %v794_v28 = vld [vmem:[#allocation12 + $0xa0] sm:$0xff] }
 0x1b9   :  { %1087 = vmatprep.subr.bf16.mxu0 %v6490_v25  ;;  %v6492_v29 = vcombine.high %v793_v27, %v794_v28  ;;  %v6491_v30 = vcombine.low %v793_v27, %v794_v28  ;;  %v8117_v28 = vmov 1983009808  }
 0x1ba   :  { %748 = vmatprep.mubr.bf16.mxu1 %v523_v31  ;;  %1088 = vmatpush1.bf16.msra.mxu0 %v6489_v26  ;;  %v795_v31 = vld [vmem:[#allocation12 + $0xc0] sm:$0xff] }
 0x1bb   :  { %749 = vmatmul.mubr.bf16.vlgmr.msra.gmra.mrb[0].mxu1 %v522_v33  ;;  %1089 = vmatprep.subr.bf16.mxu0 %v6492_v29  ;;  %v985_v29 = vunpack.c.l.s4 %v8117_v28 }
 0x1bc   :  { %7012 = vmatpush3.bf16.msra.mxu1 %v7584_v32  ;;  %v796_v32 = vld [vmem:[#allocation12 + $0xe0] sm:$0xff] }
 0x1bd   :  { %7013 = vmatprep.subr.bf16.mxu1 %v7585_v34  ;;  %v6494_v33 = vcombine.high %v795_v31, %v796_v32  ;;  %v6493_v34 = vcombine.low %v795_v31, %v796_v32  ;;  %v986_v31 = vunpack.c.0.s8 %v985_v29  ;;  %v7669_v29 = vld [vmem:[#allocation4 + $0x19c] ss:$12 sps:$4 sm:$0xff]  }
 0x1be   :  { %1090 = vmatpush1.bf16.msra.mxu0 %v6491_v30  ;;  %v987_v30 = vlaneseq }
 0x1bf   :  { %1091 = vmatprep.subr.bf16.mxu0 %v6494_v33 }
 0x1c0   :  { %7014 = vmatpush3.bf16.msra.mxu1 %v7586_v35  ;;  %v797_v35 = vld [vmem:[#allocation12 + $0x100] sm:$0xff]  ;;  %v8425_v32 = vshrl.u32 %v987_v30, 7 }
 0x1c1   :  { %7015 = vmatprep.subr.bf16.mxu1 %v7587_v36  ;;  %v798_v36 = vld [vmem:[#allocation12 + $0x120] sm:$0xff] }
 0x1c2   :  { %1092 = vmatpush1.bf16.msra.mxu0 %v6493_v34  ;;  %v8428_v33 = vsub.s32 %v986_v31, %v8425_v32  ;;  %v7673_v31 = vld [vmem:[#allocation4 + $0x1b4] ss:$12 sps:$4 sm:$0xff]  }
 0x1c4   :  { %7016 = vmatpush3.bf16.msra.mxu1 %v7588_v37  ;;  %v6496_v37 = vcombine.high %v797_v35, %v798_v36 }
 0x1c5   :  { %7017 = vmatprep.subr.bf16.mxu1 %v7589_v38  ;;  %v6495_v38 = vcombine.low %v797_v35, %v798_v36  ;;  %v805_v36 = vld [vmem:[%s8776_s9] sm:$0x1] }
 0x1c6   :  { %1093 = vmatprep.subr.bf16.mxu0 %v6496_v37 }
 0x1c7   :  { %1094 = vmatpush1.bf16.msra.mxu0 %v6495_v38 }
 0x1c8   :  { %7018 = vmatpush3.bf16.msra.mxu1 %v7590_v39  ;;  %v799_v39 = vld [vmem:[#allocation12 + $0x140] sm:$0xff] }
 0x1c9   :  { %7019 = vmatprep.subr.bf16.mxu1 %v7591_v40  ;;  %v800_v40 = vld [vmem:[#allocation12 + $0x160] sm:$0xff] }
 0x1cc   :  { %7020 = vmatpush3.bf16.msra.mxu1 %v7592_v41  ;;  %v6498_v41 = vcombine.high %v799_v39, %v800_v40 }
 0x1cd   :  { %7021 = vmatprep.subr.bf16.mxu1 %v7593_v42  ;;  %v6497_v42 = vcombine.low %v799_v39, %v800_v40  ;;  %v806_v39 = vld [vmem:[%s8776_s9 + $0x1] sm:$0x1] }
 0x1ce   :  { %1095 = vmatprep.subr.bf16.mxu0 %v6498_v41  ;;  %v8438_v41 = vsub.s32 0, %v8425_v32 }
 0x1cf   :  { %1096 = vmatpush1.bf16.msra.mxu0 %v6497_v42 }
 0x1d0   :  { %7022 = vmatpush3.bf16.msra.mxu1 %v7594_v43  ;;  %v801_v43 = vld [vmem:[#allocation12 + $0x180] sm:$0xff] }
 0x1d1   :  { %7023 = vmatprep.subr.bf16.mxu1 %v7595_v44  ;;  %v802_v44 = vld [vmem:[#allocation12 + $0x1a0] sm:$0xff] }
 0x1d4   :  { %7024 = vmatpush3.bf16.msra.mxu1 %v7596_v45  ;;  %v6500_v45 = vcombine.high %v801_v43, %v802_v44 }
 0x1d5   :  { %7025 = vmatprep.subr.bf16.mxu1 %v7597_v46  ;;  %v6499_v46 = vcombine.low %v801_v43, %v802_v44 }
 0x1d6   :  { %1097 = vmatprep.subr.bf16.mxu0 %v6500_v45  ;;  %v7627_v45 = vld [vmem:[#allocation4 + $0x8] ss:$12 sps:$4 sm:$0xff]  }
 0x1d7   :  { %1098 = vmatpush1.bf16.msra.mxu0 %v6499_v46 }
 0x1d8   :  { %7026 = vmatpush3.bf16.msra.mxu1 %v7598_v47  ;;  %v803_v47 = vld [vmem:[#allocation12 + $0x1c0] sm:$0xff] }
 0x28e   :  { %v8410_v48 = vpop.f32.mrb[0].mxu1 }
 0x28f   :  { %v807_v49 = vrot.slane %v8410_v48, 4  ;;  %v819_v50 = vmul.f32 %v8410_v48, %v8410_v48  ;;  %v8415_v51 = vpop.f32.mrb[1].mxu1 }
 0x290   :  { %v813_v52 = vrot.slane %v8415_v51, 4  ;;  %v820_v53 = vmul.f32 %v8415_v51, %v8415_v51  ;;  %v754_v54 = vpop.f32.mrb[2].mxu1 }
 0x291   :  { %v808_v55 = vadd.f32 %v807_v49, %v8410_v48  ;;  %v821_v56 = vrot.slane %v819_v50, 4  ;;  %v755_v57 = vpop.f32.mrb[3].mxu1  ;;  %v804_v49 = vld [vmem:[#allocation12 + $0x1e0] sm:$0xff] }
 0x292   :  { %v814_v58 = vadd.f32 %v813_v52, %v8415_v51  ;;  %v827_v59 = vrot.slane %v820_v53, 4  ;;  %v6501_v52 = vcombine.low %v803_v47, %v804_v49  ;;  %v7601_v54 = vld [vmem:[#allocation4 + $0x4] ss:$12 sps:$4 sm:$0xff]   ;;  %v7607_v57 = vld [vmem:[#allocation4 + $0x34] ss:$12 sps:$4 sm:$0xff]  }
 0x293   :  { %v809_v61 = vrot.slane %v808_v55, 2  ;;  %v822_v62 = vadd.f32 %v821_v56, %v819_v50  ;;  %v6502_v50 = vcombine.high %v803_v47, %v804_v49  ;;  %1632 = vmatprep.subr.bf16.mxu1 %v7601_v54  ;;  %v7602_v56 = vld [vmem:[#allocation4 + $0x18] ss:$12 sps:$4 sm:$0xff]   ;;  %v7631_v47 = vld [vmem:[#allocation4 + $0xe0] ss:$12 sps:$4 sm:$0xff]  }
 0x294   :  { %v815_v63 = vrot.slane %v814_v58, 2  ;;  %v828_v0 = vadd.f32 %v827_v59, %v820_v53  ;;  %v7599_v53 = vld [vmem:[#allocation4] ss:$12 sps:$4 sm:$0xff]   ;;  %v7605_v59 = vld [vmem:[#allocation4 + $0x30] ss:$12 sps:$4 sm:$0xff]  }
 0x295   :  { %v810_v1 = vadd.f32 %v809_v61, %v808_v55  ;;  %v823_v2 = vrot.slane %v822_v62, 2  ;;  %1099 = vmatprep.subr.bf16.mxu0 %v6502_v50  ;;  %v7604_v55 = vld [vmem:[#allocation4 + $0x1c] ss:$12 sps:$4 sm:$0xff]   ;;  %v7610_v61 = vld [vmem:[#allocation4 + $0x4c] ss:$12 sps:$4 sm:$0xff]  }
 0x296   :  { %v816_v3 = vadd.f32 %v815_v63, %v814_v58  ;;  %v829_v4 = vrot.slane %v828_v0, 2  ;;  %1100 = vmatpush1.bf16.msra.mxu0 %v6501_v52  ;;  %v7626_v58 = vld [vmem:[#allocation4 + $0xc8] ss:$12 sps:$4 sm:$0xff]   ;;  %v7613_v63 = vld [vmem:[#allocation4 + $0x64] ss:$12 sps:$4 sm:$0xff]  }
 0x297   :  { %v811_v5 = vrot.slane %v810_v1, 1  ;;  %v824_v6 = vadd.f32 %v823_v2, %v822_v62  ;;  %7033 = vmatprep.subr.bf16.mxu0 %v7626_v58  ;;  %v7608_v62 = vld [vmem:[#allocation4 + $0x48] ss:$12 sps:$4 sm:$0xff]   ;;  %v7614_v2 = vld [vmem:[#allocation4 + $0x78] ss:$12 sps:$4 sm:$0xff]  }
 0x298   :  { %v817_v7 = vrot.slane %v816_v3, 1  ;;  %v830_v8 = vadd.f32 %v829_v4, %v828_v0  ;;  %v7611_v0 = vld [vmem:[#allocation4 + $0x60] ss:$12 sps:$4 sm:$0xff]   ;;  %v7617_v4 = vld [vmem:[#allocation4 + $0x90] ss:$12 sps:$4 sm:$0xff]  }
 0x299   :  { %v825_v9 = vrot.slane %v824_v6, 1  ;;  %v812_v11 = vadd.f32 %v811_v5, %v810_v1  ;;  %v7616_v1 = vld [vmem:[#allocation4 + $0x7c] ss:$12 sps:$4 sm:$0xff]   ;;  %v7622_v5 = vld [vmem:[#allocation4 + $0xac] ss:$12 sps:$4 sm:$0xff]  }
 0x29a   :  { %v831_v10 = vrot.slane %v830_v8, 1  ;;  %v818_v13 = vadd.f32 %v817_v7, %v816_v3  ;;  %v7619_v3 = vld [vmem:[#allocation4 + $0x94] ss:$12 sps:$4 sm:$0xff]   ;;  %v7625_v7 = vld [vmem:[#allocation4 + $0xc4] ss:$12 sps:$4 sm:$0xff]  }
 0x29b   :  { %v826_v12 = vadd.f32 %v825_v9, %v824_v6  ;;  %v7620_v6 = vld [vmem:[#allocation4 + $0xa8] ss:$12 sps:$4 sm:$0xff]   ;;  %v7632_v49 = vld [vmem:[#allocation4 + $0x20] ss:$12 sps:$4 sm:$0xff]   ;;  %v7636_v50 = vld [vmem:[#allocation4 + $0xf8] ss:$12 sps:$4 sm:$0xff]  }
 0x29c   :  { %v832_v14 = vadd.f32 %v831_v10, %v830_v8  ;;  %v7623_v8 = vld [vmem:[#allocation4 + $0xc0] ss:$12 sps:$4 sm:$0xff]   ;;  %v7630_v9 = vld [vmem:[#allocation4 + $0xdc] ss:$12 sps:$4 sm:$0xff]   ;;  %v7628_v10 = vld [vmem:[#allocation4 + $0xd8] ss:$12 sps:$4 sm:$0xff]  }
 0x29d   :  { %v834_v15 = vsel %vm833_vm0, %v812_v11, %v826_v12  ;;  %v7635_v11 = vld [vmem:[#allocation4 + $0xf4] ss:$12 sps:$4 sm:$0xff]   ;;  %v7633_v12 = vld [vmem:[#allocation4 + $0xf0] ss:$12 sps:$4 sm:$0xff]   ;;  %v7637_v52 = vld [vmem:[#allocation4 + $0x38] ss:$12 sps:$4 sm:$0xff]  }
 0x29e   :  { %v835_v16 = vsel %vm833_vm0, %v818_v13, %v832_v14  ;;  %v836_v18 = vpack.c.bf16 %v834_v15, %v834_v15  ;;  %v7640_v13 = vld [vmem:[#allocation4 + $0x10c] ss:$12 sps:$4 sm:$0xff]   ;;  %v7638_v14 = vld [vmem:[#allocation4 + $0x108] ss:$12 sps:$4 sm:$0xff]   ;;  %v7645_v15 = vld [vmem:[#allocation4 + $0x124] ss:$12 sps:$4 sm:$0xff]  }
 0x29f   :  { %v837_v17 = vpack.c.bf16 %v835_v16, %v835_v16  ;;  %v7643_v16 = vld [vmem:[#allocation4 + $0x120] ss:$12 sps:$4 sm:$0xff]   ;;  %v7642_v54 = vld [vmem:[#allocation4 + $0x50] ss:$12 sps:$4 sm:$0xff]  }
 0x2a0   :  { %v7651_v58 = vld [vmem:[#allocation4 + $0x140] ss:$12 sps:$4 sm:$0xff]  }
 0x2a1   :  { %966 = vmatprep.mubr.bf16.mxu1 %v837_v17 }
 0x2a2   :  { %967 = vmatmul.mubr.bf16.vlgmr.msra.gmra.mrb[4].mxu1 %v836_v18 }
 0x2a3   :  { %1633 = vmatpush1.bf16.msra.mxu1 %v7599_v53  ;;  %v7641_v53 = vld [vmem:[#allocation4 + $0x110] ss:$12 sps:$4 sm:$0xff]  }
 0x2a4   :  { %1634 = vmatprep.subr.bf16.mxu1 %v7604_v55  ;;  %v7646_v55 = vld [vmem:[#allocation4 + $0x128] ss:$12 sps:$4 sm:$0xff]  }
 0x2a7   :  { %1635 = vmatpush1.bf16.msra.mxu1 %v7602_v56  ;;  %v7647_v56 = vld [vmem:[#allocation4 + $0x68] ss:$12 sps:$4 sm:$0xff]  }
 0x2a8   :  { %1636 = vmatprep.subr.bf16.mxu1 %v7607_v57  ;;  %v7650_v57 = vld [vmem:[#allocation4 + $0x13c] ss:$12 sps:$4 sm:$0xff]  }
 0x2ab   :  { %1637 = vmatpush1.bf16.msra.mxu1 %v7605_v59  ;;  %v7648_v59 = vld [vmem:[#allocation4 + $0x138] ss:$12 sps:$4 sm:$0xff]  }
 0x2ac   :  { %1638 = vmatprep.subr.bf16.mxu1 %v7610_v61  ;;  %v7652_v61 = vld [vmem:[#allocation4 + $0x80] ss:$12 sps:$4 sm:$0xff]  }
 0x2af   :  { %1639 = vmatpush1.bf16.msra.mxu1 %v7608_v62  ;;  %v7655_v62 = vld [vmem:[#allocation4 + $0x154] ss:$12 sps:$4 sm:$0xff]  }
 0x2b0   :  { %1640 = vmatprep.subr.bf16.mxu1 %v7613_v63  ;;  %v7656_v63 = vld [vmem:[#allocation4 + $0x158] ss:$12 sps:$4 sm:$0xff]  }
 0x2b3   :  { %1641 = vmatpush1.bf16.msra.mxu1 %v7611_v0  ;;  %v7653_v0 = vld [vmem:[#allocation4 + $0x150] ss:$12 sps:$4 sm:$0xff]  }
 0x2b4   :  { %1642 = vmatprep.subr.bf16.mxu1 %v7616_v1  ;;  %v7657_v1 = vld [vmem:[#allocation4 + $0x98] ss:$12 sps:$4 sm:$0xff]  }
 0x2b7   :  { %1643 = vmatpush1.bf16.msra.mxu1 %v7614_v2  ;;  %v7660_v2 = vld [vmem:[#allocation4 + $0x16c] ss:$12 sps:$4 sm:$0xff]  }
 0x2b8   :  { %1644 = vmatprep.subr.bf16.mxu1 %v7619_v3  ;;  %v7661_v3 = vld [vmem:[#allocation4 + $0x170] ss:$12 sps:$4 sm:$0xff]  }
 0x2bb   :  { %1645 = vmatpush1.bf16.msra.mxu1 %v7617_v4  ;;  %v7658_v4 = vld [vmem:[#allocation4 + $0x168] ss:$12 sps:$4 sm:$0xff]  }
 0x2bc   :  { %1646 = vmatprep.subr.bf16.mxu1 %v7622_v5  ;;  %v7662_v5 = vld [vmem:[#allocation4 + $0xb0] ss:$12 sps:$4 sm:$0xff]  }
 0x2bf   :  { %1647 = vmatpush1.bf16.msra.mxu1 %v7620_v6  ;;  %v7665_v6 = vld [vmem:[#allocation4 + $0x184] ss:$12 sps:$4 sm:$0xff]  }
 0x2c0   :  { %1648 = vmatprep.subr.bf16.mxu1 %v7625_v7  ;;  %v8118_v7 = vmov 0.0  }
 0x2c3   :  { %1649 = vmatpush1.bf16.msra.mxu1 %v7623_v8  ;;  %v8444_v8 = vsub.s32 1, %v8425_v32 }
 0x2c4   :  { %1650 = vmatprep.subr.bf16.mxu1 %v7630_v9 }
 0x2c7   :  { %1651 = vmatpush1.bf16.msra.mxu1 %v7628_v10 }
 0x2c8   :  { %1652 = vmatprep.subr.bf16.mxu1 %v7635_v11 }
 0x2cb   :  { %1653 = vmatpush1.bf16.msra.mxu1 %v7633_v12 }
 0x2cc   :  { %1654 = vmatprep.subr.bf16.mxu1 %v7640_v13 }
 0x2cf   :  { %1655 = vmatpush1.bf16.msra.mxu1 %v7638_v14 }
 0x2d0   :  { %1656 = vmatprep.subr.bf16.mxu1 %v7645_v15 }
 0x2d3   :  { %1657 = vmatpush1.bf16.msra.mxu1 %v7643_v16 }
 0x2d4   :  { %1658 = vmatprep.subr.bf16.mxu1 %v7650_v57  ;;  %v7697_v57 = vld [vmem:[#allocation10 + $0x184] ss:$12 sps:$4 sm:$0xff]  }
 0x2d7   :  { %1659 = vmatpush1.bf16.msra.mxu1 %v7648_v59  ;;  %v7700_v59 = vld [vmem:[#allocation10 + $0x19c] ss:$12 sps:$4 sm:$0xff]  }
 0x2d8   :  { %1660 = vmatprep.subr.bf16.mxu1 %v7655_v62  ;;  %v7701_v62 = vld [vmem:[#allocation10 + $0xf4] ss:$12 sps:$4 sm:$0xff]  }
 0x2db   :  { %1661 = vmatpush1.bf16.msra.mxu1 %v7653_v0  ;;  %v7702_v0 = vld [vmem:[#allocation10 + $0x34] ss:$12 sps:$4 sm:$0xff]  }
 0x2dc   :  { %1662 = vmatprep.subr.bf16.mxu1 %v7660_v2  ;;  %v7705_v2 = vld [vmem:[#allocation10 + $0x4c] ss:$12 sps:$4 sm:$0xff]  }
 0x2df   :  { %1663 = vmatpush1.bf16.msra.mxu1 %v7658_v4  ;;  %v7707_v4 = vld [vmem:[#allocation10 + $0x124] ss:$12 sps:$4 sm:$0xff]  }
 0x2e0   :  { %1673 = vmatprep.subr.bf16.mxu1 %v7665_v6  ;;  %v7709_v6 = vld [vmem:[#allocation10 + $0x1e4] ss:$12 sps:$4 sm:$0xff]  }
 0x375   :  { %v7027_v17 = vpop.f32.mrb[4].mxu1 }
 0x376   :  { %v7028_v18 = vpop.f32.mrb[5].mxu1 }
 0x377   :  { %v7029_v19 = vadd.f32 %v7028_v18, %v7027_v17  ;;  %v7030_v20 = vpop.f32.mrb[6].mxu1 }
 0x378   :  { %v7031_v21 = vpop.f32.mrb[7].mxu1 }
 0x379   :  { %v974_v22 = vmul.f32 0.0125, %v7029_v19 }
 0x37b   :  { %v975_v23 = vmul.f32 %v974_v22, %v974_v22 }
 0x37d   :  { %v977_v24 = vrot.slane %v975_v23, 7 }
 0x37f   :  { %v979_v25 = vsub.f32 %v974_v22, %v977_v24 }
 0x381   :  { %v980_v26 = vmax.f32 %v979_v25, 0.0 }
 0x383   :  { %v981_v27 = vadd.f32 1e-05, %v980_v26  ;;  %v7663_v26 = vld [vmem:[#allocation4 + $0x180] ss:$12 sps:$4 sm:$0xff]  }
 0x385   :  { %7911 = vrsqrt.f32 %v981_v27  ;;  %v7666_v27 = vld [vmem:[#allocation4 + $0x188] ss:$12 sps:$4 sm:$0xff]  }
 0x38f   :  { %v7912_v34 = vpop.eup %7911 }
 0x390   :  { %v990_v35 = vrot.slane %v7912_v34, %v8428_v33  ;;  %v7671_v34 = vld [vmem:[#allocation4 + $0x1b0] ss:$12 sps:$4 sm:$0xff]  }
 0x392   :  { %v6486_v37 = vrot.slane %v990_v35, 9  ;;  %v7674_v35 = vld [vmem:[#allocation4 + $0x1b8] ss:$12 sps:$4 sm:$0xff]  }
 0x394   :  { %v994_v38 = vmul.f32 %v6486_v37, %v805_v36  ;;  %v7677_v36 = vld [vmem:[#allocation4 + $0x1cc] ss:$12 sps:$4 sm:$0xff]   ;;  %v7675_v37 = vld [vmem:[#allocation4 + $0x1c8] ss:$12 sps:$4 sm:$0xff]  }
 0x396   :  { %v995_v40 = vmul.f32 %v994_v38, %v974_v22 }
 0x398   :  { %v996_v42 = vsub.f32 %v806_v39, %v995_v40  ;;  %v7681_v39 = vld [vmem:[#allocation4 + $0x1e4] ss:$12 sps:$4 sm:$0xff]   ;;  %v7679_v40 = vld [vmem:[#allocation4 + $0x1e0] ss:$12 sps:$4 sm:$0xff]  }
 0x39a   :  { %v1001_v43 = vrot.slane %v996_v42, %v8438_v41  ;;  %v7682_v42 = vld [vmem:[#allocation4 + $0x1e8] ss:$12 sps:$4 sm:$0xff]  }
 0x39c   :  { %v1003_v44 = vsel %vm833_vm0, %v994_v38, %v1001_v43  ;;  %v7678_v38 = vld [vmem:[#allocation4 + $0x1d0] ss:$12 sps:$4 sm:$0xff]  }
 0x39d   :  { %v1004_v46 = vpack.c.bf16 %v1003_v44, %v1003_v44  ;;  %v7685_v43 = vld [vmem:[#allocation4 + $0x1fc] ss:$12 sps:$4 sm:$0xff]   ;;  %v7683_v44 = vld [vmem:[#allocation4 + $0x1f8] ss:$12 sps:$4 sm:$0xff]  }
 0x39f   :  { %1118 = vmatmul.mubr.bf16.vlgmr.msra.gmra.mrb[4].mxu0 %v1004_v46  ;;  %v7689_v46 = vld [vmem:[#allocation4 + $0x214] ss:$12 sps:$4 sm:$0xff]  }
 0x3a0   :  { %7034 = vmatpush3.bf16.msra.mxu0 %v7627_v45  ;;  %v7686_v45 = vld [vmem:[#allocation4 + $0x200] ss:$12 sps:$4 sm:$0xff]  }
 0x3a1   :  { %7035 = vmatprep.subr.bf16.mxu0 %v7631_v47  ;;  %v7687_v47 = vld [vmem:[#allocation4 + $0x210] ss:$12 sps:$4 sm:$0xff]  }
 0x3a4   :  { %7036 = vmatpush3.bf16.msra.mxu0 %v7632_v49  ;;  %v7690_v49 = vld [vmem:[#allocation4 + $0x218] ss:$12 sps:$4 sm:$0xff]  }
 0x3a5   :  { %7037 = vmatprep.subr.bf16.mxu0 %v7636_v50  ;;  %v7693_v50 = vld [vmem:[#allocation4 + $0x22c] ss:$12 sps:$4 sm:$0xff]  }
 0x3a8   :  { %7038 = vmatpush3.bf16.msra.mxu0 %v7637_v52  ;;  %v7691_v52 = vld [vmem:[#allocation4 + $0x228] ss:$12 sps:$4 sm:$0xff]  }
 0x3a9   :  { %7039 = vmatprep.subr.bf16.mxu0 %v7641_v53  ;;  %v7694_v53 = vld [vmem:[#allocation4 + $0x230] ss:$12 sps:$4 sm:$0xff]  }
 0x3ac   :  { %7040 = vmatpush3.bf16.msra.mxu0 %v7642_v54  ;;  %v7937_v54 = vld [vmem:[%s8767_s0 + $0x8] sm:$0xf] }
 0x3ad   :  { %7041 = vmatprep.subr.bf16.mxu0 %v7646_v55  ;;  %v7695_v55 = vld [vmem:[#allocation10 + $0xc4] ss:$12 sps:$4 sm:$0xff]  }
 0x3b0   :  { %7042 = vmatpush3.bf16.msra.mxu0 %v7647_v56  ;;  %v7696_v56 = vld [vmem:[#allocation10 + $0x4] ss:$12 sps:$4 sm:$0xff]  }
 0x3b1   :  { %7043 = vmatprep.subr.bf16.mxu0 %v7651_v58  ;;  %v7698_v58 = vld [vmem:[#allocation10 + $0xdc] ss:$12 sps:$4 sm:$0xff]  }
 0x3b4   :  { %7044 = vmatpush3.bf16.msra.mxu0 %v7652_v61  ;;  %v7699_v61 = vld [vmem:[#allocation10 + $0x1c] ss:$12 sps:$4 sm:$0xff]  }
 0x3b5   :  { %7045 = vmatprep.subr.bf16.mxu0 %v7656_v63  ;;  %v7703_v63 = vld [vmem:[#allocation10 + $0x1b4] ss:$12 sps:$4 sm:$0xff]  }
 0x3b8   :  { %7046 = vmatpush3.bf16.msra.mxu0 %v7657_v1  ;;  %v7704_v1 = vld [vmem:[#allocation10 + $0x10c] ss:$12 sps:$4 sm:$0xff]  }
 0x3b9   :  { %7047 = vmatprep.subr.bf16.mxu0 %v7661_v3  ;;  %v7706_v3 = vld [vmem:[#allocation10 + $0x1cc] ss:$12 sps:$4 sm:$0xff]  }
 0x3bc   :  { %7048 = vmatpush3.bf16.msra.mxu0 %v7662_v5  ;;  %v7708_v5 = vld [vmem:[#allocation10 + $0x64] ss:$12 sps:$4 sm:$0xff]  }
 0x3bd   :  { %7272 = vmatprep.subr.bf16.mxu0 %v8118_v7 }
 0x472   :  { %v1119_v9 = vpop.f32.mrb[4].mxu0 }
 0x473   :  { %v1129_v10 = vrot.slane %v1119_v9, %v8438_v41  ;;  %v1121_v11 = vpop.f32.mrb[5].mxu0  ;;  %v1139_v15 = vrot.slane %v1119_v9, %v8444_v8  ;;  %v7710_v9 = vld [vmem:[#allocation10 + $0x13c] ss:$12 sps:$4 sm:$0xff]  }
 0x474   :  { %v1133_v12 = vrot.slane %v1121_v11, %v8438_v41  ;;  %v1123_v13 = vpop.f32.mrb[6].mxu0  ;;  %v1143_v18 = vrot.slane %v1121_v11, %v8444_v8  ;;  %v7712_v11 = vld [vmem:[#allocation10 + $0x1fc] ss:$12 sps:$4 sm:$0xff]  }
 0x475   :  { %v1134_v14 = vmul.f32 %v1129_v10, %v8410_v48  ;;  %v1124_v16 = vpop.f32.mrb[7].mxu0  ;;  %v7667_v48 = vld [vmem:[#allocation4 + $0x198] ss:$12 sps:$4 sm:$0xff]   ;;  %v7711_v10 = vld [vmem:[#allocation10 + $0x7c] ss:$12 sps:$4 sm:$0xff]  }
 0x476   :  { %v1135_v17 = vmul.f32 %v1133_v12, %v8415_v51  ;;  %v7670_v51 = vld [vmem:[#allocation4 + $0x1a0] ss:$12 sps:$4 sm:$0xff]  }
 0x477   :  { %v1144_v19 = vadd.f32 %v1139_v15, %v1134_v14  ;;  %v7713_v12 = vld [vmem:[#allocation10 + $0x154] ss:$12 sps:$4 sm:$0xff]   ;;  %v7716_v15 = vld [vmem:[#allocation10 + $0x16c] ss:$12 sps:$4 sm:$0xff]  }
 0x478   :  { %v1145_v20 = vadd.f32 %v1143_v18, %v1135_v17  ;;  %v7714_v13 = vld [vmem:[#allocation10 + $0x94] ss:$12 sps:$4 sm:$0xff]   ;;  %v7717_v16 = vld [vmem:[#allocation10 + $0xac] ss:$12 sps:$4 sm:$0xff]  }
 0x479   :  { %v1146_v21 = vmul.f32 0.2, %v1144_v19  ;;  %v7715_v14 = vld [vmem:[#allocation10 + $0x214] ss:$12 sps:$4 sm:$0xff]   ;;  %v7718_v17 = vld [vmem:[#allocation10 + $0x22c] ss:$12 sps:$4 sm:$0xff]  }
 0x47a   :  { %v1147_v22 = vmul.f32 0.2, %v1145_v20 }
 0x47b   :  { %v1148_v23 = vmax.f32 %v1144_v19, %v1146_v21 }
 0x47c   :  { %v1149_v24 = vmax.f32 %v1145_v20, %v1147_v22 }
 0x47d   :  { %v1150_v28 = vpack.c.bf16 %v1148_v23, %v1148_v23 }
 0x47e   :  { %v1151_v25 = vpack.c.bf16 %v1149_v24, %v1149_v24 }
 0x480   :  { %1664 = vmatprep.mubr.bf16.mxu1 %v1151_v25  ;;  %1746 = vmatprep.mubr.bf16.mxu0 %v1151_v25 }
 0x481   :  { %1665 = vmatmul.mubr.bf16.vlgmr.msra.gmra.mrb[8].mxu1 %v1150_v28  ;;  %1747 = vmatmul.mubr.bf16.vlgmr.msra.gmra.mrb[8].mxu0 %v1150_v28 }
 0x482   :  { %1674 = vmatpush1.bf16.msra.mxu1 %v7663_v26  ;;  %7273 = vmatpush3.bf16.msra.mxu0 %v7666_v27 }
 0x483   :  { %1675 = vmatprep.subr.bf16.mxu1 %v7669_v29  ;;  %7274 = vmatprep.subr.bf16.mxu0 %v8118_v7 }
 0x484   :  { %1705 = vmatprep.mubr.bf16.mxu1 %v8116_v60  ;;  %7288 = vmatprep.mubr.msk.bf16.mxu0 %vm8119_vm1, %v8118_v7 }
 0x486   :  { %1676 = vmatpush1.bf16.msra.mxu1 %v7667_v48  ;;  %7275 = vmatpush3.bf16.msra.mxu0 %v7670_v51 }
 0x487   :  { %1677 = vmatprep.subr.bf16.mxu1 %v7673_v31  ;;  %7276 = vmatprep.subr.bf16.mxu0 %v8118_v7 }
 0x48a   :  { %1678 = vmatpush1.bf16.msra.mxu1 %v7671_v34  ;;  %7277 = vmatpush3.bf16.msra.mxu0 %v7674_v35 }
 0x48b   :  { %1679 = vmatprep.subr.bf16.mxu1 %v7677_v36  ;;  %7278 = vmatprep.subr.bf16.mxu0 %v8118_v7 }
 0x48e   :  { %1680 = vmatpush1.bf16.msra.mxu1 %v7675_v37  ;;  %7279 = vmatpush3.bf16.msra.mxu0 %v7678_v38 }
 0x48f   :  { %1681 = vmatprep.subr.bf16.mxu1 %v7681_v39  ;;  %7280 = vmatprep.subr.bf16.mxu0 %v8118_v7 }
 0x492   :  { %1682 = vmatpush1.bf16.msra.mxu1 %v7679_v40  ;;  %7281 = vmatpush3.bf16.msra.mxu0 %v7682_v42 }
 0x493   :  { %1683 = vmatprep.subr.bf16.mxu1 %v7685_v43  ;;  %7282 = vmatprep.subr.bf16.mxu0 %v8118_v7 }
 0x496   :  { %1684 = vmatpush1.bf16.msra.mxu1 %v7683_v44  ;;  %7283 = vmatpush3.bf16.msra.mxu0 %v7686_v45 }
 0x497   :  { %1685 = vmatprep.subr.bf16.mxu1 %v7689_v46  ;;  %7284 = vmatprep.subr.bf16.mxu0 %v8118_v7 }
 0x49a   :  { %1686 = vmatpush1.bf16.msra.mxu1 %v7687_v47  ;;  %7285 = vmatpush3.bf16.msra.mxu0 %v7690_v49 }
 0x49b   :  { %1687 = vmatprep.subr.bf16.mxu1 %v7693_v50  ;;  %7286 = vmatprep.subr.bf16.mxu0 %v8118_v7 }
 0x49e   :  { %1688 = vmatpush1.bf16.msra.mxu1 %v7691_v52  ;;  %7287 = vmatpush3.bf16.msra.mxu0 %v7694_v53 }
 0x49f   :  { %7292 = vmatprep.subr.bf16.mxu1 %v8118_v7  ;;  %7064 = vmatprep.subr.bf16.mxu0 %v7695_v55 }
 0x4a1   :  { %1706 = vmatmul.mubr.bf16.vlgmr.msra.gmra.mrb[8].mxu1 %v7937_v54  ;;  %7289 = vmatmul.mubr.bf16.vlgmr.msra.gmra.mrb[12].mxu0 %v7937_v54 }
 0x4a2   :  { %7308 = vmatprep.mubr.msk.bf16.mxu1 %vm8119_vm1, %v8118_v7  ;;  %7293 = vmatpush3.bf16.msra.mxu1 %v7697_v57 }
 0x4a3   :  { %7065 = vmatpush3.bf16.msra.mxu0 %v7696_v56  ;;  %7294 = vmatprep.subr.bf16.mxu1 %v8118_v7 }
 0x4a4   :  { %7066 = vmatprep.subr.bf16.mxu0 %v7698_v58 }
 0x4a6   :  { %7295 = vmatpush3.bf16.msra.mxu1 %v7700_v59 }
 0x4a7   :  { %7067 = vmatpush3.bf16.msra.mxu0 %v7699_v61  ;;  %7296 = vmatprep.subr.bf16.mxu1 %v8118_v7 }
 0x4a8   :  { %7068 = vmatprep.subr.bf16.mxu0 %v7701_v62 }
 0x4aa   :  { %7297 = vmatpush3.bf16.msra.mxu1 %v7703_v63 }
 0x4ab   :  { %7069 = vmatpush3.bf16.msra.mxu0 %v7702_v0  ;;  %7298 = vmatprep.subr.bf16.mxu1 %v8118_v7 }
 0x4ac   :  { %7070 = vmatprep.subr.bf16.mxu0 %v7704_v1 }
 0x4ae   :  { %7299 = vmatpush3.bf16.msra.mxu1 %v7706_v3 }
 0x4af   :  { %7071 = vmatpush3.bf16.msra.mxu0 %v7705_v2  ;;  %7300 = vmatprep.subr.bf16.mxu1 %v8118_v7 }
 0x4b0   :  { %7072 = vmatprep.subr.bf16.mxu0 %v7707_v4 }
 0x4b2   :  { %7301 = vmatpush3.bf16.msra.mxu1 %v7709_v6 }
 0x4b3   :  { %7073 = vmatpush3.bf16.msra.mxu0 %v7708_v5  ;;  %7302 = vmatprep.subr.bf16.mxu1 %v8118_v7 }
 0x4b4   :  { %7074 = vmatprep.subr.bf16.mxu0 %v7710_v9 }
 0x4b6   :  { %7303 = vmatpush3.bf16.msra.mxu1 %v7712_v11 }
 0x4b7   :  { %7075 = vmatpush3.bf16.msra.mxu0 %v7711_v10  ;;  %7304 = vmatprep.subr.bf16.mxu1 %v8118_v7 }
 0x4b8   :  { %7076 = vmatprep.subr.bf16.mxu0 %v7713_v12 }
 0x4ba   :  { %7305 = vmatpush3.bf16.msra.mxu1 %v7715_v14 }
 0x4bb   :  { %7077 = vmatpush3.bf16.msra.mxu0 %v7714_v13  ;;  %7306 = vmatprep.subr.bf16.mxu1 %v8118_v7 }
 0x4bc   :  { %7078 = vmatprep.subr.bf16.mxu0 %v7716_v15 }
 0x4be   :  { %7307 = vmatpush3.bf16.msra.mxu1 %v7718_v17 }
 0x4bf   :  { %7079 = vmatpush3.bf16.msra.mxu0 %v7717_v16  ;;  %7312 = vmatprep.subr.bf16.mxu1 %v8118_v7 }
 0x554   :  { %v7049_v18 = vpop.f32.mrb[8].mxu0 }
 0x555   :  { %v7050_v19 = vpop.f32.mrb[9].mxu0 }
 0x556   :  { %v7051_v20 = vadd.f32 %v7050_v19, %v7049_v18  ;;  %v7052_v21 = vpop.f32.mrb[10].mxu0 }
 0x557   :  { %v7053_v22 = vpop.f32.mrb[11].mxu0  ;;  %v1844_v21 = vld [vmem:[#allocation12 + $0x28] sm:$0xff] }
 0x574   :  { %v8476_v23 = vpop.f32.mrb[8].mxu1  ;;  %v1788_v24 = vpop.f32.mrb[12].mxu0 }
 0x575   :  { %v1876_v25 = vrot.slane %v8476_v23, 4  ;;  %v1894_v26 = vmul.f32 %v8476_v23, %v8476_v23  ;;  %v8481_v27 = vadd.f32 %v7051_v20, %v1788_v24  ;;  %v8483_v28 = vpop.f32.mrb[9].mxu1  ;;  %v7290_v29 = vpop.f32.mrb[13].mxu0  ;;  %v1842_v20 = vld [vmem:[#allocation12 + $0x8] sm:$0xff]  ;;  %v1843_v24 = vld [vmem:[#allocation12 + $0x10] sm:$0xf] }
 0x576   :  { %v1882_v48 = vrot.slane %v8483_v28, 4  ;;  %v1895_v51 = vmul.f32 %v8483_v28, %v8483_v28  ;;  %v1711_v31 = vpop.f32.mrb[10].mxu1  ;;  %v1791_v34 = vpop.f32.mrb[14].mxu0  ;;  %v6601_v22 = vcombine.high %v1842_v20, %v1844_v21 }
 0x577   :  { %v1877_v35 = vadd.f32 %v1876_v25, %v8476_v23  ;;  %v1897_v36 = vrot.slane %v1894_v26, 4  ;;  %v1888_v37 = vrot.slane %v8481_v27, 4  ;;  %v1896_v38 = vmul.f32 %v8481_v27, %v8481_v27  ;;  %v1712_v39 = vpop.f32.mrb[11].mxu1  ;;  %v7291_v40 = vpop.f32.mrb[15].mxu0  ;;  %v1845_v25 = vld [vmem:[#allocation12 + $0x30] sm:$0xf] }
 0x578   :  { %v1883_v42 = vadd.f32 %v1882_v48, %v8483_v28  ;;  %v1903_v43 = vrot.slane %v1895_v51, 4  ;;  %v6602_v29 = vcombine.low %v1843_v24, %v1845_v25  ;;  %2304 = vmatprep.subr.bf16.mxu0 %v6601_v22  ;;  %v1846_v48 = vld [vmem:[#allocation12 + $0x48] sm:$0xff]  ;;  %v1847_v34 = vld [vmem:[#allocation12 + $0x50] sm:$0xf] }
 0x579   :  { %v1878_v44 = vrot.slane %v1877_v35, 2  ;;  %v1898_v45 = vadd.f32 %v1897_v36, %v1894_v26  ;;  %v1889_v46 = vadd.f32 %v1888_v37, %v8481_v27  ;;  %v1909_v47 = vrot.slane %v1896_v38, 4  ;;  %v1852_v39 = vld [vmem:[#allocation12 + $0xa8] sm:$0xff]  ;;  %v7721_v22 = vld [vmem:[#allocation6 + $0x4] ss:$12 sps:$4 sm:$0xff]  }
 0x57a   :  { %v1884_v49 = vrot.slane %v1883_v42, 2  ;;  %v1904_v50 = vadd.f32 %v1903_v43, %v1895_v51  ;;  %v6600_v26 = vcombine.low %v1842_v20, %v1844_v21  ;;  %v1848_v51 = vld [vmem:[#allocation12 + $0x68] sm:$0xff]  ;;  %v1853_v43 = vld [vmem:[#allocation12 + $0xb0] sm:$0xf] }
 0x57b   :  { %v1879_v52 = vadd.f32 %v1878_v44, %v1877_v35  ;;  %v1899_v53 = vrot.slane %v1898_v45, 2  ;;  %v1890_v54 = vrot.slane %v1889_v46, 2  ;;  %v1910_v55 = vadd.f32 %v1909_v47, %v1896_v38  ;;  %v1849_v35 = vld [vmem:[#allocation12 + $0x70] sm:$0xf]  ;;  %v1850_v38 = vld [vmem:[#allocation12 + $0x88] sm:$0xff] }
 0x57c   :  { %v1885_v56 = vadd.f32 %v1884_v49, %v1883_v42  ;;  %v1905_v57 = vrot.slane %v1904_v50, 2  ;;  %v6604_v31 = vcombine.high %v1846_v48, %v1848_v51  ;;  %v6603_v36 = vcombine.low %v1846_v48, %v1848_v51  ;;  %v1851_v42 = vld [vmem:[#allocation12 + $0x90] sm:$0xf]  ;;  %v1856_v47 = vld [vmem:[#allocation12 + $0xe8] sm:$0xff] }
 0x57d   :  { %v1880_v58 = vrot.slane %v1879_v52, 1  ;;  %v1900_v59 = vadd.f32 %v1899_v53, %v1898_v45  ;;  %v1891_v61 = vadd.f32 %v1890_v54, %v1889_v46  ;;  %v1911_v62 = vrot.slane %v1910_v55, 2  ;;  %v1854_v46 = vld [vmem:[#allocation12 + $0xc8] sm:$0xff] }
 0x57e   :  { %v1886_v63 = vrot.slane %v1885_v56, 1  ;;  %v1906_v0 = vadd.f32 %v1905_v57, %v1904_v50  ;;  %v6605_v37 = vcombine.low %v1847_v34, %v1849_v35  ;;  %v6607_v40 = vcombine.high %v1850_v38, %v1852_v39  ;;  %v1855_v50 = vld [vmem:[#allocation12 + $0xd0] sm:$0xf]  ;;  %v7746_v24 = vld [vmem:[#allocation6 + $0xc8] ss:$12 sps:$4 sm:$0xff]  }
 0x57f   :  { %v1901_v1 = vrot.slane %v1900_v59, 1  ;;  %v1892_v2 = vrot.slane %v1891_v61, 1  ;;  %v1912_v3 = vadd.f32 %v1911_v62, %v1910_v55  ;;  %v1881_v5 = vadd.f32 %v1880_v58, %v1879_v52  ;;  %v1857_v52 = vld [vmem:[#allocation12 + $0xf0] sm:$0xf]  ;;  %v1858_v55 = vld [vmem:[#allocation12 + $0x108] sm:$0xff] }
 0x580   :  { %v1907_v4 = vrot.slane %v1906_v0, 1  ;;  %v1887_v10 = vadd.f32 %v1886_v63, %v1885_v56  ;;  %v6606_v44 = vcombine.low %v1850_v38, %v1852_v39  ;;  %v6608_v45 = vcombine.low %v1851_v42, %v1853_v43  ;;  %v1860_v56 = vld [vmem:[#allocation12 + $0x128] sm:$0xff]  ;;  %v1859_v58 = vld [vmem:[#allocation12 + $0x110] sm:$0xf] }
 0x581   :  { %v1902_v6 = vadd.f32 %v1901_v1, %v1900_v59  ;;  %v1913_v9 = vrot.slane %v1912_v3, 1  ;;  %v1893_v13 = vadd.f32 %v1892_v2, %v1891_v61  ;;  %v6610_v49 = vcombine.high %v1854_v46, %v1856_v47  ;;  %v1861_v59 = vld [vmem:[#allocation12 + $0x130] sm:$0xf]  ;;  %v1862_v63 = vld [vmem:[#allocation12 + $0x148] sm:$0xff] }
 0x582   :  { %v1908_v11 = vadd.f32 %v1907_v4, %v1906_v0  ;;  %v6609_v53 = vcombine.low %v1854_v46, %v1856_v47  ;;  %v6611_v54 = vcombine.low %v1855_v50, %v1857_v52  ;;  %v6613_v57 = vcombine.high %v1858_v55, %v1860_v56  ;;  %v1864_v0 = vld [vmem:[#allocation12 + $0x168] sm:$0xff]  ;;  %v1863_v2 = vld [vmem:[#allocation12 + $0x150] sm:$0xf]  ;;  %v1874_v47 = vld [vmem:[%s8776_s9 + $0x2] sm:$0x1] }
 0x583   :  { %v1915_v12 = vsel %vm833_vm0, %v1881_v5, %v1902_v6  ;;  %v1914_v14 = vadd.f32 %v1913_v9, %v1912_v3  ;;  %v6612_v61 = vcombine.low %v1858_v55, %v1860_v56  ;;  %v6614_v62 = vcombine.low %v1859_v58, %v1861_v59  ;;  %v1865_v3 = vld [vmem:[#allocation12 + $0x170] sm:$0xf]  ;;  %v1866_v6 = vld [vmem:[#allocation12 + $0x188] sm:$0xff]  ;;  %v1875_v52 = vld [vmem:[%s8776_s9 + $0x3] sm:$0x1] }
 0x584   :  { %v1916_v15 = vsel %vm833_vm0, %v1887_v10, %v1908_v11  ;;  %v1918_v18 = vpack.c.bf16 %v1915_v12, %v1915_v12  ;;  %v6616_v1 = vcombine.high %v1862_v63, %v1864_v0  ;;  %v6615_v4 = vcombine.low %v1862_v63, %v1864_v0  ;;  %v1868_v9 = vld [vmem:[#allocation12 + $0x1a8] sm:$0xff]  ;;  %v1867_v11 = vld [vmem:[#allocation12 + $0x190] sm:$0xf]  ;;  %v7722_v63 = vld [vmem:[#allocation6 + $0x18] ss:$12 sps:$4 sm:$0xff]  }
 0x585   :  { %v1919_v16 = vpack.c.bf16 %v1916_v15, %v1916_v15  ;;  %v1917_v17 = vsel %vm833_vm0, %v1893_v13, %v1914_v14  ;;  %v6617_v5 = vcombine.low %v1863_v2, %v1865_v3  ;;  %v6619_v10 = vcombine.high %v1866_v6, %v1868_v9  ;;  %v1869_v12 = vld [vmem:[#allocation12 + $0x1b0] sm:$0xf]  ;;  %v1870_v15 = vld [vmem:[#allocation12 + $0x1c8] sm:$0xff]  ;;  %v7756_v2 = vld [vmem:[#allocation6 + $0xf8] ss:$12 sps:$4 sm:$0xff]  }
 0x586   :  { %v1920_v19 = vpack.c.bf16 %v1917_v17, %v1917_v17  ;;  %v6618_v13 = vcombine.low %v1866_v6, %v1868_v9  ;;  %v6620_v14 = vcombine.low %v1867_v11, %v1869_v12  ;;  %v7747_v58 = vld [vmem:[#allocation6 + $0x8] ss:$12 sps:$4 sm:$0xff]   ;;  %v7752_v0 = vld [vmem:[#allocation6 + $0x20] ss:$12 sps:$4 sm:$0xff]   ;;  %v7725_v3 = vld [vmem:[#allocation6 + $0x30] ss:$12 sps:$4 sm:$0xff]  }
 0x587   :  { %2097 = vmatprep.mubr.bf16.mxu0 %v1919_v16  ;;  %v1872_v16 = vld [vmem:[#allocation12 + $0x1e8] sm:$0xff]  ;;  %v7761_v6 = vld [vmem:[#allocation6 + $0x110] ss:$12 sps:$4 sm:$0xff]  }
 0x588   :  { %2098 = vmatmul.mubr.bf16.vlgmr.msra.gmra.mrb[16].mxu0 %v1918_v18  ;;  %7309 = vmatmul.mubr.bf16.vlgmr.msra.gmra.mrb[12].mxu1 %v1920_v19  ;;  %v6622_v17 = vcombine.high %v1870_v15, %v1872_v16  ;;  %v1871_v18 = vld [vmem:[#allocation12 + $0x1d0] sm:$0xf]  ;;  %v6621_v20 = vcombine.low %v1870_v15, %v1872_v16  ;;  %v7728_v9 = vld [vmem:[#allocation6 + $0x48] ss:$12 sps:$4 sm:$0xff]   ;;  %v7734_v16 = vld [vmem:[#allocation6 + $0x78] ss:$12 sps:$4 sm:$0xff]  }
 0x589   :  { %2336 = vmatprep.mubr.bf16.mxu0 %v8116_v60  ;;  %7328 = vmatprep.mubr.msk.bf16.mxu1 %vm8119_vm1, %v8118_v7  ;;  %v1873_v19 = vld [vmem:[#allocation12 + $0x1f0] sm:$0xf]  ;;  %v7766_v12 = vld [vmem:[#allocation6 + $0x128] ss:$12 sps:$4 sm:$0xff]  }
 0x58a   :  { %2305 = vmatpush1.bf16.msra.mxu0 %v6600_v26  ;;  %7313 = vmatpush3.bf16.msra.mxu1 %v6602_v29  ;;  %v6623_v21 = vcombine.low %v1871_v18, %v1873_v19  ;;  %v7733_v11 = vld [vmem:[#allocation6 + $0x64] ss:$12 sps:$4 sm:$0xff]   ;;  %v7736_v15 = vld [vmem:[#allocation6 + $0x7c] ss:$12 sps:$4 sm:$0xff]   ;;  %v7742_v19 = vld [vmem:[#allocation6 + $0xac] ss:$12 sps:$4 sm:$0xff]  }
 0x58b   :  { %7314 = vmatprep.subr.bf16.mxu1 %v8118_v7  ;;  %2306 = vmatprep.subr.bf16.mxu0 %v6604_v31  ;;  %v7737_v18 = vld [vmem:[#allocation6 + $0x90] ss:$12 sps:$4 sm:$0xff]  }
 0x58e   :  { %2307 = vmatpush1.bf16.msra.mxu0 %v6603_v36  ;;  %7315 = vmatpush3.bf16.msra.mxu1 %v6605_v37 }
 0x58f   :  { %7316 = vmatprep.subr.bf16.mxu1 %v8118_v7  ;;  %2308 = vmatprep.subr.bf16.mxu0 %v6607_v40 }
 0x592   :  { %2309 = vmatpush1.bf16.msra.mxu0 %v6606_v44  ;;  %7317 = vmatpush3.bf16.msra.mxu1 %v6608_v45 }
 0x593   :  { %7318 = vmatprep.subr.bf16.mxu1 %v8118_v7  ;;  %2310 = vmatprep.subr.bf16.mxu0 %v6610_v49 }
 0x596   :  { %2311 = vmatpush1.bf16.msra.mxu0 %v6609_v53  ;;  %7319 = vmatpush3.bf16.msra.mxu1 %v6611_v54 }
 0x597   :  { %7320 = vmatprep.subr.bf16.mxu1 %v8118_v7  ;;  %2312 = vmatprep.subr.bf16.mxu0 %v6613_v57  ;;  %v7719_v57 = vld [vmem:[#allocation6] ss:$12 sps:$4 sm:$0xff]  }
 0x59a   :  { %2313 = vmatpush1.bf16.msra.mxu0 %v6612_v61  ;;  %7321 = vmatpush3.bf16.msra.mxu1 %v6614_v62  ;;  %v7724_v61 = vld [vmem:[#allocation6 + $0x1c] ss:$12 sps:$4 sm:$0xff]   ;;  %v7751_v62 = vld [vmem:[#allocation6 + $0xe0] ss:$12 sps:$4 sm:$0xff]  }
 0x59b   :  { %7322 = vmatprep.subr.bf16.mxu1 %v8118_v7  ;;  %2314 = vmatprep.subr.bf16.mxu0 %v6616_v1  ;;  %v7727_v1 = vld [vmem:[#allocation6 + $0x34] ss:$12 sps:$4 sm:$0xff]  }
 0x59e   :  { %2315 = vmatpush1.bf16.msra.mxu0 %v6615_v4  ;;  %7323 = vmatpush3.bf16.msra.mxu1 %v6617_v5  ;;  %v7757_v4 = vld [vmem:[#allocation6 + $0x38] ss:$12 sps:$4 sm:$0xff]  }
 0x59f   :  { %7324 = vmatprep.subr.bf16.mxu1 %v8118_v7  ;;  %2316 = vmatprep.subr.bf16.mxu0 %v6619_v10  ;;  %v7730_v5 = vld [vmem:[#allocation6 + $0x4c] ss:$12 sps:$4 sm:$0xff]   ;;  %v7762_v10 = vld [vmem:[#allocation6 + $0x50] ss:$12 sps:$4 sm:$0xff]  }
 0x5a2   :  { %2317 = vmatpush1.bf16.msra.mxu0 %v6618_v13  ;;  %7325 = vmatpush3.bf16.msra.mxu1 %v6620_v14  ;;  %v7731_v13 = vld [vmem:[#allocation6 + $0x60] ss:$12 sps:$4 sm:$0xff]   ;;  %v7767_v14 = vld [vmem:[#allocation6 + $0x68] ss:$12 sps:$4 sm:$0xff]  }
 0x5a3   :  { %7326 = vmatprep.subr.bf16.mxu1 %v8118_v7  ;;  %2318 = vmatprep.subr.bf16.mxu0 %v6622_v17  ;;  %v7739_v17 = vld [vmem:[#allocation6 + $0x94] ss:$12 sps:$4 sm:$0xff]  }
 0x5a6   :  { %2319 = vmatpush1.bf16.msra.mxu0 %v6621_v20  ;;  %7327 = vmatpush3.bf16.msra.mxu1 %v6623_v21  ;;  %v7740_v20 = vld [vmem:[#allocation6 + $0xa8] ss:$12 sps:$4 sm:$0xff]   ;;  %v7745_v21 = vld [vmem:[#allocation6 + $0xc4] ss:$12 sps:$4 sm:$0xff]  }
 0x5a7   :  { %2904 = vmatprep.subr.bf16.mxu0 %v7721_v22  ;;  %7104 = vmatprep.subr.bf16.mxu1 %v7746_v24  ;;  %v7743_v22 = vld [vmem:[#allocation6 + $0xc0] ss:$12 sps:$4 sm:$0xff]   ;;  %v7750_v24 = vld [vmem:[#allocation6 + $0xdc] ss:$12 sps:$4 sm:$0xff]  }
 0x65b   :  { %v7080_v25 = vpop.f32.mrb[16].mxu0  ;;  %v2139_v26 = vpop.f32.mrb[12].mxu1 }
 0x65c   :  { %v7081_v29 = vpop.f32.mrb[17].mxu0  ;;  %v7310_v48 = vpop.f32.mrb[13].mxu1 }
 0x65d   :  { %v7082_v51 = vadd.f32 %v7081_v29, %v7080_v25  ;;  %v7083_v31 = vpop.f32.mrb[18].mxu0  ;;  %v2142_v34 = vpop.f32.mrb[14].mxu1  ;;  %v7748_v25 = vld [vmem:[#allocation6 + $0xd8] ss:$12 sps:$4 sm:$0xff]   ;;  %v7753_v29 = vld [vmem:[#allocation6 + $0xf0] ss:$12 sps:$4 sm:$0xff]  }
 0x65e   :  { %v7084_v35 = vpop.f32.mrb[19].mxu0  ;;  %v7311_v36 = vpop.f32.mrb[15].mxu1  ;;  %v7760_v48 = vld [vmem:[#allocation6 + $0x10c] ss:$12 sps:$4 sm:$0xff]   ;;  %v7765_v31 = vld [vmem:[#allocation6 + $0x124] ss:$12 sps:$4 sm:$0xff]  }
 0x65f   :  { %v2140_v37 = vadd.f32 %v7082_v51, %v2139_v26  ;;  %v7755_v26 = vld [vmem:[#allocation6 + $0xf4] ss:$12 sps:$4 sm:$0xff]   ;;  %v7770_v35 = vld [vmem:[#allocation6 + $0x13c] ss:$12 sps:$4 sm:$0xff]  }
 0x660   :  { %v7758_v51 = vld [vmem:[#allocation6 + $0x108] ss:$12 sps:$4 sm:$0xff]   ;;  %v7763_v34 = vld [vmem:[#allocation6 + $0x120] ss:$12 sps:$4 sm:$0xff]  }
 0x661   :  { %v2145_v38 = vmul.f32 0.017857144, %v2140_v37  ;;  %v7771_v36 = vld [vmem:[#allocation6 + $0x140] ss:$12 sps:$4 sm:$0xff]   ;;  %v7768_v37 = vld [vmem:[#allocation6 + $0x138] ss:$12 sps:$4 sm:$0xff]  }
 0x663   :  { %v2146_v39 = vmul.f32 %v2145_v38, %v2145_v38 }
 0x665   :  { %v2148_v40 = vrot.slane %v2146_v39, 7  ;;  %v7775_v39 = vld [vmem:[#allocation6 + $0x154] ss:$12 sps:$4 sm:$0xff]  }
 0x667   :  { %v2150_v42 = vsub.f32 %v2145_v38, %v2148_v40  ;;  %v7776_v40 = vld [vmem:[#allocation6 + $0x158] ss:$12 sps:$4 sm:$0xff]  }
 0x669   :  { %v2151_v43 = vmax.f32 %v2150_v42, 0.0  ;;  %v7773_v42 = vld [vmem:[#allocation6 + $0x150] ss:$12 sps:$4 sm:$0xff]  }
 0x66b   :  { %v2152_v44 = vadd.f32 1e-05, %v2151_v43  ;;  %v7777_v43 = vld [vmem:[#allocation6 + $0x98] ss:$12 sps:$4 sm:$0xff]  }
 0x66d   :  { %7913 = vrsqrt.f32 %v2152_v44  ;;  %v7780_v44 = vld [vmem:[#allocation6 + $0x16c] ss:$12 sps:$4 sm:$0xff]  }
 0x677   :  { %v7914_v45 = vpop.eup %7913 }
 0x678   :  { %v2161_v46 = vrot.slane %v7914_v45, %v8428_v33  ;;  %v7781_v45 = vld [vmem:[#allocation6 + $0x170] ss:$12 sps:$4 sm:$0xff]  }
 0x67a   :  { %v6599_v49 = vrot.slane %v2161_v46, 9  ;;  %v7778_v46 = vld [vmem:[#allocation6 + $0x168] ss:$12 sps:$4 sm:$0xff]  }
 0x67c   :  { %v2165_v50 = vmul.f32 %v6599_v49, %v1874_v47  ;;  %v7782_v47 = vld [vmem:[#allocation6 + $0xb0] ss:$12 sps:$4 sm:$0xff]  }
 0x67d   :  { %v7785_v49 = vld [vmem:[#allocation6 + $0x184] ss:$12 sps:$4 sm:$0xff]  }
 0x67e   :  { %v2166_v53 = vmul.f32 %v2165_v50, %v2145_v38  ;;  %v7772_v38 = vld [vmem:[#allocation6 + $0x80] ss:$12 sps:$4 sm:$0xff]  }
 0x680   :  { %v2167_v54 = vsub.f32 %v1875_v52, %v2166_v53 }
 0x682   :  { %v2172_v55 = vrot.slane %v2167_v54, %v8438_v41 }
 0x684   :  { %v2174_v56 = vsel %vm833_vm0, %v2165_v50, %v2172_v55 }
 0x685   :  { %v2175_v59 = vpack.c.bf16 %v2174_v56, %v2174_v56 }
 0x687   :  { %2337 = vmatmul.mubr.bf16.vlgmr.msra.gmra.mrb[20].mxu0 %v2175_v59  ;;  %7329 = vmatmul.mubr.bf16.vlgmr.msra.gmra.mrb[16].mxu1 %v2175_v59 }
 0x688   :  { %2905 = vmatpush1.bf16.msra.mxu0 %v7719_v57  ;;  %7105 = vmatpush3.bf16.msra.mxu1 %v7747_v58 }
 0x689   :  { %2906 = vmatprep.subr.bf16.mxu0 %v7724_v61  ;;  %7106 = vmatprep.subr.bf16.mxu1 %v7751_v62 }
 0x68c   :  { %2907 = vmatpush1.bf16.msra.mxu0 %v7722_v63  ;;  %7107 = vmatpush3.bf16.msra.mxu1 %v7752_v0 }
 0x68d   :  { %2908 = vmatprep.subr.bf16.mxu0 %v7727_v1  ;;  %7108 = vmatprep.subr.bf16.mxu1 %v7756_v2 }
 0x690   :  { %2909 = vmatpush1.bf16.msra.mxu0 %v7725_v3  ;;  %7109 = vmatpush3.bf16.msra.mxu1 %v7757_v4 }
 0x691   :  { %2910 = vmatprep.subr.bf16.mxu0 %v7730_v5  ;;  %7110 = vmatprep.subr.bf16.mxu1 %v7761_v6 }
 0x694   :  { %2911 = vmatpush1.bf16.msra.mxu0 %v7728_v9  ;;  %7111 = vmatpush3.bf16.msra.mxu1 %v7762_v10 }
 0x695   :  { %2912 = vmatprep.subr.bf16.mxu0 %v7733_v11  ;;  %7112 = vmatprep.subr.bf16.mxu1 %v7766_v12  ;;  %v7783_v11 = vld [vmem:[#allocation6 + $0x180] ss:$12 sps:$4 sm:$0xff]   ;;  %v7786_v12 = vld [vmem:[#allocation6 + $0x188] ss:$12 sps:$4 sm:$0xff]  }
 0x698   :  { %2913 = vmatpush1.bf16.msra.mxu0 %v7731_v13  ;;  %7113 = vmatpush3.bf16.msra.mxu1 %v7767_v14  ;;  %v7789_v14 = vld [vmem:[#allocation6 + $0x19c] ss:$12 sps:$4 sm:$0xff]  }
 0x699   :  { %2914 = vmatprep.subr.bf16.mxu0 %v7736_v15  ;;  %7114 = vmatprep.subr.bf16.mxu1 %v7771_v36  ;;  %v7793_v15 = vld [vmem:[#allocation6 + $0x1b4] ss:$12 sps:$4 sm:$0xff]   ;;  %v7807_v36 = vld [vmem:[#allocation6 + $0x210] ss:$12 sps:$4 sm:$0xff]  }
 0x69c   :  { %2915 = vmatpush1.bf16.msra.mxu0 %v7734_v16  ;;  %7115 = vmatpush3.bf16.msra.mxu1 %v7772_v38  ;;  %v7791_v16 = vld [vmem:[#allocation6 + $0x1b0] ss:$12 sps:$4 sm:$0xff]   ;;  %v7813_v38 = vld [vmem:[#allocation6 + $0x22c] ss:$12 sps:$4 sm:$0xff]  }
 0x69d   :  { %2916 = vmatprep.subr.bf16.mxu0 %v7739_v17  ;;  %7116 = vmatprep.subr.bf16.mxu1 %v7776_v40  ;;  %v7794_v17 = vld [vmem:[#allocation6 + $0x1b8] ss:$12 sps:$4 sm:$0xff]   ;;  %v7814_v40 = vld [vmem:[#allocation6 + $0x230] ss:$12 sps:$4 sm:$0xff]  }
 0x6a0   :  { %2917 = vmatpush1.bf16.msra.mxu0 %v7737_v18  ;;  %7117 = vmatpush3.bf16.msra.mxu1 %v7777_v43  ;;  %v7797_v18 = vld [vmem:[#allocation6 + $0x1cc] ss:$12 sps:$4 sm:$0xff]  }
 0x6a1   :  { %2918 = vmatprep.subr.bf16.mxu0 %v7742_v19  ;;  %7118 = vmatprep.subr.bf16.mxu1 %v7781_v45  ;;  %v7795_v19 = vld [vmem:[#allocation6 + $0x1c8] ss:$12 sps:$4 sm:$0xff]  }
 0x6a2   :  { %v7816_v45 = vld [vmem:[#allocation10 + $0x8] ss:$12 sps:$4 sm:$0xff]  }
 0x6a4   :  { %2919 = vmatpush1.bf16.msra.mxu0 %v7740_v20  ;;  %7119 = vmatpush3.bf16.msra.mxu1 %v7782_v47  ;;  %v7798_v20 = vld [vmem:[#allocation6 + $0x1d0] ss:$12 sps:$4 sm:$0xff]   ;;  %v7818_v47 = vld [vmem:[#allocation10 + $0xe0] ss:$12 sps:$4 sm:$0xff]  }
 0x6a5   :  { %2920 = vmatprep.subr.bf16.mxu0 %v7745_v21  ;;  %7332 = vmatprep.subr.bf16.mxu1 %v8118_v7 }
 0x6a8   :  { %2921 = vmatpush1.bf16.msra.mxu0 %v7743_v22  ;;  %v7801_v22 = vld [vmem:[#allocation6 + $0x1e4] ss:$12 sps:$4 sm:$0xff]  }
 0x6a9   :  { %2922 = vmatprep.subr.bf16.mxu0 %v7750_v24  ;;  %v7799_v24 = vld [vmem:[#allocation6 + $0x1e0] ss:$12 sps:$4 sm:$0xff]  }
 0x6ac   :  { %2923 = vmatpush1.bf16.msra.mxu0 %v7748_v25  ;;  %v7802_v25 = vld [vmem:[#allocation6 + $0x1e8] ss:$12 sps:$4 sm:$0xff]  }
 0x6ad   :  { %2924 = vmatprep.subr.bf16.mxu0 %v7755_v26 }
 0x6b0   :  { %2925 = vmatpush1.bf16.msra.mxu0 %v7753_v29  ;;  %v7805_v29 = vld [vmem:[#allocation6 + $0x1fc] ss:$12 sps:$4 sm:$0xff]  }
 0x6b1   :  { %2926 = vmatprep.subr.bf16.mxu0 %v7760_v48 }
 0x6b4   :  { %2927 = vmatpush1.bf16.msra.mxu0 %v7758_v51  ;;  %v7803_v51 = vld [vmem:[#allocation6 + $0x1f8] ss:$12 sps:$4 sm:$0xff]  }
 0x6b5   :  { %2928 = vmatprep.subr.bf16.mxu0 %v7765_v31  ;;  %v7806_v31 = vld [vmem:[#allocation6 + $0x200] ss:$12 sps:$4 sm:$0xff]  }
 0x6b8   :  { %2929 = vmatpush1.bf16.msra.mxu0 %v7763_v34 }
 0x6b9   :  { %2930 = vmatprep.subr.bf16.mxu0 %v7770_v35  ;;  %v7809_v35 = vld [vmem:[#allocation6 + $0x214] ss:$12 sps:$4 sm:$0xff]  }
 0x6bc   :  { %2931 = vmatpush1.bf16.msra.mxu0 %v7768_v37 }
 0x6bd   :  { %2932 = vmatprep.subr.bf16.mxu0 %v7775_v39  ;;  %v7811_v39 = vld [vmem:[#allocation6 + $0x228] ss:$12 sps:$4 sm:$0xff]  }
 0x6c0   :  { %2933 = vmatpush1.bf16.msra.mxu0 %v7773_v42 }
 0x6c1   :  { %2934 = vmatprep.subr.bf16.mxu0 %v7780_v44  ;;  %v7815_v44 = vld [vmem:[#allocation10 + $0xc8] ss:$12 sps:$4 sm:$0xff]  }
 0x6c4   :  { %2935 = vmatpush1.bf16.msra.mxu0 %v7778_v46  ;;  %v7817_v46 = vld [vmem:[#allocation10 + $0x188] ss:$12 sps:$4 sm:$0xff]  }
 0x6c5   :  { %2945 = vmatprep.subr.bf16.mxu0 %v7785_v49  ;;  %v7820_v49 = vld [vmem:[#allocation10 + $0x1a0] ss:$12 sps:$4 sm:$0xff]  }
 0x75a   :  { %v2338_v50 = vpop.f32.mrb[20].mxu0  ;;  %v8517_v52 = vpop.f32.mrb[16].mxu1 }
 0x75b   :  { %v2388_v53 = vrot.slane %v2338_v50, %v8438_v41  ;;  %v2340_v54 = vpop.f32.mrb[21].mxu0  ;;  %v7330_v55 = vpop.f32.mrb[17].mxu1  ;;  %v2403_v61 = vrot.slane %v2338_v50, %v8444_v8  ;;  %v2396_v21 = vrot.slane %v8517_v52, %v8438_v41  ;;  %v2411_v48 = vrot.slane %v8517_v52, %v8444_v8  ;;  %v7819_v50 = vld [vmem:[#allocation10 + $0x20] ss:$12 sps:$4 sm:$0xff]   ;;  %v7821_v52 = vld [vmem:[#allocation10 + $0xf8] ss:$12 sps:$4 sm:$0xff]  }
 0x75c   :  { %v2392_v56 = vrot.slane %v2340_v54, %v8438_v41  ;;  %v2342_v57 = vpop.f32.mrb[22].mxu0  ;;  %v2382_v58 = vpop.f32.mrb[18].mxu1  ;;  %v2407_v1 = vrot.slane %v2340_v54, %v8444_v8  ;;  %v7822_v54 = vld [vmem:[#allocation10 + $0x38] ss:$12 sps:$4 sm:$0xff]   ;;  %v7824_v55 = vld [vmem:[#allocation10 + $0x110] ss:$12 sps:$4 sm:$0xff]  }
 0x75d   :  { %v2397_v59 = vmul.f32 %v2388_v53, %v8476_v23  ;;  %v2343_v62 = vpop.f32.mrb[23].mxu0  ;;  %v7331_v63 = vpop.f32.mrb[19].mxu1  ;;  %v7787_v23 = vld [vmem:[#allocation6 + $0x198] ss:$12 sps:$4 sm:$0xff]   ;;  %v2399_v26 = vmul.f32 %v2396_v21, %v8481_v27  ;;  %v7826_v57 = vld [vmem:[#allocation10 + $0x1d0] ss:$12 sps:$4 sm:$0xff]  }
 0x75e   :  { %v2398_v0 = vmul.f32 %v2392_v56, %v8483_v28  ;;  %v7790_v28 = vld [vmem:[#allocation6 + $0x1a0] ss:$12 sps:$4 sm:$0xff]   ;;  %v7810_v27 = vld [vmem:[#allocation6 + $0x218] ss:$12 sps:$4 sm:$0xff]   ;;  %v7825_v56 = vld [vmem:[#allocation10 + $0x50] ss:$12 sps:$4 sm:$0xff]  }
 0x75f   :  { %v2412_v2 = vadd.f32 %v2403_v61, %v2397_v59  ;;  %v2414_v34 = vadd.f32 %v2411_v48, %v2399_v26  ;;  %v7823_v53 = vld [vmem:[#allocation10 + $0x1b8] ss:$12 sps:$4 sm:$0xff]   ;;  %v7827_v58 = vld [vmem:[#allocation10 + $0x128] ss:$12 sps:$4 sm:$0xff]   ;;  %v7830_v62 = vld [vmem:[#allocation10 + $0x140] ss:$12 sps:$4 sm:$0xff]  }
 0x760   :  { %v2413_v3 = vadd.f32 %v2407_v1, %v2398_v0  ;;  %v7828_v59 = vld [vmem:[#allocation10 + $0x68] ss:$12 sps:$4 sm:$0xff]   ;;  %v7831_v63 = vld [vmem:[#allocation10 + $0x80] ss:$12 sps:$4 sm:$0xff]   ;;  %v7833_v1 = vld [vmem:[#allocation10 + $0x158] ss:$12 sps:$4 sm:$0xff]  }
 0x761   :  { %v2415_v4 = vmul.f32 0.2, %v2412_v2  ;;  %v2417_v37 = vmul.f32 0.2, %v2414_v34  ;;  %v7829_v61 = vld [vmem:[#allocation10 + $0x1e8] ss:$12 sps:$4 sm:$0xff]  }
 0x762   :  { %v2416_v5 = vmul.f32 0.2, %v2413_v3  ;;  %v7832_v0 = vld [vmem:[#allocation10 + $0x200] ss:$12 sps:$4 sm:$0xff]  }
 0x763   :  { %v2418_v6 = vmax.f32 %v2412_v2, %v2415_v4  ;;  %v2420_v42 = vmax.f32 %v2414_v34, %v2417_v37  ;;  %v7834_v2 = vld [vmem:[#allocation10 + $0x98] ss:$12 sps:$4 sm:$0xff]   ;;  %v7836_v4 = vld [vmem:[#allocation10 + $0x170] ss:$12 sps:$4 sm:$0xff]  }
 0x764   :  { %v2419_v9 = vmax.f32 %v2413_v3, %v2416_v5  ;;  %v7835_v3 = vld [vmem:[#allocation10 + $0x218] ss:$12 sps:$4 sm:$0xff]   ;;  %v7837_v5 = vld [vmem:[#allocation10 + $0xb0] ss:$12 sps:$4 sm:$0xff]  }
 0x765   :  { %v2421_v13 = vpack.c.bf16 %v2418_v6, %v2418_v6  ;;  %v2423_v43 = vpack.c.bf16 %v2420_v42, %v2420_v42  ;;  %v7838_v6 = vld [vmem:[#allocation10 + $0x230] ss:$12 sps:$4 sm:$0xff]  }
 0x766   :  { %v2422_v10 = vpack.c.bf16 %v2419_v9, %v2419_v9 }
 0x768   :  { %2936 = vmatprep.mubr.bf16.mxu0 %v2422_v10  ;;  %3018 = vmatprep.mubr.bf16.mxu1 %v2422_v10 }
 0x769   :  { %2937 = vmatmul.mubr.bf16.vlgmr.msra.gmra.mrb[24].mxu0 %v2421_v13  ;;  %3019 = vmatmul.mubr.bf16.vlgmr.msra.gmra.mrb[20].mxu1 %v2421_v13 }
 0x76a   :  { %2946 = vmatpush1.bf16.msra.mxu0 %v7783_v11  ;;  %7333 = vmatpush3.bf16.msra.mxu1 %v7786_v12 }
 0x76b   :  { %2947 = vmatprep.subr.bf16.mxu0 %v7789_v14  ;;  %7334 = vmatprep.subr.bf16.mxu1 %v8118_v7 }
 0x76c   :  { %2977 = vmatprep.mubr.bf16.mxu0 %v8116_v60  ;;  %7348 = vmatprep.mubr.msk.bf16.mxu1 %vm8119_vm1, %v8118_v7 }
 0x76e   :  { %2948 = vmatpush1.bf16.msra.mxu0 %v7787_v23  ;;  %7335 = vmatpush3.bf16.msra.mxu1 %v7790_v28 }
 0x76f   :  { %2949 = vmatprep.subr.bf16.mxu0 %v7793_v15  ;;  %7336 = vmatprep.subr.bf16.mxu1 %v8118_v7 }
 0x772   :  { %2950 = vmatpush1.bf16.msra.mxu0 %v7791_v16  ;;  %7337 = vmatpush3.bf16.msra.mxu1 %v7794_v17 }
 0x773   :  { %2951 = vmatprep.subr.bf16.mxu0 %v7797_v18  ;;  %7338 = vmatprep.subr.bf16.mxu1 %v8118_v7 }
 0x776   :  { %2952 = vmatpush1.bf16.msra.mxu0 %v7795_v19  ;;  %7339 = vmatpush3.bf16.msra.mxu1 %v7798_v20 }
 0x777   :  { %2953 = vmatprep.subr.bf16.mxu0 %v7801_v22  ;;  %7340 = vmatprep.subr.bf16.mxu1 %v8118_v7 }
 0x77a   :  { %2954 = vmatpush1.bf16.msra.mxu0 %v7799_v24  ;;  %7341 = vmatpush3.bf16.msra.mxu1 %v7802_v25 }
 0x77b   :  { %2955 = vmatprep.subr.bf16.mxu0 %v7805_v29  ;;  %7342 = vmatprep.subr.bf16.mxu1 %v8118_v7 }
 0x77e   :  { %2956 = vmatpush1.bf16.msra.mxu0 %v7803_v51  ;;  %7343 = vmatpush3.bf16.msra.mxu1 %v7806_v31 }
 0x77f   :  { %2957 = vmatprep.subr.bf16.mxu0 %v7809_v35  ;;  %7344 = vmatprep.subr.bf16.mxu1 %v8118_v7 }
 0x782   :  { %2958 = vmatpush1.bf16.msra.mxu0 %v7807_v36  ;;  %7345 = vmatpush3.bf16.msra.mxu1 %v7810_v27 }
 0x783   :  { %2959 = vmatprep.subr.bf16.mxu0 %v7813_v38  ;;  %7346 = vmatprep.subr.bf16.mxu1 %v8118_v7 }
 0x786   :  { %2960 = vmatpush1.bf16.msra.mxu0 %v7811_v39  ;;  %7347 = vmatpush3.bf16.msra.mxu1 %v7814_v40 }
 0x787   :  { %7352 = vmatprep.subr.bf16.mxu0 %v8118_v7  ;;  %7135 = vmatprep.subr.bf16.mxu1 %v7815_v44 }
 0x789   :  { %2978 = vmatmul.mubr.bf16.vlgmr.msra.gmra.mrb[24].mxu0 %v2423_v43  ;;  %7349 = vmatmul.mubr.bf16.vlgmr.msra.gmra.mrb[24].mxu1 %v2423_v43 }
 0x78a   :  { %7368 = vmatprep.mubr.msk.bf16.mxu0 %vm8119_vm1, %v8118_v7  ;;  %7353 = vmatpush3.bf16.msra.mxu0 %v7817_v46 }
 0x78b   :  { %7136 = vmatpush3.bf16.msra.mxu1 %v7816_v45  ;;  %7354 = vmatprep.subr.bf16.mxu0 %v8118_v7 }
 0x78c   :  { %7137 = vmatprep.subr.bf16.mxu1 %v7818_v47 }
 0x78e   :  { %7355 = vmatpush3.bf16.msra.mxu0 %v7820_v49 }
 0x78f   :  { %7138 = vmatpush3.bf16.msra.mxu1 %v7819_v50  ;;  %7356 = vmatprep.subr.bf16.mxu0 %v8118_v7 }
 0x790   :  { %7139 = vmatprep.subr.bf16.mxu1 %v7821_v52 }
 0x792   :  { %7357 = vmatpush3.bf16.msra.mxu0 %v7823_v53 }
 0x793   :  { %7140 = vmatpush3.bf16.msra.mxu1 %v7822_v54  ;;  %7358 = vmatprep.subr.bf16.mxu0 %v8118_v7 }
 0x794   :  { %7141 = vmatprep.subr.bf16.mxu1 %v7824_v55 }
 0x796   :  { %7359 = vmatpush3.bf16.msra.mxu0 %v7826_v57 }
 0x797   :  { %7142 = vmatpush3.bf16.msra.mxu1 %v7825_v56  ;;  %7360 = vmatprep.subr.bf16.mxu0 %v8118_v7 }
 0x798   :  { %7143 = vmatprep.subr.bf16.mxu1 %v7827_v58 }
 0x79a   :  { %7361 = vmatpush3.bf16.msra.mxu0 %v7829_v61 }
 0x79b   :  { %7144 = vmatpush3.bf16.msra.mxu1 %v7828_v59  ;;  %7362 = vmatprep.subr.bf16.mxu0 %v8118_v7 }
 0x79c   :  { %7145 = vmatprep.subr.bf16.mxu1 %v7830_v62 }
 0x79e   :  { %7363 = vmatpush3.bf16.msra.mxu0 %v7832_v0 }
 0x79f   :  { %7146 = vmatpush3.bf16.msra.mxu1 %v7831_v63  ;;  %7364 = vmatprep.subr.bf16.mxu0 %v8118_v7 }
 0x7a0   :  { %7147 = vmatprep.subr.bf16.mxu1 %v7833_v1 }
 0x7a2   :  { %7365 = vmatpush3.bf16.msra.mxu0 %v7835_v3 }
 0x7a3   :  { %7148 = vmatpush3.bf16.msra.mxu1 %v7834_v2  ;;  %7366 = vmatprep.subr.bf16.mxu0 %v8118_v7 }
 0x7a4   :  { %7149 = vmatprep.subr.bf16.mxu1 %v7836_v4 }
 0x7a6   :  { %7367 = vmatpush3.bf16.msra.mxu0 %v7838_v6 }
 0x7a7   :  { %7150 = vmatpush3.bf16.msra.mxu1 %v7837_v5  ;;  %7372 = vmatprep.subr.bf16.mxu0 %v8118_v7 }
 0x83c   :  { %v7120_v9 = vpop.f32.mrb[20].mxu1 }
 0x83d   :  { %v7121_v10 = vpop.f32.mrb[21].mxu1 }
 0x83e   :  { %v7122_v11 = vadd.f32 %v7121_v10, %v7120_v9  ;;  %v7123_v12 = vpop.f32.mrb[22].mxu1 }
 0x83f   :  { %v7124_v13 = vpop.f32.mrb[23].mxu1  ;;  %v3116_v12 = vld [vmem:[#allocation12 + $0x34] sm:$0xff] }
 0x85c   :  { %v8551_v14 = vpop.f32.mrb[24].mxu0  ;;  %v3060_v23 = vpop.f32.mrb[24].mxu1 }
 0x85d   :  { %v3148_v28 = vrot.slane %v8551_v14, 4  ;;  %v3166_v15 = vmul.f32 %v8551_v14, %v8551_v14  ;;  %v8556_v16 = vadd.f32 %v7122_v11, %v3060_v23  ;;  %v8558_v17 = vpop.f32.mrb[25].mxu0  ;;  %v7350_v18 = vpop.f32.mrb[25].mxu1  ;;  %v3114_v11 = vld [vmem:[#allocation12 + $0x14] sm:$0xff]  ;;  %v3115_v23 = vld [vmem:[#allocation12 + $0x1c] sm:$0xf] }
 0x85e   :  { %v3154_v19 = vrot.slane %v8558_v17, 4  ;;  %v3167_v20 = vmul.f32 %v8558_v17, %v8558_v17  ;;  %v2983_v21 = vpop.f32.mrb[26].mxu0  ;;  %v3063_v22 = vpop.f32.mrb[26].mxu1  ;;  %v6722_v13 = vcombine.high %v3114_v11, %v3116_v12 }
 0x85f   :  { %v3149_v24 = vadd.f32 %v3148_v28, %v8551_v14  ;;  %v3169_v25 = vrot.slane %v3166_v15, 4  ;;  %v3160_v26 = vrot.slane %v8556_v16, 4  ;;  %v3168_v29 = vmul.f32 %v8556_v16, %v8556_v16  ;;  %v2984_v48 = vpop.f32.mrb[27].mxu0  ;;  %v7351_v51 = vpop.f32.mrb[27].mxu1  ;;  %v3117_v28 = vld [vmem:[#allocation12 + $0x3c] sm:$0xf] }
 0x860   :  { %v3155_v31 = vadd.f32 %v3154_v19, %v8558_v17  ;;  %v3175_v34 = vrot.slane %v3167_v20, 4  ;;  %v6723_v18 = vcombine.low %v3115_v23, %v3117_v28  ;;  %3576 = vmatprep.subr.bf16.mxu1 %v6722_v13  ;;  %v3118_v19 = vld [vmem:[#allocation12 + $0x54] sm:$0xff]  ;;  %v3119_v22 = vld [vmem:[#allocation12 + $0x5c] sm:$0xf]  ;;  %v3696_v13 = vld [vmem:[#allocation7] sm:$0xff] }
 0x861   :  { %v3150_v35 = vrot.slane %v3149_v24, 2  ;;  %v3170_v36 = vadd.f32 %v3169_v25, %v3166_v15  ;;  %v3161_v27 = vadd.f32 %v3160_v26, %v8556_v16  ;;  %v3181_v37 = vrot.slane %v3168_v29, 4  ;;  %v3124_v48 = vld [vmem:[#allocation12 + $0xb4] sm:$0xff]  ;;  %v3700_v23 = vld [vmem:[#allocation7 + $0x20] sm:$0xff]  ;;  %v3697_v28 = vld [vmem:[#allocation7 + $0x8] sm:$0xff] }
 0x862   :  { %v3156_v38 = vrot.slane %v3155_v31, 2  ;;  %v3176_v39 = vadd.f32 %v3175_v34, %v3167_v20  ;;  %v6721_v15 = vcombine.low %v3114_v11, %v3116_v12  ;;  %v3120_v20 = vld [vmem:[#allocation12 + $0x74] sm:$0xff]  ;;  %v3125_v34 = vld [vmem:[#allocation12 + $0xbc] sm:$0xf] }
 0x863   :  { %v3151_v40 = vadd.f32 %v3150_v35, %v3149_v24  ;;  %v3171_v42 = vrot.slane %v3170_v36, 2  ;;  %v3162_v43 = vrot.slane %v3161_v27, 2  ;;  %v3182_v44 = vadd.f32 %v3181_v37, %v3168_v29  ;;  %v3121_v24 = vld [vmem:[#allocation12 + $0x7c] sm:$0xf]  ;;  %v3122_v29 = vld [vmem:[#allocation12 + $0x94] sm:$0xff] }
 0x864   :  { %v3157_v45 = vadd.f32 %v3156_v38, %v3155_v31  ;;  %v3177_v46 = vrot.slane %v3176_v39, 2  ;;  %v6725_v21 = vcombine.high %v3118_v19, %v3120_v20  ;;  %v6724_v25 = vcombine.low %v3118_v19, %v3120_v20  ;;  %v3123_v31 = vld [vmem:[#allocation12 + $0x9c] sm:$0xf]  ;;  %v3128_v37 = vld [vmem:[#allocation12 + $0xf4] sm:$0xff]  ;;  %v3701_v19 = vld [vmem:[#allocation7 + $0x28] sm:$0xff] }
 0x865   :  { %v3152_v47 = vrot.slane %v3151_v40, 1  ;;  %v3172_v49 = vadd.f32 %v3171_v42, %v3170_v36  ;;  %v3163_v50 = vadd.f32 %v3162_v43, %v3161_v27  ;;  %v3183_v52 = vrot.slane %v3182_v44, 2  ;;  %v3126_v27 = vld [vmem:[#allocation12 + $0xd4] sm:$0xff] }
 0x866   :  { %v3158_v53 = vrot.slane %v3157_v45, 1  ;;  %v3178_v54 = vadd.f32 %v3177_v46, %v3176_v39  ;;  %v6726_v26 = vcombine.low %v3119_v22, %v3121_v24  ;;  %v6728_v51 = vcombine.high %v3122_v29, %v3124_v48  ;;  %v3127_v39 = vld [vmem:[#allocation12 + $0xdc] sm:$0xf] }
 0x867   :  { %v3173_v55 = vrot.slane %v3172_v49, 1  ;;  %v3164_v56 = vrot.slane %v3163_v50, 1  ;;  %v3184_v57 = vadd.f32 %v3183_v52, %v3182_v44  ;;  %v3153_v59 = vadd.f32 %v3152_v47, %v3151_v40  ;;  %v3129_v40 = vld [vmem:[#allocation12 + $0xfc] sm:$0xf]  ;;  %v3130_v44 = vld [vmem:[#allocation12 + $0x114] sm:$0xff] }
 0x868   :  { %v3179_v58 = vrot.slane %v3178_v54, 1  ;;  %v3159_v63 = vadd.f32 %v3158_v53, %v3157_v45  ;;  %v6727_v35 = vcombine.low %v3122_v29, %v3124_v48  ;;  %v6729_v36 = vcombine.low %v3123_v31, %v3125_v34  ;;  %v3132_v45 = vld [vmem:[#allocation12 + $0x134] sm:$0xff]  ;;  %v3131_v47 = vld [vmem:[#allocation12 + $0x11c] sm:$0xf] }
 0x869   :  { %v3174_v61 = vadd.f32 %v3173_v55, %v3172_v49  ;;  %v3185_v62 = vrot.slane %v3184_v57, 1  ;;  %v3165_v2 = vadd.f32 %v3164_v56, %v3163_v50  ;;  %v6731_v38 = vcombine.high %v3126_v27, %v3128_v37  ;;  %v3133_v49 = vld [vmem:[#allocation12 + $0x13c] sm:$0xf]  ;;  %v3134_v53 = vld [vmem:[#allocation12 + $0x154] sm:$0xff] }
 0x86a   :  { %v3180_v0 = vadd.f32 %v3179_v58, %v3178_v54  ;;  %v6730_v42 = vcombine.low %v3126_v27, %v3128_v37  ;;  %v6732_v43 = vcombine.low %v3127_v39, %v3129_v40  ;;  %v6734_v46 = vcombine.high %v3130_v44, %v3132_v45  ;;  %v3136_v54 = vld [vmem:[#allocation12 + $0x174] sm:$0xff]  ;;  %v3135_v56 = vld [vmem:[#allocation12 + $0x15c] sm:$0xf] }
 0x86b   :  { %v3187_v1 = vsel %vm833_vm0, %v3153_v59, %v3174_v61  ;;  %v3186_v3 = vadd.f32 %v3185_v62, %v3184_v57  ;;  %v6733_v50 = vcombine.low %v3130_v44, %v3132_v45  ;;  %v6735_v52 = vcombine.low %v3131_v47, %v3133_v49  ;;  %v3137_v57 = vld [vmem:[#allocation12 + $0x17c] sm:$0xf]  ;;  %v3138_v61 = vld [vmem:[#allocation12 + $0x194] sm:$0xff]  ;;  %v3146_v44 = vld [vmem:[%s8776_s9 + $0x4] sm:$0x1] }
 0x86c   :  { %v3188_v4 = vsel %vm833_vm0, %v3159_v63, %v3180_v0  ;;  %v3190_v9 = vpack.c.bf16 %v3187_v1, %v3187_v1  ;;  %v6737_v55 = vcombine.high %v3134_v53, %v3136_v54  ;;  %v6736_v58 = vcombine.low %v3134_v53, %v3136_v54  ;;  %v3140_v62 = vld [vmem:[#allocation12 + $0x1b4] sm:$0xff]  ;;  %v3139_v0 = vld [vmem:[#allocation12 + $0x19c] sm:$0xf]  ;;  %v3147_v47 = vld [vmem:[%s8776_s9 + $0x5] sm:$0x1] }
 0x86d   :  { %v3191_v5 = vpack.c.bf16 %v3188_v4, %v3188_v4  ;;  %v3189_v6 = vsel %vm833_vm0, %v3165_v2, %v3186_v3  ;;  %v6738_v59 = vcombine.low %v3135_v56, %v3137_v57  ;;  %v6740_v63 = vcombine.high %v3138_v61, %v3140_v62  ;;  %v3141_v1 = vld [vmem:[#allocation12 + $0x1bc] sm:$0xf]  ;;  %v3142_v4 = vld [vmem:[#allocation12 + $0x1d4] sm:$0xff]  ;;  %v3708_v54 = vld [vmem:[#allocation7 + $0x60] sm:$0xff] }
 0x86e   :  { %v3192_v10 = vpack.c.bf16 %v3189_v6, %v3189_v6  ;;  %v6739_v2 = vcombine.low %v3138_v61, %v3140_v62  ;;  %v6741_v3 = vcombine.low %v3139_v0, %v3141_v1  ;;  %v6747_v20 = vcombine.low %v3697_v28, %v3701_v19  ;;  %v3709_v56 = vld [vmem:[#allocation7 + $0x68] sm:$0xff]  ;;  %v3712_v61 = vld [vmem:[#allocation7 + $0x80] sm:$0xff] }
 0x86f   :  { %3369 = vmatprep.mubr.bf16.mxu1 %v3191_v5  ;;  %v3144_v5 = vld [vmem:[#allocation12 + $0x1f4] sm:$0xff]  ;;  %v3716_v62 = vld [vmem:[#allocation7 + $0xa0] sm:$0xff]  ;;  %v3717_v0 = vld [vmem:[#allocation7 + $0xa8] sm:$0xff] }
 0x870   :  { %3370 = vmatmul.mubr.bf16.vlgmr.msra.gmra.mrb[28].mxu1 %v3190_v9  ;;  %7369 = vmatmul.mubr.bf16.vlgmr.msra.gmra.mrb[28].mxu0 %v3192_v10  ;;  %v6743_v6 = vcombine.high %v3142_v4, %v3144_v5  ;;  %v3143_v9 = vld [vmem:[#allocation12 + $0x1dc] sm:$0xf]  ;;  %v6742_v11 = vcombine.low %v3142_v4, %v3144_v5  ;;  %v3720_v5 = vld [vmem:[#allocation7 + $0xc0] sm:$0xff] }
 0x871   :  { %3608 = vmatprep.mubr.bf16.mxu1 %v8116_v60  ;;  %7388 = vmatprep.mubr.msk.bf16.mxu0 %vm8119_vm1, %v8118_v7  ;;  %v3145_v10 = vld [vmem:[#allocation12 + $0x1fc] sm:$0xf] }
 0x872   :  { %3577 = vmatpush1.bf16.msra.mxu1 %v6721_v15  ;;  %7373 = vmatpush3.bf16.msra.mxu0 %v6723_v18  ;;  %v6744_v12 = vcombine.low %v3143_v9, %v3145_v10  ;;  %v6745_v15 = vcombine.low %v3696_v13, %v3700_v23  ;;  %v6746_v18 = vcombine.high %v3696_v13, %v3700_v23  ;;  %v3721_v9 = vld [vmem:[#allocation7 + $0xc8] sm:$0xff] }
 0x873   :  { %7374 = vmatprep.subr.bf16.mxu0 %v8118_v7  ;;  %3578 = vmatprep.subr.bf16.mxu1 %v6725_v21  ;;  %v6748_v21 = vcombine.high %v3697_v28, %v3701_v19  ;;  %v3725_v10 = vld [vmem:[#allocation7 + $0xe8] sm:$0xff]  ;;  %v3728_v28 = vld [vmem:[#allocation7 + $0x100] sm:$0xff] }
 0x874   :  { %v6772_v23 = vcombine.high %v3721_v9, %v3725_v10  ;;  %v3733_v19 = vld [vmem:[#allocation7 + $0x128] sm:$0xff] }
 0x876   :  { %3579 = vmatpush1.bf16.msra.mxu1 %v6724_v25  ;;  %7375 = vmatpush3.bf16.msra.mxu0 %v6726_v26 }
 0x877   :  { %7376 = vmatprep.subr.bf16.mxu0 %v8118_v7  ;;  %3580 = vmatprep.subr.bf16.mxu1 %v6728_v51 }
 0x87a   :  { %3581 = vmatpush1.bf16.msra.mxu1 %v6727_v35  ;;  %7377 = vmatpush3.bf16.msra.mxu0 %v6729_v36 }
 0x87b   :  { %7378 = vmatprep.subr.bf16.mxu0 %v8118_v7  ;;  %3582 = vmatprep.subr.bf16.mxu1 %v6731_v38 }
 0x87e   :  { %3583 = vmatpush1.bf16.msra.mxu1 %v6730_v42  ;;  %7379 = vmatpush3.bf16.msra.mxu0 %v6732_v43 }
 0x87f   :  { %7380 = vmatprep.subr.bf16.mxu0 %v8118_v7  ;;  %3584 = vmatprep.subr.bf16.mxu1 %v6734_v46 }
 0x882   :  { %3585 = vmatpush1.bf16.msra.mxu1 %v6733_v50  ;;  %7381 = vmatpush3.bf16.msra.mxu0 %v6735_v52  ;;  %v3704_v52 = vld [vmem:[#allocation7 + $0x40] sm:$0xff] }
 0x883   :  { %7382 = vmatprep.subr.bf16.mxu0 %v8118_v7  ;;  %3586 = vmatprep.subr.bf16.mxu1 %v6737_v55  ;;  %v3705_v55 = vld [vmem:[#allocation7 + $0x48] sm:$0xff]  ;;  %v6753_v1 = vcombine.low %v3704_v52, %v3708_v54 }
 0x886   :  { %3587 = vmatpush1.bf16.msra.mxu1 %v6736_v58  ;;  %7383 = vmatpush3.bf16.msra.mxu0 %v6738_v59  ;;  %v6754_v58 = vcombine.high %v3704_v52, %v3708_v54  ;;  %v6756_v59 = vcombine.high %v3705_v55, %v3709_v56  ;;  %v3760_v54 = vld [vmem:[#allocation7 + $0x200] sm:$0xff] }
 0x887   :  { %7384 = vmatprep.subr.bf16.mxu0 %v8118_v7  ;;  %3588 = vmatprep.subr.bf16.mxu1 %v6740_v63  ;;  %v3713_v63 = vld [vmem:[#allocation7 + $0x88] sm:$0xff] }
 0x888   :  { %v6764_v4 = vcombine.high %v3713_v63, %v3717_v0 }
 0x88a   :  { %3589 = vmatpush1.bf16.msra.mxu1 %v6739_v2  ;;  %7385 = vmatpush3.bf16.msra.mxu0 %v6741_v3  ;;  %v6755_v2 = vcombine.low %v3705_v55, %v3709_v56  ;;  %v6762_v3 = vcombine.high %v3712_v61, %v3716_v62  ;;  %v3764_v55 = vld [vmem:[#allocation7 + $0x220] sm:$0xff]  ;;  %v3761_v56 = vld [vmem:[#allocation7 + $0x208] sm:$0xff] }
 0x88b   :  { %7386 = vmatprep.subr.bf16.mxu0 %v8118_v7  ;;  %3590 = vmatprep.subr.bf16.mxu1 %v6743_v6  ;;  %v3724_v6 = vld [vmem:[#allocation7 + $0xe0] sm:$0xff] }
 0x88c   :  { %v6770_v13 = vcombine.high %v3720_v5, %v3724_v6 }
 0x88e   :  { %3591 = vmatpush1.bf16.msra.mxu1 %v6742_v11  ;;  %7387 = vmatpush3.bf16.msra.mxu0 %v6744_v12  ;;  %v6761_v11 = vcombine.low %v3712_v61, %v3716_v62  ;;  %v6763_v12 = vcombine.low %v3713_v63, %v3717_v0  ;;  %v3768_v62 = vld [vmem:[#allocation7 + $0x240] sm:$0xff]  ;;  %v3769_v0 = vld [vmem:[#allocation7 + $0x248] sm:$0xff] }
 0x88f   :  { %4848 = vmatprep.subr.bf16.mxu1 %v6746_v18  ;;  %4930 = vmatprep.subr.bf16.mxu0 %v6748_v21  ;;  %v3729_v18 = vld [vmem:[#allocation7 + $0x108] sm:$0xff]  ;;  %v6771_v21 = vcombine.low %v3721_v9, %v3725_v10  ;;  %v3772_v63 = vld [vmem:[#allocation7 + $0x260] sm:$0xff] }
 0x890   :  { %v3780_v9 = vld [vmem:[#allocation7 + $0x2a0] sm:$0xff]  ;;  %v3777_v10 = vld [vmem:[#allocation7 + $0x288] sm:$0xff] }
 0x943   :  { %v7151_v22 = vpop.f32.mrb[28].mxu1  ;;  %v3411_v24 = vpop.f32.mrb[28].mxu0 }
 0x944   :  { %v7152_v25 = vpop.f32.mrb[29].mxu1  ;;  %v7370_v26 = vpop.f32.mrb[29].mxu0 }
 0x945   :  { %v7153_v29 = vadd.f32 %v7152_v25, %v7151_v22  ;;  %v7154_v48 = vpop.f32.mrb[30].mxu1  ;;  %v3414_v51 = vpop.f32.mrb[30].mxu0  ;;  %v3736_v25 = vld [vmem:[#allocation7 + $0x140] sm:$0xff] }
 0x946   :  { %v7155_v31 = vpop.f32.mrb[31].mxu1  ;;  %v7371_v34 = vpop.f32.mrb[31].mxu0  ;;  %v3740_v26 = vld [vmem:[#allocation7 + $0x160] sm:$0xff]  ;;  %v3741_v48 = vld [vmem:[#allocation7 + $0x168] sm:$0xff] }
 0x947   :  { %v3412_v35 = vadd.f32 %v7153_v29, %v3411_v24  ;;  %v6780_v24 = vcombine.high %v3729_v18, %v3733_v19  ;;  %v3737_v29 = vld [vmem:[#allocation7 + $0x148] sm:$0xff]  ;;  %v6779_v31 = vcombine.low %v3729_v18, %v3733_v19  ;;  %v6786_v34 = vcombine.high %v3736_v25, %v3740_v26  ;;  %v3788_v18 = vld [vmem:[#allocation7 + $0x2e0] sm:$0xff] }
 0x948   :  { %v3785_v19 = vld [vmem:[#allocation7 + $0x2c8] sm:$0xff] }
 0x949   :  { %v3417_v36 = vmul.f32 0.03125, %v3412_v35  ;;  %v6788_v35 = vcombine.high %v3737_v29, %v3741_v48 }
 0x94b   :  { %v3418_v27 = vmul.f32 %v3417_v36, %v3417_v36 }
 0x94d   :  { %v3420_v37 = vrot.slane %v3418_v27, 7  ;;  %v3748_v27 = vld [vmem:[#allocation7 + $0x1a0] sm:$0xff] }
 0x94f   :  { %v3422_v38 = vsub.f32 %v3417_v36, %v3420_v37  ;;  %v3745_v37 = vld [vmem:[#allocation7 + $0x188] sm:$0xff] }
 0x951   :  { %v3423_v39 = vmax.f32 %v3422_v38, 0.0  ;;  %v3749_v38 = vld [vmem:[#allocation7 + $0x1a8] sm:$0xff] }
 0x953   :  { %v3424_v40 = vadd.f32 1e-05, %v3423_v39  ;;  %v6785_v39 = vcombine.low %v3736_v25, %v3740_v26  ;;  %v3792_v26 = vld [vmem:[#allocation7 + $0x300] sm:$0xff] }
 0x955   :  { %7915 = vrsqrt.f32 %v3424_v40  ;;  %v6787_v40 = vcombine.low %v3737_v29, %v3741_v48  ;;  %v3796_v29 = vld [vmem:[#allocation7 + $0x320] sm:$0xff]  ;;  %v3793_v48 = vld [vmem:[#allocation7 + $0x308] sm:$0xff] }
 0x95f   :  { %v7916_v42 = vpop.eup %7915 }
 0x960   :  { %v3433_v43 = vrot.slane %v7916_v42, %v8428_v33 }
 0x962   :  { %v6720_v45 = vrot.slane %v3433_v43, 9  ;;  %v6796_v43 = vcombine.high %v3745_v37, %v3749_v38 }
 0x964   :  { %v3437_v46 = vmul.f32 %v6720_v45, %v3146_v44  ;;  %v3752_v44 = vld [vmem:[#allocation7 + $0x1c0] sm:$0xff] }
 0x965   :  { %v3756_v45 = vld [vmem:[#allocation7 + $0x1e0] sm:$0xff] }
 0x966   :  { %v3438_v49 = vmul.f32 %v3437_v46, %v3417_v36  ;;  %v3744_v36 = vld [vmem:[#allocation7 + $0x180] sm:$0xff]  ;;  %v6802_v52 = vcombine.high %v3752_v44, %v3756_v45 }
 0x967   :  { %v6794_v42 = vcombine.high %v3744_v36, %v3748_v27 }
 0x968   :  { %v3439_v50 = vsub.f32 %v3147_v47, %v3438_v49  ;;  %v3757_v47 = vld [vmem:[#allocation7 + $0x1e8] sm:$0xff]  ;;  %v6793_v49 = vcombine.low %v3744_v36, %v3748_v27  ;;  %v6841_v27 = vcombine.low %v3792_v26, %v3796_v29 }
 0x96a   :  { %v3444_v53 = vrot.slane %v3439_v50, %v8438_v41  ;;  %v6795_v50 = vcombine.low %v3745_v37, %v3749_v38  ;;  %v3800_v38 = vld [vmem:[#allocation7 + $0x340] sm:$0xff] }
 0x96c   :  { %v3446_v33 = vsel %vm833_vm0, %v3437_v46, %v3444_v53  ;;  %v3753_v46 = vld [vmem:[#allocation7 + $0x1c8] sm:$0xff] }
 0x96d   :  { %v3447_v57 = vpack.c.bf16 %v3446_v33, %v3446_v33  ;;  %v6804_v53 = vcombine.high %v3753_v46, %v3757_v47  ;;  %v3765_v33 = vld [vmem:[#allocation7 + $0x228] sm:$0xff] }
 0x96e   :  { %v6812_v61 = vcombine.high %v3761_v56, %v3765_v33 }
 0x96f   :  { %3609 = vmatmul.mubr.bf16.vlgmr.msra.gmra.mrb[32].mxu1 %v3447_v57  ;;  %7389 = vmatmul.mubr.bf16.vlgmr.msra.gmra.mrb[32].mxu0 %v3447_v57  ;;  %v6801_v57 = vcombine.low %v3752_v44, %v3756_v45 }
 0x970   :  { %4849 = vmatpush1.bf16.msra.mxu1 %v6745_v15  ;;  %4931 = vmatpush1.bf16.msra.mxu0 %v6747_v20  ;;  %v3732_v15 = vld [vmem:[#allocation7 + $0x120] sm:$0xff]  ;;  %v6769_v20 = vcombine.low %v3720_v5, %v3724_v6 }
 0x971   :  { %4850 = vmatprep.subr.bf16.mxu1 %v6754_v58  ;;  %4932 = vmatprep.subr.bf16.mxu0 %v6756_v59  ;;  %v6778_v22 = vcombine.high %v3728_v28, %v3732_v15  ;;  %v6777_v51 = vcombine.low %v3728_v28, %v3732_v15  ;;  %v6803_v58 = vcombine.low %v3753_v46, %v3757_v47  ;;  %v3776_v6 = vld [vmem:[#allocation7 + $0x280] sm:$0xff] }
 0x972   :  { %v6810_v59 = vcombine.high %v3760_v54, %v3764_v55  ;;  %v3784_v15 = vld [vmem:[#allocation7 + $0x2c0] sm:$0xff] }
 0x973   :  { %v3808_v47 = vld [vmem:[#allocation7 + $0x380] sm:$0xff] }
 0x974   :  { %4851 = vmatpush1.bf16.msra.mxu1 %v6753_v1  ;;  %4933 = vmatpush1.bf16.msra.mxu0 %v6755_v2  ;;  %v3773_v1 = vld [vmem:[#allocation7 + $0x268] sm:$0xff]  ;;  %v6809_v2 = vcombine.low %v3760_v54, %v3764_v55 }
 0x975   :  { %4852 = vmatprep.subr.bf16.mxu1 %v6762_v3  ;;  %4934 = vmatprep.subr.bf16.mxu0 %v6764_v4  ;;  %v6811_v3 = vcombine.low %v3761_v56, %v3765_v33  ;;  %v6818_v4 = vcombine.high %v3768_v62, %v3772_v63  ;;  %v6820_v5 = vcombine.high %v3769_v0, %v3773_v1  ;;  %v3816_v33 = vld [vmem:[#allocation7 + $0x3c0] sm:$0xff] }
 0x978   :  { %4853 = vmatpush1.bf16.msra.mxu1 %v6761_v11  ;;  %4935 = vmatpush1.bf16.msra.mxu0 %v6763_v12  ;;  %v3781_v11 = vld [vmem:[#allocation7 + $0x2a8] sm:$0xff]  ;;  %v6817_v12 = vcombine.low %v3768_v62, %v3772_v63 }
 0x979   :  { %4854 = vmatprep.subr.bf16.mxu1 %v6770_v13  ;;  %4936 = vmatprep.subr.bf16.mxu0 %v6772_v23  ;;  %v6819_v13 = vcombine.low %v3769_v0, %v3773_v1  ;;  %v6826_v23 = vcombine.high %v3776_v6, %v3780_v9  ;;  %v6828_v28 = vcombine.high %v3777_v10, %v3781_v11  ;;  %v3824_v1 = vld [vmem:[#allocation7 + $0x400] sm:$0xff] }
 0x97c   :  { %4855 = vmatpush1.bf16.msra.mxu1 %v6769_v20  ;;  %4937 = vmatpush1.bf16.msra.mxu0 %v6771_v21  ;;  %v3789_v20 = vld [vmem:[#allocation7 + $0x2e8] sm:$0xff]  ;;  %v6825_v21 = vcombine.low %v3776_v6, %v3780_v9 }
 0x97d   :  { %4856 = vmatprep.subr.bf16.mxu1 %v6778_v22  ;;  %4938 = vmatprep.subr.bf16.mxu0 %v6780_v24  ;;  %v6827_v22 = vcombine.low %v3777_v10, %v3781_v11  ;;  %v6834_v24 = vcombine.high %v3784_v15, %v3788_v18  ;;  %v6836_v25 = vcombine.high %v3785_v19, %v3789_v20 }
 0x980   :  { %4857 = vmatpush1.bf16.msra.mxu1 %v6777_v51  ;;  %4939 = vmatpush1.bf16.msra.mxu0 %v6779_v31  ;;  %v3797_v51 = vld [vmem:[#allocation7 + $0x328] sm:$0xff]  ;;  %v6833_v31 = vcombine.low %v3784_v15, %v3788_v18 }
 0x981   :  { %4858 = vmatprep.subr.bf16.mxu1 %v6786_v34  ;;  %4940 = vmatprep.subr.bf16.mxu0 %v6788_v35  ;;  %v6835_v34 = vcombine.low %v3785_v19, %v3789_v20  ;;  %v6842_v35 = vcombine.high %v3792_v26, %v3796_v29  ;;  %v6844_v36 = vcombine.high %v3793_v48, %v3797_v51 }
 0x982   :  { %v6843_v37 = vcombine.low %v3793_v48, %v3797_v51 }
 0x984   :  { %4859 = vmatpush1.bf16.msra.mxu1 %v6785_v39  ;;  %4941 = vmatpush1.bf16.msra.mxu0 %v6787_v40  ;;  %v3804_v39 = vld [vmem:[#allocation7 + $0x360] sm:$0xff]  ;;  %v3801_v40 = vld [vmem:[#allocation7 + $0x348] sm:$0xff] }
 0x985   :  { %4860 = vmatprep.subr.bf16.mxu1 %v6794_v42  ;;  %4942 = vmatprep.subr.bf16.mxu0 %v6796_v43  ;;  %v6850_v42 = vcombine.high %v3800_v38, %v3804_v39  ;;  %v3805_v43 = vld [vmem:[#allocation7 + $0x368] sm:$0xff]  ;;  %v6849_v44 = vcombine.low %v3800_v38, %v3804_v39 }
 0x986   :  { %v6851_v45 = vcombine.low %v3801_v40, %v3805_v43  ;;  %v6852_v46 = vcombine.high %v3801_v40, %v3805_v43  ;;  %v3837_v38 = vld [vmem:[#allocation7 + $0x468] sm:$0xff]  ;;  %v3840_v43 = vld [vmem:[#allocation7 + $0x480] sm:$0xff] }
 0x988   :  { %4861 = vmatpush1.bf16.msra.mxu1 %v6793_v49  ;;  %4943 = vmatpush1.bf16.msra.mxu0 %v6795_v50  ;;  %v3812_v49 = vld [vmem:[#allocation7 + $0x3a0] sm:$0xff]  ;;  %v3809_v50 = vld [vmem:[#allocation7 + $0x388] sm:$0xff] }
 0x989   :  { %4862 = vmatprep.subr.bf16.mxu1 %v6802_v52  ;;  %4944 = vmatprep.subr.bf16.mxu0 %v6804_v53  ;;  %v6858_v52 = vcombine.high %v3808_v47, %v3812_v49  ;;  %v3813_v53 = vld [vmem:[#allocation7 + $0x3a8] sm:$0xff]  ;;  %v6857_v54 = vcombine.low %v3808_v47, %v3812_v49 }
 0x98a   :  { %v6859_v55 = vcombine.low %v3809_v50, %v3813_v53  ;;  %v6860_v56 = vcombine.high %v3809_v50, %v3813_v53  ;;  %v3852_v53 = vld [vmem:[#allocation7 + $0x4e0] sm:$0xff] }
 0x98c   :  { %4863 = vmatpush1.bf16.msra.mxu1 %v6801_v57  ;;  %4945 = vmatpush1.bf16.msra.mxu0 %v6803_v58  ;;  %v3820_v57 = vld [vmem:[#allocation7 + $0x3e0] sm:$0xff]  ;;  %v3817_v58 = vld [vmem:[#allocation7 + $0x3c8] sm:$0xff] }
 0x98d   :  { %4864 = vmatprep.subr.bf16.mxu1 %v6810_v59  ;;  %4946 = vmatprep.subr.bf16.mxu0 %v6812_v61  ;;  %v6866_v59 = vcombine.high %v3816_v33, %v3820_v57  ;;  %v3821_v61 = vld [vmem:[#allocation7 + $0x3e8] sm:$0xff]  ;;  %v6865_v62 = vcombine.low %v3816_v33, %v3820_v57 }
 0x98e   :  { %v6867_v63 = vcombine.low %v3817_v58, %v3821_v61  ;;  %v6868_v0 = vcombine.high %v3817_v58, %v3821_v61  ;;  %v3860_v61 = vld [vmem:[#allocation7 + $0x520] sm:$0xff] }
 0x990   :  { %4865 = vmatpush1.bf16.msra.mxu1 %v6809_v2  ;;  %4947 = vmatpush1.bf16.msra.mxu0 %v6811_v3  ;;  %v3828_v2 = vld [vmem:[#allocation7 + $0x420] sm:$0xff]  ;;  %v3825_v3 = vld [vmem:[#allocation7 + $0x408] sm:$0xff] }
 0x991   :  { %4866 = vmatprep.subr.bf16.mxu1 %v6818_v4  ;;  %4948 = vmatprep.subr.bf16.mxu0 %v6820_v5  ;;  %v6874_v4 = vcombine.high %v3824_v1, %v3828_v2  ;;  %v3829_v5 = vld [vmem:[#allocation7 + $0x428] sm:$0xff]  ;;  %v6873_v6 = vcombine.low %v3824_v1, %v3828_v2 }
 0x992   :  { %v6875_v9 = vcombine.low %v3825_v3, %v3829_v5  ;;  %v6876_v10 = vcombine.high %v3825_v3, %v3829_v5  ;;  %v3864_v5 = vld [vmem:[#allocation7 + $0x540] sm:$0xff] }
 0x994   :  { %4867 = vmatpush1.bf16.msra.mxu1 %v6817_v12  ;;  %4949 = vmatpush1.bf16.msra.mxu0 %v6819_v13 }
 0x995   :  { %4868 = vmatprep.subr.bf16.mxu1 %v6826_v23  ;;  %4950 = vmatprep.subr.bf16.mxu0 %v6828_v28 }
 0x998   :  { %4869 = vmatpush1.bf16.msra.mxu1 %v6825_v21  ;;  %4951 = vmatpush1.bf16.msra.mxu0 %v6827_v22 }
 0x999   :  { %4870 = vmatprep.subr.bf16.mxu1 %v6834_v24  ;;  %4952 = vmatprep.subr.bf16.mxu0 %v6836_v25 }
 0x99c   :  { %4871 = vmatpush1.bf16.msra.mxu1 %v6833_v31  ;;  %4953 = vmatpush1.bf16.msra.mxu0 %v6835_v34 }
 0x99d   :  { %4872 = vmatprep.subr.bf16.mxu1 %v6842_v35  ;;  %4954 = vmatprep.subr.bf16.mxu0 %v6844_v36  ;;  %v3832_v35 = vld [vmem:[#allocation7 + $0x440] sm:$0xff] }
 0x9a0   :  { %4873 = vmatpush1.bf16.msra.mxu1 %v6841_v27  ;;  %4955 = vmatpush1.bf16.msra.mxu0 %v6843_v37  ;;  %v3836_v27 = vld [vmem:[#allocation7 + $0x460] sm:$0xff]  ;;  %v3833_v37 = vld [vmem:[#allocation7 + $0x448] sm:$0xff] }
 0x9a1   :  { %4874 = vmatprep.subr.bf16.mxu1 %v6850_v42  ;;  %4956 = vmatprep.subr.bf16.mxu0 %v6852_v46  ;;  %v6882_v40 = vcombine.high %v3832_v35, %v3836_v27  ;;  %v6884_v42 = vcombine.high %v3833_v37, %v3837_v38  ;;  %v6881_v46 = vcombine.low %v3832_v35, %v3836_v27 }
 0x9a2   :  { %v6883_v47 = vcombine.low %v3833_v37, %v3837_v38  ;;  %v3698_v38 = vld [vmem:[#allocation7 + $0x10] sm:$0xff] }
 0x9a4   :  { %4875 = vmatpush1.bf16.msra.mxu1 %v6849_v44  ;;  %4957 = vmatpush1.bf16.msra.mxu0 %v6851_v45  ;;  %v3841_v44 = vld [vmem:[#allocation7 + $0x488] sm:$0xff] }
 0x9a5   :  { %4876 = vmatprep.subr.bf16.mxu1 %v6858_v52  ;;  %4958 = vmatprep.subr.bf16.mxu0 %v6860_v56  ;;  %v3845_v45 = vld [vmem:[#allocation7 + $0x4a8] sm:$0xff]  ;;  %v3848_v52 = vld [vmem:[#allocation7 + $0x4c0] sm:$0xff] }
 0x9a6   :  { %v6892_v50 = vcombine.high %v3841_v44, %v3845_v45  ;;  %v6891_v33 = vcombine.low %v3841_v44, %v3845_v45  ;;  %v6898_v57 = vcombine.high %v3848_v52, %v3852_v53 }
 0x9a8   :  { %4877 = vmatpush1.bf16.msra.mxu1 %v6857_v54  ;;  %4959 = vmatpush1.bf16.msra.mxu0 %v6859_v55  ;;  %v3849_v54 = vld [vmem:[#allocation7 + $0x4c8] sm:$0xff] }
 0x9a9   :  { %4878 = vmatprep.subr.bf16.mxu1 %v6866_v59  ;;  %4960 = vmatprep.subr.bf16.mxu0 %v6868_v0  ;;  %v3853_v55 = vld [vmem:[#allocation7 + $0x4e8] sm:$0xff]  ;;  %v3856_v59 = vld [vmem:[#allocation7 + $0x500] sm:$0xff]  ;;  %v6897_v0 = vcombine.low %v3848_v52, %v3852_v53  ;;  %v3707_v52 = vld [vmem:[#allocation7 + $0x58] sm:$0xff] }
 0x9aa   :  { %v6900_v58 = vcombine.high %v3849_v54, %v3853_v55  ;;  %v6899_v1 = vcombine.low %v3849_v54, %v3853_v55  ;;  %v6906_v3 = vcombine.high %v3856_v59, %v3860_v61  ;;  %v3711_v53 = vld [vmem:[#allocation7 + $0x78] sm:$0xff] }
 0x9ac   :  { %4879 = vmatpush1.bf16.msra.mxu1 %v6865_v62  ;;  %4961 = vmatpush1.bf16.msra.mxu0 %v6867_v63  ;;  %v3857_v62 = vld [vmem:[#allocation7 + $0x508] sm:$0xff] }
 0x9ad   :  { %4889 = vmatprep.subr.bf16.mxu1 %v6874_v4  ;;  %4971 = vmatprep.subr.bf16.mxu0 %v6876_v10  ;;  %v3861_v63 = vld [vmem:[#allocation7 + $0x528] sm:$0xff] }
 0x9ae   :  { %v6908_v4 = vcombine.high %v3857_v62, %v3861_v63  ;;  %v3869_v10 = vld [vmem:[#allocation7 + $0x568] sm:$0xff] }
 0xa42   :  { %v3610_v11 = vpop.f32.mrb[32].mxu1  ;;  %v8591_v12 = vpop.f32.mrb[32].mxu0 }
 0xa43   :  { %v3660_v13 = vrot.slane %v3610_v11, %v8438_v41  ;;  %v3612_v23 = vpop.f32.mrb[33].mxu1  ;;  %v7390_v28 = vpop.f32.mrb[33].mxu0  ;;  %v3675_v21 = vrot.slane %v3610_v11, %v8444_v8  ;;  %v3668_v2 = vrot.slane %v8591_v12, %v8438_v41  ;;  %v6905_v11 = vcombine.low %v3856_v59, %v3860_v61  ;;  %v3718_v59 = vld [vmem:[#allocation7 + $0xb0] sm:$0xff]  ;;  %v3715_v61 = vld [vmem:[#allocation7 + $0x98] sm:$0xff] }
 0xa44   :  { %v3664_v15 = vrot.slane %v3612_v23, %v8438_v41  ;;  %v3614_v18 = vpop.f32.mrb[34].mxu1  ;;  %v3654_v19 = vpop.f32.mrb[34].mxu0  ;;  %v3679_v26 = vrot.slane %v3612_v23, %v8444_v8 }
 0xa45   :  { %v3669_v20 = vmul.f32 %v3660_v13, %v8551_v14  ;;  %v3615_v22 = vpop.f32.mrb[35].mxu1  ;;  %v7391_v24 = vpop.f32.mrb[35].mxu0  ;;  %v6907_v13 = vcombine.low %v3857_v62, %v3861_v63  ;;  %v3671_v23 = vmul.f32 %v3668_v2, %v8556_v16  ;;  %v3872_v18 = vld [vmem:[#allocation7 + $0x580] sm:$0xff]  ;;  %v3719_v62 = vld [vmem:[#allocation7 + $0xb8] sm:$0xff] }
 0xa46   :  { %v3670_v25 = vmul.f32 %v3664_v15, %v8558_v17  ;;  %v3844_v17 = vld [vmem:[#allocation7 + $0x4a0] sm:$0xff]  ;;  %v3683_v22 = vrot.slane %v8591_v12, %v8444_v8  ;;  %v6768_v2 = vcombine.high %v3715_v61, %v3719_v62 }
 0xa47   :  { %v3684_v29 = vadd.f32 %v3675_v21, %v3669_v20  ;;  %v6890_v49 = vcombine.high %v3840_v43, %v3844_v17  ;;  %v6889_v56 = vcombine.low %v3840_v43, %v3844_v17  ;;  %v3876_v19 = vld [vmem:[#allocation7 + $0x5a0] sm:$0xff]  ;;  %v3873_v20 = vld [vmem:[#allocation7 + $0x588] sm:$0xff]  ;;  %v3703_v43 = vld [vmem:[#allocation7 + $0x38] sm:$0xff] }
 0xa48   :  { %v3685_v48 = vadd.f32 %v3679_v26, %v3670_v25  ;;  %v3877_v21 = vld [vmem:[#allocation7 + $0x5a8] sm:$0xff]  ;;  %v3686_v26 = vadd.f32 %v3683_v22, %v3671_v23  ;;  %v6921_v35 = vcombine.low %v3872_v18, %v3876_v19  ;;  %v3730_v23 = vld [vmem:[#allocation7 + $0x110] sm:$0xff] }
 0xa49   :  { %v3687_v51 = vmul.f32 0.2, %v3684_v29  ;;  %v6924_v16 = vcombine.high %v3873_v20, %v3877_v21  ;;  %v3738_v22 = vld [vmem:[#allocation7 + $0x150] sm:$0xff] }
 0xa4a   :  { %v3688_v31 = vmul.f32 0.2, %v3685_v48  ;;  %v3689_v27 = vmul.f32 0.2, %v3686_v26 }
 0xa4b   :  { %v3690_v34 = vmax.f32 %v3684_v29, %v3687_v51  ;;  %v6922_v29 = vcombine.high %v3872_v18, %v3876_v19  ;;  %v3884_v51 = vld [vmem:[#allocation7 + $0x5e0] sm:$0xff] }
 0xa4c   :  { %v3691_v36 = vmax.f32 %v3685_v48, %v3688_v31  ;;  %v3880_v48 = vld [vmem:[#allocation7 + $0x5c0] sm:$0xff]  ;;  %v3881_v31 = vld [vmem:[#allocation7 + $0x5c8] sm:$0xff]  ;;  %v3692_v45 = vmax.f32 %v3686_v26, %v3689_v27  ;;  %v3743_v26 = vld [vmem:[#allocation7 + $0x178] sm:$0xff] }
 0xa4d   :  { %v8601_v14 = vpack.c.bf16 %v3690_v34, %v3690_v34  ;;  %v3885_v34 = vld [vmem:[#allocation7 + $0x5e8] sm:$0xff]  ;;  %v6930_v12 = vcombine.high %v3880_v48, %v3884_v51  ;;  %v6929_v17 = vcombine.low %v3880_v48, %v3884_v51 }
 0xa4e   :  { %v8599_v39 = vpack.c.bf16 %v3691_v36, %v3691_v36  ;;  %v6923_v36 = vcombine.low %v3873_v20, %v3877_v21  ;;  %v6932_v37 = vcombine.high %v3881_v31, %v3885_v34  ;;  %v6931_v44 = vcombine.low %v3881_v31, %v3885_v34  ;;  %v3746_v31 = vld [vmem:[#allocation7 + $0x190] sm:$0xff] }
 0xa4f   :  { %v8614_v55 = vpack.c.bf16 %v3692_v45, %v3692_v45  ;;  %v3750_v34 = vld [vmem:[#allocation7 + $0x1b0] sm:$0xff] }
 0xa50   :  { %4880 = vmatprep.mubr.bf16.mxu1 %v8599_v39  ;;  %4962 = vmatprep.mubr.bf16.mxu0 %v8599_v39 }
 0xa51   :  { %4881 = vmatmul.mubr.bf16.vlgmr.msra.gmra.mrb[36].mxu1 %v8601_v14  ;;  %4963 = vmatmul.mubr.bf16.vlgmr.msra.gmra.mrb[36].mxu0 %v8601_v14 }
 0xa52   :  { %4890 = vmatpush1.bf16.msra.mxu1 %v6873_v6  ;;  %4972 = vmatpush1.bf16.msra.mxu0 %v6875_v9  ;;  %v3868_v6 = vld [vmem:[#allocation7 + $0x560] sm:$0xff]  ;;  %v3865_v9 = vld [vmem:[#allocation7 + $0x548] sm:$0xff] }
 0xa53   :  { %4891 = vmatprep.subr.bf16.mxu1 %v6882_v40  ;;  %4973 = vmatprep.subr.bf16.mxu0 %v6884_v42  ;;  %v6914_v28 = vcombine.high %v3864_v5, %v3868_v6  ;;  %v6916_v15 = vcombine.high %v3865_v9, %v3869_v10  ;;  %v6913_v24 = vcombine.low %v3864_v5, %v3868_v6  ;;  %v3702_v40 = vld [vmem:[#allocation7 + $0x30] sm:$0xff]  ;;  %v3699_v42 = vld [vmem:[#allocation7 + $0x18] sm:$0xff] }
 0xa54   :  { %4921 = vmatprep.mubr.bf16.mxu1 %v8116_v60  ;;  %5003 = vmatprep.mubr.bf16.mxu0 %v8116_v60  ;;  %v6915_v25 = vcombine.low %v3865_v9, %v3869_v10  ;;  %v6749_v54 = vcombine.low %v3698_v38, %v3702_v40  ;;  %v3723_v5 = vld [vmem:[#allocation7 + $0xd8] sm:$0xff]  ;;  %v6767_v10 = vcombine.low %v3715_v61, %v3719_v62 }
 0xa55   :  { %v3727_v6 = vld [vmem:[#allocation7 + $0xf8] sm:$0xff] }
 0xa56   :  { %4892 = vmatpush1.bf16.msra.mxu1 %v6881_v46  ;;  %4974 = vmatpush1.bf16.msra.mxu0 %v6883_v47  ;;  %v6750_v46 = vcombine.high %v3698_v38, %v3702_v40  ;;  %v6752_v47 = vcombine.high %v3699_v42, %v3703_v43  ;;  %v6775_v19 = vcombine.low %v3723_v5, %v3727_v6  ;;  %v3754_v40 = vld [vmem:[#allocation7 + $0x1d0] sm:$0xff]  ;;  %v3771_v61 = vld [vmem:[#allocation7 + $0x258] sm:$0xff] }
 0xa57   :  { %4893 = vmatprep.subr.bf16.mxu1 %v6890_v49  ;;  %4975 = vmatprep.subr.bf16.mxu0 %v6892_v50  ;;  %v3706_v49 = vld [vmem:[#allocation7 + $0x50] sm:$0xff]  ;;  %v3775_v62 = vld [vmem:[#allocation7 + $0x278] sm:$0xff] }
 0xa58   :  { %v3710_v50 = vld [vmem:[#allocation7 + $0x70] sm:$0xff] }
 0xa59   :  { %v6757_v63 = vcombine.low %v3706_v49, %v3710_v50 }
 0xa5a   :  { %4894 = vmatpush1.bf16.msra.mxu1 %v6889_v56  ;;  %4976 = vmatpush1.bf16.msra.mxu0 %v6891_v33  ;;  %v6751_v56 = vcombine.low %v3699_v42, %v3703_v43  ;;  %v6758_v33 = vcombine.high %v3706_v49, %v3710_v50  ;;  %v3758_v42 = vld [vmem:[#allocation7 + $0x1f0] sm:$0xff]  ;;  %v3755_v43 = vld [vmem:[#allocation7 + $0x1d8] sm:$0xff] }
 0xa5b   :  { %4895 = vmatprep.subr.bf16.mxu1 %v6898_v57  ;;  %4977 = vmatprep.subr.bf16.mxu0 %v6900_v58  ;;  %v6760_v57 = vcombine.high %v3707_v52, %v3711_v53  ;;  %v3714_v58 = vld [vmem:[#allocation7 + $0x90] sm:$0xff] }
 0xa5c   :  { %v6765_v9 = vcombine.low %v3714_v58, %v3718_v59  ;;  %v3762_v49 = vld [vmem:[#allocation7 + $0x210] sm:$0xff] }
 0xa5d   :  { %v3766_v50 = vld [vmem:[#allocation7 + $0x230] sm:$0xff] }
 0xa5e   :  { %4896 = vmatpush1.bf16.msra.mxu1 %v6897_v0  ;;  %4978 = vmatpush1.bf16.msra.mxu0 %v6899_v1  ;;  %v6759_v0 = vcombine.low %v3707_v52, %v3711_v53  ;;  %v6766_v1 = vcombine.high %v3714_v58, %v3718_v59  ;;  %v3763_v52 = vld [vmem:[#allocation7 + $0x218] sm:$0xff]  ;;  %v3770_v58 = vld [vmem:[#allocation7 + $0x250] sm:$0xff] }
 0xa5f   :  { %4897 = vmatprep.subr.bf16.mxu1 %v6906_v3  ;;  %4979 = vmatprep.subr.bf16.mxu0 %v6908_v4  ;;  %v3722_v3 = vld [vmem:[#allocation7 + $0xd0] sm:$0xff]  ;;  %v3767_v53 = vld [vmem:[#allocation7 + $0x238] sm:$0xff] }
 0xa60   :  { %v3726_v4 = vld [vmem:[#allocation7 + $0xf0] sm:$0xff] }
 0xa61   :  { %v6773_v18 = vcombine.low %v3722_v3, %v3726_v4  ;;  %v3774_v59 = vld [vmem:[#allocation7 + $0x270] sm:$0xff] }
 0xa62   :  { %4898 = vmatpush1.bf16.msra.mxu1 %v6905_v11  ;;  %4980 = vmatpush1.bf16.msra.mxu0 %v6907_v13  ;;  %v6774_v11 = vcombine.high %v3722_v3, %v3726_v4  ;;  %v6776_v13 = vcombine.high %v3723_v5, %v3727_v6  ;;  %v3778_v3 = vld [vmem:[#allocation7 + $0x290] sm:$0xff]  ;;  %v3779_v5 = vld [vmem:[#allocation7 + $0x298] sm:$0xff] }
 0xa63   :  { %4899 = vmatprep.subr.bf16.mxu1 %v6914_v28  ;;  %4981 = vmatprep.subr.bf16.mxu0 %v6916_v15  ;;  %v3734_v28 = vld [vmem:[#allocation7 + $0x130] sm:$0xff]  ;;  %v3735_v15 = vld [vmem:[#allocation7 + $0x138] sm:$0xff] }
 0xa64   :  { %v6782_v20 = vcombine.high %v3730_v23, %v3734_v28  ;;  %v3782_v4 = vld [vmem:[#allocation7 + $0x2b0] sm:$0xff]  ;;  %v3783_v6 = vld [vmem:[#allocation7 + $0x2b8] sm:$0xff] }
 0xa66   :  { %4900 = vmatpush1.bf16.msra.mxu1 %v6913_v24  ;;  %4982 = vmatpush1.bf16.msra.mxu0 %v6915_v25  ;;  %v3742_v24 = vld [vmem:[#allocation7 + $0x170] sm:$0xff]  ;;  %v3739_v25 = vld [vmem:[#allocation7 + $0x158] sm:$0xff] }
 0xa67   :  { %4901 = vmatprep.subr.bf16.mxu1 %v6922_v29  ;;  %4983 = vmatprep.subr.bf16.mxu0 %v6924_v16  ;;  %v6781_v29 = vcombine.low %v3730_v23, %v3734_v28  ;;  %v6790_v48 = vcombine.high %v3738_v22, %v3742_v24  ;;  %v6792_v51 = vcombine.high %v3739_v25, %v3743_v26  ;;  %v3786_v23 = vld [vmem:[#allocation7 + $0x2d0] sm:$0xff] }
 0xa68   :  { %v6789_v27 = vcombine.low %v3738_v22, %v3742_v24  ;;  %v3790_v28 = vld [vmem:[#allocation7 + $0x2f0] sm:$0xff] }
 0xa69   :  { %v3794_v22 = vld [vmem:[#allocation7 + $0x310] sm:$0xff] }
 0xa6a   :  { %4902 = vmatpush1.bf16.msra.mxu1 %v6921_v35  ;;  %4984 = vmatpush1.bf16.msra.mxu0 %v6923_v36  ;;  %v3747_v35 = vld [vmem:[#allocation7 + $0x198] sm:$0xff]  ;;  %v3798_v24 = vld [vmem:[#allocation7 + $0x330] sm:$0xff] }
 0xa6b   :  { %4903 = vmatprep.subr.bf16.mxu1 %v6930_v12  ;;  %4985 = vmatprep.subr.bf16.mxu0 %v6932_v37  ;;  %v3751_v36 = vld [vmem:[#allocation7 + $0x1b8] sm:$0xff]  ;;  %v6791_v12 = vcombine.low %v3739_v25, %v3743_v26  ;;  %v6798_v37 = vcombine.high %v3746_v31, %v3750_v34 }
 0xa6c   :  { %v6800_v38 = vcombine.high %v3747_v35, %v3751_v36  ;;  %v6799_v45 = vcombine.low %v3747_v35, %v3751_v36  ;;  %v3795_v25 = vld [vmem:[#allocation7 + $0x318] sm:$0xff] }
 0xa6d   :  { %v3799_v26 = vld [vmem:[#allocation7 + $0x338] sm:$0xff] }
 0xa6e   :  { %4904 = vmatpush1.bf16.msra.mxu1 %v6929_v17  ;;  %4986 = vmatpush1.bf16.msra.mxu0 %v6931_v44  ;;  %v3759_v17 = vld [vmem:[#allocation7 + $0x1f8] sm:$0xff]  ;;  %v6797_v44 = vcombine.low %v3746_v31, %v3750_v34  ;;  %v3802_v31 = vld [vmem:[#allocation7 + $0x350] sm:$0xff] }
 0xa6f   :  { %5012 = vmatprep.subr.bf16.mxu1 %v6750_v46  ;;  %5094 = vmatprep.subr.bf16.mxu0 %v6752_v47  ;;  %v6806_v46 = vcombine.high %v3754_v40, %v3758_v42  ;;  %v6808_v47 = vcombine.high %v3755_v43, %v3759_v17  ;;  %v3806_v34 = vld [vmem:[#allocation7 + $0x370] sm:$0xff]  ;;  %v3803_v35 = vld [vmem:[#allocation7 + $0x358] sm:$0xff] }
 0xa70   :  { %v3807_v36 = vld [vmem:[#allocation7 + $0x378] sm:$0xff] }
 0xa71   :  { %4922 = vmatmul.mubr.bf16.vlgmr.msra.gmra.mrb[36].mxu1 %v8614_v55  ;;  %5004 = vmatmul.mubr.bf16.vlgmr.msra.gmra.mrb[36].mxu0 %v8614_v55 }
 0xa72   :  { %5013 = vmatpush1.bf16.msra.mxu1 %v6749_v54  ;;  %5044 = vmatprep.mubr.bf16.mxu1 %v8599_v39  ;;  %v6805_v54 = vcombine.low %v3754_v40, %v3758_v42  ;;  %v3810_v40 = vld [vmem:[#allocation7 + $0x390] sm:$0xff] }
 0xa73   :  { %5095 = vmatpush1.bf16.msra.mxu0 %v6751_v56  ;;  %5126 = vmatprep.mubr.bf16.mxu0 %v8599_v39  ;;  %v3731_v39 = vld [vmem:[#allocation7 + $0x118] sm:$0xff]  ;;  %v6807_v56 = vcombine.low %v3755_v43, %v3759_v17  ;;  %v3814_v42 = vld [vmem:[#allocation7 + $0x3b0] sm:$0xff] }
 0xa74   :  { %5014 = vmatprep.subr.bf16.mxu1 %v6758_v33  ;;  %5096 = vmatprep.subr.bf16.mxu0 %v6760_v57  ;;  %v6784_v21 = vcombine.high %v3731_v39, %v3735_v15  ;;  %v6783_v16 = vcombine.low %v3731_v39, %v3735_v15  ;;  %v6814_v33 = vcombine.high %v3762_v49, %v3766_v50  ;;  %v3787_v39 = vld [vmem:[#allocation7 + $0x2d8] sm:$0xff] }
 0xa75   :  { %v6816_v57 = vcombine.high %v3763_v52, %v3767_v53  ;;  %v3791_v15 = vld [vmem:[#allocation7 + $0x2f8] sm:$0xff] }
 0xa76   :  { %5015 = vmatpush1.bf16.msra.mxu1 %v6757_v63  ;;  %v6813_v63 = vcombine.low %v3762_v49, %v3766_v50  ;;  %v3811_v43 = vld [vmem:[#allocation7 + $0x398] sm:$0xff]  ;;  %v3818_v49 = vld [vmem:[#allocation7 + $0x3d0] sm:$0xff] }
 0xa77   :  { %5097 = vmatpush1.bf16.msra.mxu0 %v6759_v0  ;;  %5016 = vmatprep.subr.bf16.mxu1 %v6766_v1  ;;  %v6815_v0 = vcombine.low %v3763_v52, %v3767_v53  ;;  %v6822_v1 = vcombine.high %v3770_v58, %v3774_v59  ;;  %v3815_v17 = vld [vmem:[#allocation7 + $0x3b8] sm:$0xff]  ;;  %v3822_v50 = vld [vmem:[#allocation7 + $0x3f0] sm:$0xff] }
 0xa78   :  { %5098 = vmatprep.subr.bf16.mxu0 %v6768_v2  ;;  %v6824_v2 = vcombine.high %v3771_v61, %v3775_v62  ;;  %v3819_v52 = vld [vmem:[#allocation7 + $0x3d8] sm:$0xff] }
 0xa79   :  { %v3823_v53 = vld [vmem:[#allocation7 + $0x3f8] sm:$0xff] }
 0xa7a   :  { %5017 = vmatpush1.bf16.msra.mxu1 %v6765_v9  ;;  %v6821_v9 = vcombine.low %v3770_v58, %v3774_v59  ;;  %v3826_v58 = vld [vmem:[#allocation7 + $0x410] sm:$0xff] }
 0xa7b   :  { %5099 = vmatpush1.bf16.msra.mxu0 %v6767_v10  ;;  %5018 = vmatprep.subr.bf16.mxu1 %v6774_v11  ;;  %v6823_v10 = vcombine.low %v3771_v61, %v3775_v62  ;;  %v6830_v11 = vcombine.high %v3778_v3, %v3782_v4  ;;  %v3830_v59 = vld [vmem:[#allocation7 + $0x430] sm:$0xff]  ;;  %v3827_v61 = vld [vmem:[#allocation7 + $0x418] sm:$0xff] }
 0xa7c   :  { %5100 = vmatprep.subr.bf16.mxu0 %v6776_v13  ;;  %v6832_v13 = vcombine.high %v3779_v5, %v3783_v6  ;;  %v3831_v62 = vld [vmem:[#allocation7 + $0x438] sm:$0xff] }
 0xa7e   :  { %5019 = vmatpush1.bf16.msra.mxu1 %v6773_v18  ;;  %v6829_v18 = vcombine.low %v3778_v3, %v3782_v4  ;;  %v3834_v3 = vld [vmem:[#allocation7 + $0x450] sm:$0xff] }
 0xa7f   :  { %5101 = vmatpush1.bf16.msra.mxu0 %v6775_v19  ;;  %5020 = vmatprep.subr.bf16.mxu1 %v6782_v20  ;;  %v6831_v19 = vcombine.low %v3779_v5, %v3783_v6  ;;  %v6838_v20 = vcombine.high %v3786_v23, %v3790_v28  ;;  %v3838_v4 = vld [vmem:[#allocation7 + $0x470] sm:$0xff]  ;;  %v3835_v5 = vld [vmem:[#allocation7 + $0x458] sm:$0xff] }
 0xa80   :  { %5102 = vmatprep.subr.bf16.mxu0 %v6784_v21  ;;  %v6840_v21 = vcombine.high %v3787_v39, %v3791_v15  ;;  %v3839_v6 = vld [vmem:[#allocation7 + $0x478] sm:$0xff] }
 0xa82   :  { %5021 = vmatpush1.bf16.msra.mxu1 %v6781_v29  ;;  %v6837_v29 = vcombine.low %v3786_v23, %v3790_v28  ;;  %v3842_v23 = vld [vmem:[#allocation7 + $0x490] sm:$0xff] }
 0xa83   :  { %5103 = vmatpush1.bf16.msra.mxu0 %v6783_v16  ;;  %5022 = vmatprep.subr.bf16.mxu1 %v6790_v48  ;;  %v6839_v16 = vcombine.low %v3787_v39, %v3791_v15  ;;  %v6846_v48 = vcombine.high %v3794_v22, %v3798_v24  ;;  %v3846_v28 = vld [vmem:[#allocation7 + $0x4b0] sm:$0xff]  ;;  %v3843_v39 = vld [vmem:[#allocation7 + $0x498] sm:$0xff] }
 0xa84   :  { %5104 = vmatprep.subr.bf16.mxu0 %v6792_v51  ;;  %v6848_v51 = vcombine.high %v3795_v25, %v3799_v26  ;;  %v3847_v15 = vld [vmem:[#allocation7 + $0x4b8] sm:$0xff] }
 0xa86   :  { %5023 = vmatpush1.bf16.msra.mxu1 %v6789_v27  ;;  %v6845_v27 = vcombine.low %v3794_v22, %v3798_v24  ;;  %v3850_v22 = vld [vmem:[#allocation7 + $0x4d0] sm:$0xff] }
 0xa87   :  { %5105 = vmatpush1.bf16.msra.mxu0 %v6791_v12  ;;  %5024 = vmatprep.subr.bf16.mxu1 %v6798_v37  ;;  %v6847_v12 = vcombine.low %v3795_v25, %v3799_v26  ;;  %v6854_v37 = vcombine.high %v3802_v31, %v3806_v34  ;;  %v3854_v24 = vld [vmem:[#allocation7 + $0x4f0] sm:$0xff]  ;;  %v3851_v25 = vld [vmem:[#allocation7 + $0x4d8] sm:$0xff] }
 0xa88   :  { %5106 = vmatprep.subr.bf16.mxu0 %v6800_v38  ;;  %v6856_v38 = vcombine.high %v3803_v35, %v3807_v36  ;;  %v3855_v26 = vld [vmem:[#allocation7 + $0x4f8] sm:$0xff] }
 0xa8a   :  { %5025 = vmatpush1.bf16.msra.mxu1 %v6797_v44  ;;  %v6853_v44 = vcombine.low %v3802_v31, %v3806_v34  ;;  %v3862_v31 = vld [vmem:[#allocation7 + $0x530] sm:$0xff]  ;;  %v3859_v34 = vld [vmem:[#allocation7 + $0x518] sm:$0xff] }
 0xa8b   :  { %5107 = vmatpush1.bf16.msra.mxu0 %v6799_v45  ;;  %5026 = vmatprep.subr.bf16.mxu1 %v6806_v46  ;;  %v6855_v45 = vcombine.low %v3803_v35, %v3807_v36  ;;  %v6862_v46 = vcombine.high %v3810_v40, %v3814_v42  ;;  %v3863_v35 = vld [vmem:[#allocation7 + $0x538] sm:$0xff]  ;;  %v6901_v36 = vcombine.low %v3850_v22, %v3854_v24 }
 0xa8c   :  { %5108 = vmatprep.subr.bf16.mxu0 %v6808_v47  ;;  %v6864_v47 = vcombine.high %v3811_v43, %v3815_v17 }
 0xa8e   :  { %5027 = vmatpush1.bf16.msra.mxu1 %v6805_v54  ;;  %v6861_v54 = vcombine.low %v3810_v40, %v3814_v42  ;;  %v3867_v40 = vld [vmem:[#allocation7 + $0x558] sm:$0xff] }
 0xa8f   :  { %5109 = vmatpush1.bf16.msra.mxu0 %v6807_v56  ;;  %5028 = vmatprep.subr.bf16.mxu1 %v6814_v33  ;;  %v6863_v56 = vcombine.low %v3811_v43, %v3815_v17  ;;  %v6870_v33 = vcombine.high %v3818_v49, %v3822_v50  ;;  %v3871_v42 = vld [vmem:[#allocation7 + $0x578] sm:$0xff]  ;;  %v6911_v17 = vcombine.low %v3859_v34, %v3863_v35 }
 0xa90   :  { %5110 = vmatprep.subr.bf16.mxu0 %v6816_v57  ;;  %v6872_v57 = vcombine.high %v3819_v52, %v3823_v53 }
 0xa92   :  { %5029 = vmatpush1.bf16.msra.mxu1 %v6813_v63  ;;  %v6869_v63 = vcombine.low %v3818_v49, %v3822_v50  ;;  %v3875_v49 = vld [vmem:[#allocation7 + $0x598] sm:$0xff] }
 0xa93   :  { %5111 = vmatpush1.bf16.msra.mxu0 %v6815_v0  ;;  %5030 = vmatprep.subr.bf16.mxu1 %v6822_v1  ;;  %v6871_v0 = vcombine.low %v3819_v52, %v3823_v53  ;;  %v6878_v1 = vcombine.high %v3826_v58, %v3830_v59  ;;  %v3879_v50 = vld [vmem:[#allocation7 + $0x5b8] sm:$0xff]  ;;  %v6919_v53 = vcombine.low %v3867_v40, %v3871_v42 }
 0xa94   :  { %5112 = vmatprep.subr.bf16.mxu0 %v6824_v2  ;;  %v6880_v2 = vcombine.high %v3827_v61, %v3831_v62 }
 0xa96   :  { %5031 = vmatpush1.bf16.msra.mxu1 %v6821_v9  ;;  %v6877_v9 = vcombine.low %v3826_v58, %v3830_v59  ;;  %v3883_v58 = vld [vmem:[#allocation7 + $0x5d8] sm:$0xff] }
 0xa97   :  { %5113 = vmatpush1.bf16.msra.mxu0 %v6823_v10  ;;  %5032 = vmatprep.subr.bf16.mxu1 %v6830_v11  ;;  %v6879_v10 = vcombine.low %v3827_v61, %v3831_v62  ;;  %v6886_v11 = vcombine.high %v3834_v3, %v3838_v4  ;;  %v3887_v59 = vld [vmem:[#allocation7 + $0x5f8] sm:$0xff]  ;;  %v6927_v62 = vcombine.low %v3875_v49, %v3879_v50 }
 0xa98   :  { %5114 = vmatprep.subr.bf16.mxu0 %v6832_v13  ;;  %v6888_v13 = vcombine.high %v3835_v5, %v3839_v6 }
 0xa9a   :  { %5033 = vmatpush1.bf16.msra.mxu1 %v6829_v18  ;;  %v6885_v18 = vcombine.low %v3834_v3, %v3838_v4 }
 0xa9b   :  { %5115 = vmatpush1.bf16.msra.mxu0 %v6831_v19  ;;  %5034 = vmatprep.subr.bf16.mxu1 %v6838_v20  ;;  %v6887_v19 = vcombine.low %v3835_v5, %v3839_v6  ;;  %v6894_v20 = vcombine.high %v3842_v23, %v3846_v28 }
 0xa9c   :  { %5116 = vmatprep.subr.bf16.mxu0 %v6840_v21  ;;  %v6896_v21 = vcombine.high %v3843_v39, %v3847_v15 }
 0xa9e   :  { %5035 = vmatpush1.bf16.msra.mxu1 %v6837_v29  ;;  %v6893_v29 = vcombine.low %v3842_v23, %v3846_v28 }
 0xa9f   :  { %5117 = vmatpush1.bf16.msra.mxu0 %v6839_v16  ;;  %5036 = vmatprep.subr.bf16.mxu1 %v6846_v48  ;;  %v6902_v16 = vcombine.high %v3850_v22, %v3854_v24  ;;  %v6904_v48 = vcombine.high %v3851_v25, %v3855_v26 }
 0xaa0   :  { %5118 = vmatprep.subr.bf16.mxu0 %v6848_v51  ;;  %v3858_v51 = vld [vmem:[#allocation7 + $0x510] sm:$0xff] }
 0xaa1   :  { %v6909_v43 = vcombine.low %v3858_v51, %v3862_v31 }
 0xaa2   :  { %5037 = vmatpush1.bf16.msra.mxu1 %v6845_v27  ;;  %v6903_v27 = vcombine.low %v3851_v25, %v3855_v26 }
 0xaa3   :  { %5119 = vmatpush1.bf16.msra.mxu0 %v6847_v12  ;;  %5038 = vmatprep.subr.bf16.mxu1 %v6854_v37  ;;  %v6910_v12 = vcombine.high %v3858_v51, %v3862_v31  ;;  %v3866_v37 = vld [vmem:[#allocation7 + $0x550] sm:$0xff] }
 0xaa4   :  { %5120 = vmatprep.subr.bf16.mxu0 %v6856_v38  ;;  %v3870_v38 = vld [vmem:[#allocation7 + $0x570] sm:$0xff] }
 0xaa5   :  { %v6917_v52 = vcombine.low %v3866_v37, %v3870_v38 }
 0xaa6   :  { %5039 = vmatpush1.bf16.msra.mxu1 %v6853_v44  ;;  %v6918_v44 = vcombine.high %v3866_v37, %v3870_v38 }
 0xaa7   :  { %5121 = vmatpush1.bf16.msra.mxu0 %v6855_v45  ;;  %5040 = vmatprep.subr.bf16.mxu1 %v6862_v46  ;;  %v6920_v45 = vcombine.high %v3867_v40, %v3871_v42  ;;  %v3874_v46 = vld [vmem:[#allocation7 + $0x590] sm:$0xff] }
 0xaa8   :  { %5122 = vmatprep.subr.bf16.mxu0 %v6864_v47  ;;  %v3878_v47 = vld [vmem:[#allocation7 + $0x5b0] sm:$0xff] }
 0xaa9   :  { %v6925_v61 = vcombine.low %v3874_v46, %v3878_v47 }
 0xaaa   :  { %5041 = vmatpush1.bf16.msra.mxu1 %v6861_v54  ;;  %v6926_v54 = vcombine.high %v3874_v46, %v3878_v47 }
 0xaab   :  { %5123 = vmatpush1.bf16.msra.mxu0 %v6863_v56  ;;  %5042 = vmatprep.subr.bf16.mxu1 %v6870_v33  ;;  %v6928_v56 = vcombine.high %v3875_v49, %v3879_v50  ;;  %v3882_v33 = vld [vmem:[#allocation7 + $0x5d0] sm:$0xff] }
 0xaac   :  { %5124 = vmatprep.subr.bf16.mxu0 %v6872_v57  ;;  %v3886_v57 = vld [vmem:[#allocation7 + $0x5f0] sm:$0xff] }
 0xaae   :  { %5043 = vmatpush1.bf16.msra.mxu1 %v6869_v63  ;;  %v6934_v63 = vcombine.high %v3882_v33, %v3886_v57 }
 0xaaf   :  { %5125 = vmatpush1.bf16.msra.mxu0 %v6871_v0  ;;  %5053 = vmatprep.subr.bf16.mxu1 %v6878_v1  ;;  %v6936_v0 = vcombine.high %v3883_v58, %v3887_v59  ;;  %v6933_v1 = vcombine.low %v3882_v33, %v3886_v57  ;;  %v7840_v33 = vld [vmem:[#allocation9 + $0xc0] sm:$0xff]  }
 0xab0   :  { %5135 = vmatprep.subr.bf16.mxu0 %v6880_v2  ;;  %v6935_v2 = vcombine.low %v3883_v58, %v3887_v59 }
 0xab1   :  { %5045 = vmatmul.mubr.bf16.vlgmr.msra.gmra.mrb[40].mxu1 %v8601_v14 }
 0xab2   :  { %5127 = vmatmul.mubr.bf16.vlgmr.msra.gmra.mrb[40].mxu0 %v8601_v14  ;;  %5054 = vmatpush1.bf16.msra.mxu1 %v6877_v9  ;;  %v6895_v14 = vcombine.low %v3843_v39, %v3847_v15 }
 0xab3   :  { %5136 = vmatpush1.bf16.msra.mxu0 %v6879_v10  ;;  %5055 = vmatprep.subr.bf16.mxu1 %v6886_v11 }
 0xab4   :  { %5137 = vmatprep.subr.bf16.mxu0 %v6888_v13  ;;  %5085 = vmatprep.mubr.bf16.mxu1 %v8116_v60 }
 0xab5   :  { %5167 = vmatprep.mubr.bf16.mxu0 %v8116_v60  ;;  %v6912_v60 = vcombine.high %v3859_v34, %v3863_v35 }
 0xab6   :  { %5056 = vmatpush1.bf16.msra.mxu1 %v6885_v18 }
 0xab7   :  { %5138 = vmatpush1.bf16.msra.mxu0 %v6887_v19  ;;  %5057 = vmatprep.subr.bf16.mxu1 %v6894_v20 }
 0xab8   :  { %5139 = vmatprep.subr.bf16.mxu0 %v6896_v21 }
 0xaba   :  { %5058 = vmatpush1.bf16.msra.mxu1 %v6893_v29 }
 0xabb   :  { %5140 = vmatpush1.bf16.msra.mxu0 %v6895_v14  ;;  %5059 = vmatprep.subr.bf16.mxu1 %v6902_v16 }
 0xabc   :  { %5141 = vmatprep.subr.bf16.mxu0 %v6904_v48 }
 0xabe   :  { %5060 = vmatpush1.bf16.msra.mxu1 %v6901_v36 }
 0xabf   :  { %5142 = vmatpush1.bf16.msra.mxu0 %v6903_v27  ;;  %5061 = vmatprep.subr.bf16.mxu1 %v6910_v12 }
 0xac0   :  { %5143 = vmatprep.subr.bf16.mxu0 %v6912_v60 }
 0xac2   :  { %5062 = vmatpush1.bf16.msra.mxu1 %v6909_v43 }
 0xac3   :  { %5144 = vmatpush1.bf16.msra.mxu0 %v6911_v17  ;;  %5063 = vmatprep.subr.bf16.mxu1 %v6918_v44 }
 0xac4   :  { %5145 = vmatprep.subr.bf16.mxu0 %v6920_v45 }
 0xac6   :  { %5064 = vmatpush1.bf16.msra.mxu1 %v6917_v52 }
 0xac7   :  { %5146 = vmatpush1.bf16.msra.mxu0 %v6919_v53  ;;  %5065 = vmatprep.subr.bf16.mxu1 %v6926_v54 }
 0xac8   :  { %5147 = vmatprep.subr.bf16.mxu0 %v6928_v56  ;;  %v7839_v56 = vld [vmem:[#allocation9 + $0x40] sm:$0xff]  }
 0xaca   :  { %5066 = vmatpush1.bf16.msra.mxu1 %v6925_v61 }
 0xacb   :  { %5148 = vmatpush1.bf16.msra.mxu0 %v6927_v62  ;;  %5067 = vmatprep.subr.bf16.mxu1 %v6934_v63  ;;  %v7841_v62 = vld [vmem:[#allocation9] sm:$0xff]  }
 0xacc   :  { %5149 = vmatprep.subr.bf16.mxu0 %v6936_v0  ;;  %v7842_v63 = vld [vmem:[#allocation9 + $0x80] sm:$0xff]  }
 0xace   :  { %5068 = vmatpush1.bf16.msra.mxu1 %v6933_v1 }
 0xacf   :  { %5150 = vmatpush1.bf16.msra.mxu0 %v6935_v2  ;;  %7175 = vmatprep.subr.bf16.mxu1 %v7839_v56  ;;  %v7856_v56 = vld [vmem:[#allocation9 + $0xe0] sm:$0xff]  }
 0xad0   :  { %7197 = vmatprep.subr.bf16.mxu0 %v7840_v33  ;;  %v7857_v33 = vld [vmem:[#allocation9 + $0x20] sm:$0xff]  }
 0xad1   :  { %5086 = vmatmul.mubr.bf16.vlgmr.msra.gmra.mrb[40].mxu1 %v8614_v55 }
 0xad2   :  { %5168 = vmatmul.mubr.bf16.vlgmr.msra.gmra.mrb[40].mxu0 %v8614_v55  ;;  %7176 = vmatpush3.bf16.msra.mxu1 %v7841_v62  ;;  %v7862_v62 = vld [vmem:[#allocation9 + $0xa8] sm:$0xff]  }
 0xad3   :  { %7198 = vmatpush3.bf16.msra.mxu0 %v7842_v63 }
 0xb44   :  { %v8626_v3 = vpop.f32.mrb[36].mxu1  ;;  %v8628_v4 = vpop.f32.mrb[36].mxu0 }
 0xb45   :  { %v5180_v5 = vrot.slane %v8626_v3, 4  ;;  %v5236_v6 = vmul.f32 %v8626_v3, %v8626_v3  ;;  %v5192_v9 = vrot.slane %v8628_v4, 4  ;;  %v5238_v10 = vmul.f32 %v8628_v4, %v8628_v4  ;;  %v8636_v11 = vpop.f32.mrb[37].mxu1  ;;  %v8638_v13 = vpop.f32.mrb[37].mxu0 }
 0xb46   :  { %v5186_v55 = vrot.slane %v8636_v11, 4  ;;  %v5237_v23 = vmul.f32 %v8636_v11, %v8636_v11  ;;  %v5198_v28 = vrot.slane %v8638_v13, 4  ;;  %v5239_v39 = vmul.f32 %v8638_v13, %v8638_v13  ;;  %v4927_v15 = vpop.f32.mrb[38].mxu1  ;;  %v5009_v18 = vpop.f32.mrb[38].mxu0 }
 0xb47   :  { %v5181_v19 = vadd.f32 %v5180_v5, %v8626_v3  ;;  %v5244_v20 = vrot.slane %v5236_v6, 4  ;;  %v5193_v21 = vadd.f32 %v5192_v9, %v8628_v4  ;;  %v5256_v22 = vrot.slane %v5238_v10, 4  ;;  %v4928_v24 = vpop.f32.mrb[39].mxu1  ;;  %v5010_v25 = vpop.f32.mrb[39].mxu0  ;;  %v7843_v18 = vld [vmem:[#allocation9 + $0x48] sm:$0xff]  }
 0xb48   :  { %v5187_v26 = vadd.f32 %v5186_v55, %v8636_v11  ;;  %v5250_v29 = vrot.slane %v5237_v23, 4  ;;  %v5199_v14 = vadd.f32 %v5198_v28, %v8638_v13  ;;  %v5262_v16 = vrot.slane %v5239_v39, 4  ;;  %v7845_v25 = vld [vmem:[#allocation9 + $0x8] sm:$0xff]   ;;  %7177 = vmatprep.subr.bf16.mxu1 %v7843_v18  ;;  %v7868_v18 = vld [vmem:[#allocation9 + $0xf8] sm:$0xff]  }
 0xb49   :  { %v5182_v48 = vrot.slane %v5181_v19, 2  ;;  %v5245_v51 = vadd.f32 %v5244_v20, %v5236_v6  ;;  %v5194_v31 = vrot.slane %v5193_v21, 2  ;;  %v5257_v34 = vadd.f32 %v5256_v22, %v5238_v10  ;;  %7178 = vmatpush3.bf16.msra.mxu1 %v7845_v25  ;;  %v7870_v25 = vld [vmem:[#allocation9 + $0xb8] sm:$0xff]  }
 0xb4a   :  { %v5188_v35 = vrot.slane %v5187_v26, 2  ;;  %v5251_v36 = vadd.f32 %v5250_v29, %v5237_v23  ;;  %v5200_v27 = vrot.slane %v5199_v14, 2  ;;  %v5263_v12 = vadd.f32 %v5262_v16, %v5239_v39 }
 0xb4b   :  { %v5183_v60 = vadd.f32 %v5182_v48, %v5181_v19  ;;  %v5246_v37 = vrot.slane %v5245_v51, 2  ;;  %v5195_v38 = vadd.f32 %v5194_v31, %v5193_v21  ;;  %v5258_v40 = vrot.slane %v5257_v34, 2  ;;  %v7844_v19 = vld [vmem:[#allocation9 + $0xc8] sm:$0xff]  }
 0xb4c   :  { %v5189_v42 = vadd.f32 %v5188_v35, %v5187_v26  ;;  %v5252_v43 = vrot.slane %v5251_v36, 2  ;;  %v5201_v17 = vadd.f32 %v5200_v27, %v5199_v14  ;;  %v5264_v44 = vrot.slane %v5263_v12, 2  ;;  %v7846_v26 = vld [vmem:[#allocation9 + $0x88] sm:$0xff]   ;;  %7199 = vmatprep.subr.bf16.mxu0 %v7844_v19  ;;  %v7848_v27 = vld [vmem:[#allocation9 + $0xd0] sm:$0xff]  }
 0xb4d   :  { %v5184_v45 = vrot.slane %v5183_v60, 1  ;;  %v5247_v46 = vadd.f32 %v5246_v37, %v5245_v51  ;;  %v5196_v47 = vrot.slane %v5195_v38, 1  ;;  %v5259_v49 = vadd.f32 %v5258_v40, %v5257_v34  ;;  %7200 = vmatpush3.bf16.msra.mxu0 %v7846_v26  ;;  %v7849_v37 = vld [vmem:[#allocation9 + $0x10] sm:$0xff]  }
 0xb4e   :  { %v5190_v50 = vrot.slane %v5189_v42, 1  ;;  %v5253_v52 = vadd.f32 %v5252_v43, %v5251_v36  ;;  %v5202_v53 = vrot.slane %v5201_v17, 1  ;;  %v5265_v54 = vadd.f32 %v5264_v44, %v5263_v12  ;;  %v7847_v36 = vld [vmem:[#allocation9 + $0x50] sm:$0xff]   ;;  %7201 = vmatprep.subr.bf16.mxu0 %v7848_v27 }
 0xb4f   :  { %v5185_v57 = vadd.f32 %v5184_v45, %v5183_v60  ;;  %v5248_v58 = vrot.slane %v5247_v46, 1  ;;  %v5197_v59 = vadd.f32 %v5196_v47, %v5195_v38  ;;  %v5260_v61 = vrot.slane %v5259_v49, 1  ;;  %v7850_v38 = vld [vmem:[#allocation9 + $0x90] sm:$0xff]   ;;  %7179 = vmatprep.subr.bf16.mxu1 %v7847_v36  ;;  %v7852_v47 = vld [vmem:[#allocation9 + $0xd8] sm:$0xff]  }
 0xb50   :  { %v5191_v0 = vadd.f32 %v5190_v50, %v5189_v42  ;;  %v5254_v1 = vrot.slane %v5253_v52, 1  ;;  %v5203_v2 = vadd.f32 %v5202_v53, %v5201_v17  ;;  %v5266_v5 = vrot.slane %v5265_v54, 1  ;;  %7180 = vmatpush3.bf16.msra.mxu1 %v7849_v37  ;;  %v7854_v50 = vld [vmem:[#allocation9 + $0x98] sm:$0xff]  }
 0xb51   :  { %v8650_v6 = vmul.f32 0.125, %v5185_v57  ;;  %v5249_v9 = vadd.f32 %v5248_v58, %v5247_v46  ;;  %v8652_v10 = vmul.f32 0.125, %v5197_v59  ;;  %v5261_v55 = vadd.f32 %v5260_v61, %v5259_v49  ;;  %7202 = vmatpush3.bf16.msra.mxu0 %v7850_v38  ;;  %v7851_v46 = vld [vmem:[#allocation9 + $0x58] sm:$0xff]   ;;  %v7858_v57 = vld [vmem:[#allocation9 + $0xa0] sm:$0xff]   ;;  %v7859_v58 = vld [vmem:[#allocation9 + $0x68] sm:$0xff]  }
 0xb52   :  { %v8654_v23 = vmul.f32 0.125, %v5191_v0  ;;  %v5255_v28 = vadd.f32 %v5254_v1, %v5253_v52  ;;  %v8656_v39 = vmul.f32 0.125, %v5203_v2  ;;  %v5267_v15 = vadd.f32 %v5266_v5, %v5265_v54  ;;  %v7853_v49 = vld [vmem:[#allocation9 + $0x18] sm:$0xff]   ;;  %7181 = vmatprep.subr.bf16.mxu1 %v7851_v46  ;;  %7203 = vmatprep.subr.bf16.mxu0 %v7852_v47  ;;  %v7855_v54 = vld [vmem:[#allocation9 + $0x60] sm:$0xff]   ;;  %v7860_v59 = vld [vmem:[#allocation9 + $0xe8] sm:$0xff]  }
 0xb53   :  { %v5292_v20 = vmul.f32 0.125, %v5249_v9  ;;  %v5300_v21 = vmul.f32 %v8650_v6, %v8650_v6  ;;  %v5294_v22 = vmul.f32 0.125, %v5261_v55  ;;  %v5302_v24 = vmul.f32 %v8652_v10, %v8652_v10  ;;  %v7861_v61 = vld [vmem:[#allocation9 + $0x28] sm:$0xff]   ;;  %v7863_v0 = vld [vmem:[#allocation9 + $0x70] sm:$0xff]  }
 0xb54   :  { %v5293_v29 = vmul.f32 0.125, %v5255_v28  ;;  %v5301_v14 = vmul.f32 %v8654_v23, %v8654_v23  ;;  %v5295_v16 = vmul.f32 0.125, %v5267_v15  ;;  %v5303_v48 = vmul.f32 %v8656_v39, %v8656_v39  ;;  %7182 = vmatpush3.bf16.msra.mxu1 %v7853_v49  ;;  %v7864_v1 = vld [vmem:[#allocation9 + $0xf0] sm:$0xff]   ;;  %v7867_v15 = vld [vmem:[#allocation9 + $0x78] sm:$0xff]  }
 0xb55   :  { %v5308_v51 = vsub.f32 %v5292_v20, %v5300_v21  ;;  %v5310_v31 = vsub.f32 %v5294_v22, %v5302_v24  ;;  %7204 = vmatpush3.bf16.msra.mxu0 %v7854_v50  ;;  %v8120_v52 = vmov 1966171168   ;;  %7183 = vmatprep.subr.bf16.mxu1 %v7855_v54  ;;  %v7865_v5 = vld [vmem:[#allocation9 + $0x30] sm:$0xff]   ;;  %v7869_v24 = vld [vmem:[#allocation9 + $0x38] sm:$0xff]  }
 0xb56   :  { %v5309_v34 = vsub.f32 %v5293_v29, %v5301_v14  ;;  %v5311_v35 = vsub.f32 %v5295_v16, %v5303_v48  ;;  %v5353_v53 = vunpack.c.l.s4 %v8120_v52  ;;  %7205 = vmatprep.subr.bf16.mxu0 %v7856_v56  ;;  %v7866_v9 = vld [vmem:[#allocation9 + $0xb0] sm:$0xff]   ;;  %v7871_v16 = vld [vmem:[#allocation9 + $0x140] sm:$0xff]  }
 0xb57   :  { %v5316_v12 = vmax.f32 %v5308_v51, 0.0  ;;  %v5318_v60 = vmax.f32 %v5310_v31, 0.0  ;;  %v7872_v48 = vld [vmem:[#allocation9 + $0x1c0] sm:$0xff]  }
 0xb58   :  { %v5317_v40 = vmax.f32 %v5309_v34, 0.0  ;;  %v5319_v42 = vmax.f32 %v5311_v35, 0.0  ;;  %7184 = vmatpush3.bf16.msra.mxu1 %v7857_v33  ;;  %v5354_v63 = vunpack.c.0.s8 %v5353_v53 }
 0xb59   :  { %v5324_v43 = vadd.f32 1e-05, %v5316_v12  ;;  %v5326_v17 = vadd.f32 1e-05, %v5318_v60  ;;  %7206 = vmatpush3.bf16.msra.mxu0 %v7858_v57  ;;  %7185 = vmatprep.subr.bf16.mxu1 %v7859_v58 }
 0xb5a   :  { %v5325_v44 = vadd.f32 1e-05, %v5317_v40  ;;  %v5327_v45 = vadd.f32 1e-05, %v5319_v42  ;;  %7207 = vmatprep.subr.bf16.mxu0 %v7860_v59  ;;  %v8667_v28 = vsub.s32 %v5354_v63, %v8425_v32 }
 0xb5b   :  { %7917 = vrsqrt.f32 %v5324_v43 }
 0xb5c   :  { %7919 = vrsqrt.f32 %v5326_v17  ;;  %7186 = vmatpush3.bf16.msra.mxu1 %v7861_v61 }
 0xb5d   :  { %7921 = vrsqrt.f32 %v5325_v44  ;;  %7208 = vmatpush3.bf16.msra.mxu0 %v7862_v62  ;;  %7187 = vmatprep.subr.bf16.mxu1 %v7863_v0 }
 0xb5e   :  { %7923 = vrsqrt.f32 %v5327_v45  ;;  %7209 = vmatprep.subr.bf16.mxu0 %v7864_v1 }
 0xb60   :  { %7188 = vmatpush3.bf16.msra.mxu1 %v7865_v5 }
 0xb61   :  { %7210 = vmatpush3.bf16.msra.mxu0 %v7866_v9  ;;  %7189 = vmatprep.subr.bf16.mxu1 %v7867_v15 }
 0xb62   :  { %7211 = vmatprep.subr.bf16.mxu0 %v7868_v18 }
 0xb64   :  { %7190 = vmatpush3.bf16.msra.mxu1 %v7869_v24 }
 0xb65   :  { %v7918_v2 = vpop.eup %7917  ;;  %7212 = vmatpush3.bf16.msra.mxu0 %v7870_v25  ;;  %7219 = vmatprep.subr.bf16.mxu1 %v7871_v16 }
 0xb66   :  { %v7920_v55 = vpop.eup %7919  ;;  %7241 = vmatprep.subr.bf16.mxu0 %v7872_v48 }
 0xb67   :  { %v7922_v19 = vpop.eup %7921 }
 0xb68   :  { %v7924_v20 = vpop.eup %7923  ;;  %v5348_v21 = vcombine.low %v7918_v2, %v7922_v19 }
 0xb69   :  { %v5349_v22 = vcombine.low %v7920_v55, %v7924_v20 }
 0xb6a   :  { %v8670_v26 = vrot.slane %v5348_v21, %v8667_v28 }
 0xb6b   :  { %v8673_v29 = vrot.slane %v5349_v22, %v8667_v28 }
 0xb6d   :  { %v5380_v14 = vcombine.low %v8670_v26, %v8673_v29  ;;  %v5414_v26 = vsub.s32 3, %v8425_v32 }
 0xba4   :  { %v8677_v51 = vpop.f32.mrb[40].mxu1 }
 0xba5   :  { %v5204_v31 = vrot.slane %v8677_v51, 4  ;;  %v5240_v34 = vmul.f32 %v8677_v51, %v8677_v51  ;;  %v8682_v35 = vpop.f32.mrb[40].mxu0  ;;  %v8684_v36 = vpop.f32.mrb[41].mxu1 }
 0xba6   :  { %v5216_v27 = vrot.slane %v8682_v35, 4  ;;  %v5242_v12 = vmul.f32 %v8682_v35, %v8682_v35  ;;  %v5210_v60 = vrot.slane %v8684_v36, 4  ;;  %v5241_v37 = vmul.f32 %v8684_v36, %v8684_v36  ;;  %v8692_v38 = vpop.f32.mrb[41].mxu0  ;;  %v5091_v40 = vpop.f32.mrb[42].mxu1 }
 0xba7   :  { %v5205_v42 = vadd.f32 %v5204_v31, %v8677_v51  ;;  %v5268_v43 = vrot.slane %v5240_v34, 4  ;;  %v5222_v17 = vrot.slane %v8692_v38, 4  ;;  %v5243_v44 = vmul.f32 %v8692_v38, %v8692_v38  ;;  %v5173_v45 = vpop.f32.mrb[42].mxu0  ;;  %v5092_v46 = vpop.f32.mrb[43].mxu1 }
 0xba8   :  { %v5217_v47 = vadd.f32 %v5216_v27, %v8682_v35  ;;  %v5280_v49 = vrot.slane %v5242_v12, 4  ;;  %v5211_v50 = vadd.f32 %v5210_v60, %v8684_v36  ;;  %v5274_v52 = vrot.slane %v5241_v37, 4  ;;  %v5174_v53 = vpop.f32.mrb[43].mxu0 }
 0xba9   :  { %v5206_v54 = vrot.slane %v5205_v42, 2  ;;  %v5269_v56 = vadd.f32 %v5268_v43, %v5240_v34  ;;  %v5223_v33 = vadd.f32 %v5222_v17, %v8692_v38  ;;  %v5286_v57 = vrot.slane %v5243_v44, 4 }
 0xbaa   :  { %v5218_v58 = vrot.slane %v5217_v47, 2  ;;  %v5281_v59 = vadd.f32 %v5280_v49, %v5242_v12  ;;  %v5212_v61 = vrot.slane %v5211_v50, 2  ;;  %v5275_v62 = vadd.f32 %v5274_v52, %v5241_v37 }
 0xbab   :  { %v5207_v63 = vadd.f32 %v5206_v54, %v5205_v42  ;;  %v5270_v0 = vrot.slane %v5269_v56, 2  ;;  %v5224_v1 = vrot.slane %v5223_v33, 2  ;;  %v5287_v2 = vadd.f32 %v5286_v57, %v5243_v44 }
 0xbac   :  { %v5219_v5 = vadd.f32 %v5218_v58, %v5217_v47  ;;  %v5282_v9 = vrot.slane %v5281_v59, 2  ;;  %v5213_v55 = vadd.f32 %v5212_v61, %v5211_v50  ;;  %v5276_v15 = vrot.slane %v5275_v62, 2 }
 0xbad   :  { %v5208_v18 = vrot.slane %v5207_v63, 1  ;;  %v5271_v19 = vadd.f32 %v5270_v0, %v5269_v56  ;;  %v5225_v20 = vadd.f32 %v5224_v1, %v5223_v33  ;;  %v5288_v21 = vrot.slane %v5287_v2, 2 }
 0xbae   :  { %v5220_v22 = vrot.slane %v5219_v5, 1  ;;  %v5283_v24 = vadd.f32 %v5282_v9, %v5281_v59  ;;  %v5214_v25 = vrot.slane %v5213_v55, 1  ;;  %v5277_v16 = vadd.f32 %v5276_v15, %v5275_v62 }
 0xbaf   :  { %v5209_v48 = vadd.f32 %v5208_v18, %v5207_v63  ;;  %v5272_v31 = vrot.slane %v5271_v19, 1  ;;  %v5226_v34 = vrot.slane %v5225_v20, 1  ;;  %v5289_v27 = vadd.f32 %v5288_v21, %v5287_v2 }
 0xbb0   :  { %v5221_v12 = vadd.f32 %v5220_v22, %v5219_v5  ;;  %v5284_v60 = vrot.slane %v5283_v24, 1  ;;  %v5215_v37 = vadd.f32 %v5214_v25, %v5213_v55  ;;  %v5278_v40 = vrot.slane %v5277_v16, 1 }
 0xbb1   :  { %v5232_v42 = vmul.f32 0.125, %v5209_v48  ;;  %v5273_v43 = vadd.f32 %v5272_v31, %v5271_v19  ;;  %v5227_v17 = vadd.f32 %v5226_v34, %v5225_v20  ;;  %v5290_v44 = vrot.slane %v5289_v27, 1 }
 0xbb2   :  { %v5234_v45 = vmul.f32 0.125, %v5221_v12  ;;  %v5285_v46 = vadd.f32 %v5284_v60, %v5283_v24  ;;  %v5233_v47 = vmul.f32 0.125, %v5215_v37  ;;  %v5279_v49 = vadd.f32 %v5278_v40, %v5277_v16  ;;  %v6937_v37 = vld [vmem:[%s8776_s9 + $0x6] ss:$2 sm:$0xff] }
 0xbb3   :  { %v5296_v50 = vmul.f32 0.125, %v5273_v43  ;;  %v5304_v52 = vmul.f32 %v5232_v42, %v5232_v42  ;;  %v5235_v53 = vmul.f32 0.125, %v5227_v17  ;;  %v5291_v54 = vadd.f32 %v5290_v44, %v5289_v27 }
 0xbb4   :  { %v5298_v56 = vmul.f32 0.125, %v5285_v46  ;;  %v5306_v33 = vmul.f32 %v5234_v45, %v5234_v45  ;;  %v5297_v57 = vmul.f32 0.125, %v5279_v49  ;;  %v5305_v58 = vmul.f32 %v5233_v47, %v5233_v47 }
 0xbb5   :  { %v5312_v59 = vsub.f32 %v5296_v50, %v5304_v52  ;;  %v5299_v61 = vmul.f32 0.125, %v5291_v54  ;;  %v5307_v62 = vmul.f32 %v5235_v53, %v5235_v53  ;;  %v5388_v12 = vrot.slane %v5380_v14, %v8667_v28 }
 0xbb6   :  { %v5314_v63 = vsub.f32 %v5298_v56, %v5306_v33  ;;  %v5313_v0 = vsub.f32 %v5297_v57, %v5305_v58  ;;  %v5418_v40 = vsub.s32 4, %v8425_v32  ;;  %v5422_v17 = vsub.s32 5, %v8425_v32 }
 0xbb7   :  { %v5320_v1 = vmax.f32 %v5312_v59, 0.0  ;;  %v5315_v2 = vsub.f32 %v5299_v61, %v5307_v62  ;;  %v5426_v44 = vsub.s32 6, %v8425_v32  ;;  %v5430_v46 = vsub.s32 7, %v8425_v32 }
 0xbb8   :  { %v5322_v5 = vmax.f32 %v5314_v63, 0.0  ;;  %v5321_v9 = vmax.f32 %v5313_v0, 0.0  ;;  %v5410_v49 = vsub.s32 2, %v8425_v32 }
 0xbb9   :  { %v5328_v55 = vadd.f32 1e-05, %v5320_v1  ;;  %v5323_v15 = vmax.f32 %v5315_v2, 0.0 }
 0xbba   :  { %v5330_v18 = vadd.f32 1e-05, %v5322_v5  ;;  %v5329_v19 = vadd.f32 1e-05, %v5321_v9 }
 0xbbb   :  { %7925 = vrsqrt.f32 %v5328_v55  ;;  %v5331_v20 = vadd.f32 1e-05, %v5323_v15 }
 0xbbc   :  { %7927 = vrsqrt.f32 %v5330_v18 }
 0xbbd   :  { %7929 = vrsqrt.f32 %v5329_v19 }
 0xbbe   :  { %7931 = vrsqrt.f32 %v5331_v20 }
 0xbc5   :  { %v7926_v21 = vpop.eup %7925 }
 0xbc6   :  { %v7928_v22 = vpop.eup %7927 }
 0xbc7   :  { %v7930_v24 = vpop.eup %7929 }
 0xbc8   :  { %v7932_v25 = vpop.eup %7931  ;;  %v5350_v16 = vcombine.low %v7926_v21, %v7930_v24  ;;  %v6938_v21 = vld [vmem:[%s8776_s9 + $0x7] ss:$2 sm:$0xff] }
 0xbc9   :  { %v5351_v48 = vcombine.low %v7928_v22, %v7932_v25 }
 0xbca   :  { %v5372_v31 = vrot.slane %v5350_v16, %v8667_v28 }
 0xbcb   :  { %v5379_v34 = vrot.slane %v5351_v48, %v8667_v28 }
 0xbcd   :  { %v5381_v27 = vcombine.low %v5372_v31, %v5379_v34 }
 0xbcf   :  { %v5395_v60 = vrot.slane %v5381_v27, %v8667_v28 }
 0xbd1   :  { %v5396_v43 = vcombine.low %v5388_v12, %v5395_v60 }
 0xbd3   :  { %v5398_v29 = vmul.f32 %v6937_v37, %v5396_v43 }
 0xbd5   :  { %v5419_v14 = vrot.slane %v5398_v29, %v5418_v40  ;;  %v5423_v50 = vrot.slane %v5398_v29, %v5422_v17  ;;  %v5427_v52 = vrot.slane %v5398_v29, %v5426_v44  ;;  %v5431_v54 = vrot.slane %v5398_v29, %v5430_v46 }
 0xbd6   :  { %v5403_v56 = vrot.slane %v5398_v29, %v8438_v41  ;;  %v5407_v33 = vrot.slane %v5398_v29, %v8444_v8  ;;  %v5411_v57 = vrot.slane %v5398_v29, %v5410_v49  ;;  %v5415_v58 = vrot.slane %v5398_v29, %v5414_v26 }
 0xbd7   :  { %v5444_v59 = vmul.f32 %v5419_v14, %v5232_v42  ;;  %v5445_v61 = vmul.f32 %v5423_v50, %v5233_v47  ;;  %v5446_v62 = vmul.f32 %v5427_v52, %v5234_v45  ;;  %v5447_v63 = vmul.f32 %v5431_v54, %v5235_v53 }
 0xbd8   :  { %v5514_v0 = vmul.f32 %v5431_v54, %v8692_v38  ;;  %v5440_v1 = vmul.f32 %v5403_v56, %v8650_v6  ;;  %v5441_v32 = vmul.f32 %v5407_v33, %v8654_v23  ;;  %v5442_v2 = vmul.f32 %v5411_v57, %v8652_v10 }
 0xbd9   :  { %v5458_v5 = vcombine.low %v5444_v59, %v5445_v61  ;;  %v5459_v9 = vcombine.low %v5446_v62, %v5447_v63  ;;  %v5443_v55 = vmul.f32 %v5415_v58, %v8656_v39  ;;  %v5508_v15 = vmul.f32 %v5407_v33, %v8636_v11  ;;  %v7873_v59 = vld [vmem:[#allocation9 + $0x100] sm:$0xff]   ;;  %v7875_v63 = vld [vmem:[#allocation9 + $0x148] sm:$0xff]  }
 0xbda   :  { %v5456_v18 = vcombine.low %v5440_v1, %v5441_v32  ;;  %v5510_v42 = vmul.f32 %v5415_v58, %v8638_v13  ;;  %v5507_v45 = vmul.f32 %v5403_v56, %v8626_v3  ;;  %v5509_v47 = vmul.f32 %v5411_v57, %v8628_v4  ;;  %v7874_v61 = vld [vmem:[#allocation9 + $0x180] sm:$0xff]  }
 0xbdb   :  { %v5480_v38 = vrot.slane %v5458_v5, %v8667_v28  ;;  %v5487_v6 = vrot.slane %v5459_v9, %v8667_v28  ;;  %v5457_v23 = vcombine.low %v5442_v2, %v5443_v55  ;;  %v5512_v10 = vmul.f32 %v5423_v50, %v8684_v36  ;;  %v7877_v2 = vld [vmem:[#allocation9 + $0x108] sm:$0xff]   ;;  %v7879_v9 = vld [vmem:[#allocation9 + $0x150] sm:$0xff]  }
 0xbdc   :  { %v5466_v53 = vrot.slane %v5456_v18, %v8667_v28  ;;  %v5511_v39 = vmul.f32 %v5419_v14, %v8677_v51  ;;  %v5513_v11 = vmul.f32 %v5427_v52, %v8682_v35  ;;  %v7878_v5 = vld [vmem:[#allocation9 + $0x188] sm:$0xff]   ;;  %v7880_v55 = vld [vmem:[#allocation9 + $0x1d0] sm:$0xff]  }
 0xbdd   :  { %v5489_v19 = vcombine.low %v5480_v38, %v5487_v6  ;;  %v5473_v13 = vrot.slane %v5457_v23, %v8667_v28  ;;  %v7882_v18 = vld [vmem:[#allocation9 + $0x190] sm:$0xff]   ;;  %v7886_v38 = vld [vmem:[#allocation9 + $0x198] sm:$0xff]   ;;  %v7887_v6 = vld [vmem:[#allocation9 + $0x160] sm:$0xff]  }
 0xbde   :  { %v7888_v23 = vld [vmem:[#allocation9 + $0x1e0] sm:$0xff]  }
 0xbdf   :  { %v5503_v3 = vrot.slane %v5489_v19, %v8667_v28  ;;  %v5488_v20 = vcombine.low %v5466_v53, %v5473_v13  ;;  %v7890_v53 = vld [vmem:[#allocation9 + $0x1a0] sm:$0xff]   ;;  %v7893_v19 = vld [vmem:[#allocation9 + $0x128] sm:$0xff]  }
 0xbe0   :  { %v7894_v13 = vld [vmem:[#allocation9 + $0x1a8] sm:$0xff]  }
 0xbe1   :  { %v5496_v4 = vrot.slane %v5488_v20, %v8667_v28  ;;  %v7896_v20 = vld [vmem:[#allocation9 + $0x1f0] sm:$0xff]  }
 0xbe3   :  { %v5504_v22 = vcombine.low %v5496_v4, %v5503_v3  ;;  %v7895_v3 = vld [vmem:[#allocation9 + $0x170] sm:$0xff]  }
 0xbe4   :  { %v7897_v4 = vld [vmem:[#allocation9 + $0x130] sm:$0xff]  }
 0xbe5   :  { %v5506_v36 = vsub.f32 %v6938_v21, %v5504_v22  ;;  %v7898_v21 = vld [vmem:[#allocation9 + $0x1b0] sm:$0xff]   ;;  %v7899_v22 = vld [vmem:[#allocation9 + $0x178] sm:$0xff]  }
 0xbe7   :  { %v5523_v24 = vrot.slane %v5506_v36, %v8444_v8  ;;  %v5531_v25 = vrot.slane %v5506_v36, %v5414_v26  ;;  %v5519_v51 = vrot.slane %v5506_v36, %v8438_v41  ;;  %v5527_v35 = vrot.slane %v5506_v36, %v5410_v49 }
 0xbe8   :  { %v5539_v16 = vrot.slane %v5506_v36, %v5422_v17  ;;  %v5547_v48 = vrot.slane %v5506_v36, %v5430_v46  ;;  %v5535_v31 = vrot.slane %v5506_v36, %v5418_v40  ;;  %v5543_v34 = vrot.slane %v5506_v36, %v5426_v44  ;;  %v7900_v36 = vld [vmem:[#allocation9 + $0x1f8] sm:$0xff]  }
 0xbe9   :  { %v5557_v27 = vadd.f32 %v5523_v24, %v5508_v15  ;;  %v5559_v12 = vadd.f32 %v5531_v25, %v5510_v42  ;;  %v5556_v60 = vadd.f32 %v5519_v51, %v5507_v45  ;;  %v5558_v28 = vadd.f32 %v5527_v35, %v5509_v47  ;;  %v7881_v15 = vld [vmem:[#allocation9 + $0x110] sm:$0xff]   ;;  %v7883_v42 = vld [vmem:[#allocation9 + $0x158] sm:$0xff]  }
 0xbea   :  { %v5561_v37 = vadd.f32 %v5539_v16, %v5512_v10  ;;  %v5563_v43 = vadd.f32 %v5547_v48, %v5514_v0  ;;  %v8742_v29 = vadd.f32 %v5535_v31, %v5511_v39  ;;  %v8744_v14 = vadd.f32 %v5543_v34, %v5513_v11  ;;  %v7876_v0 = vld [vmem:[#allocation9 + $0x1c8] sm:$0xff]   ;;  %v7884_v45 = vld [vmem:[#allocation9 + $0x1d8] sm:$0xff]   ;;  %v7889_v10 = vld [vmem:[#allocation9 + $0x120] sm:$0xff]  }
 0xbeb   :  { %v5565_v50 = vmul.f32 0.2, %v5557_v27  ;;  %v5567_v8 = vmul.f32 0.2, %v5559_v12  ;;  %v5564_v26 = vmul.f32 0.2, %v5556_v60 }
 0xbec   :  { %v5566_v52 = vmul.f32 0.2, %v5558_v28  ;;  %v5569_v41 = vmul.f32 0.2, %v5561_v37  ;;  %v5571_v49 = vmul.f32 0.2, %v5563_v43 }
 0xbed   :  { %v5573_v17 = vmax.f32 %v5557_v27, %v5565_v50  ;;  %v5575_v46 = vmax.f32 %v5559_v12, %v5567_v8  ;;  %v5572_v40 = vmax.f32 %v5556_v60, %v5564_v26  ;;  %v7885_v47 = vld [vmem:[#allocation9 + $0x118] sm:$0xff]   ;;  %v7891_v39 = vld [vmem:[#allocation9 + $0x168] sm:$0xff]   ;;  %v5568_v24 = vmul.f32 0.2, %v8742_v29  ;;  %v7903_v31 = vld [vmem:[#allocation9 + $0x200] sm:$0xff]  }
 0xbee   :  { %v5574_v44 = vmax.f32 %v5558_v28, %v5566_v52  ;;  %v5577_v54 = vmax.f32 %v5561_v37, %v5569_v41  ;;  %v5579_v56 = vmax.f32 %v5563_v43, %v5571_v49  ;;  %v7892_v11 = vld [vmem:[#allocation9 + $0x1e8] sm:$0xff]   ;;  %v5570_v25 = vmul.f32 0.2, %v8744_v14  ;;  %v7901_v51 = vld [vmem:[#allocation9 + $0x138] sm:$0xff]   ;;  %v7905_v60 = vld [vmem:[#allocation9 + $0x210] sm:$0xff]  }
 0xbef   :  { %v5581_v33 = vpack.c.bf16 %v5573_v17, %v5573_v17  ;;  %v5583_v57 = vpack.c.bf16 %v5575_v46, %v5575_v46  ;;  %v5580_v58 = vpack.c.bf16 %v5572_v40, %v5572_v40  ;;  %v7902_v35 = vld [vmem:[#allocation9 + $0x1b8] sm:$0xff]   ;;  %v5576_v16 = vmax.f32 %v8742_v29, %v5568_v24  ;;  %v7904_v12 = vld [vmem:[#allocation9 + $0x208] sm:$0xff]   ;;  %v7907_v37 = vld [vmem:[#allocation9 + $0x220] sm:$0xff]  }
 0xbf0   :  { %v5582_v62 = vpack.c.bf16 %v5574_v44, %v5574_v44  ;;  %v5585_v1 = vpack.c.bf16 %v5577_v54, %v5577_v54  ;;  %v5587_v32 = vpack.c.bf16 %v5579_v56, %v5579_v56  ;;  %v5578_v48 = vmax.f32 %v8744_v14, %v5570_v25  ;;  %v7906_v28 = vld [vmem:[#allocation9 + $0x218] sm:$0xff]   ;;  %v7908_v43 = vld [vmem:[#allocation9 + $0x228] sm:$0xff]   ;;  %v7909_v29 = vld [vmem:[#allocation9 + $0x230] sm:$0xff]  }
 0xbf1   :  { %6196 = vmatprep.mubr.bf16.mxu1 %v5581_v33  ;;  %6236 = vmatprep.mubr.bf16.mxu0 %v5583_v57  ;;  %v5584_v34 = vpack.c.bf16 %v5576_v16, %v5576_v16  ;;  %v7910_v14 = vld [vmem:[#allocation9 + $0x238] sm:$0xff]   ;;  %v7938_v50 = vld [vmem:[%s8767_s0 + $0x8] sm:$0xf] }
 0xbf2   :  { %6197 = vmatmul.mubr.bf16.vlgmr.msra.gmra.mrb[44].mxu1 %v5580_v58  ;;  %6237 = vmatmul.mubr.bf16.vlgmr.msra.gmra.mrb[44].mxu0 %v5582_v62  ;;  %v5586_v27 = vpack.c.bf16 %v5578_v48, %v5578_v48 }
 0xbf3   :  { %7220 = vmatpush3.bf16.msra.mxu1 %v7873_v59  ;;  %7242 = vmatpush3.bf16.msra.mxu0 %v7874_v61 }
 0xbf4   :  { %6276 = vmatprep.mubr.bf16.mxu1 %v5585_v1  ;;  %6316 = vmatprep.mubr.bf16.mxu0 %v5587_v32 }
 0xbf5   :  { %7221 = vmatprep.subr.bf16.mxu1 %v7875_v63  ;;  %7243 = vmatprep.subr.bf16.mxu0 %v7876_v0 }
 0xbf7   :  { %7222 = vmatpush3.bf16.msra.mxu1 %v7877_v2  ;;  %7244 = vmatpush3.bf16.msra.mxu0 %v7878_v5 }
 0xbf8   :  { %7223 = vmatprep.subr.bf16.mxu1 %v7879_v9  ;;  %7245 = vmatprep.subr.bf16.mxu0 %v7880_v55 }
 0xbfb   :  { %7224 = vmatpush3.bf16.msra.mxu1 %v7881_v15  ;;  %7246 = vmatpush3.bf16.msra.mxu0 %v7882_v18 }
 0xbfc   :  { %7225 = vmatprep.subr.bf16.mxu1 %v7883_v42  ;;  %7247 = vmatprep.subr.bf16.mxu0 %v7884_v45 }
 0xbff   :  { %7226 = vmatpush3.bf16.msra.mxu1 %v7885_v47  ;;  %7248 = vmatpush3.bf16.msra.mxu0 %v7886_v38 }
 0xc00   :  { %7227 = vmatprep.subr.bf16.mxu1 %v7887_v6  ;;  %7249 = vmatprep.subr.bf16.mxu0 %v7888_v23  ;;  %v6365_v6 = vand.u32 127, %v987_v30 }
 0xc02   :  { %vm6366_vm2 = vcmp.eq.s32.totalorder %v6365_v6, 1 }
 0xc03   :  { %7228 = vmatpush3.bf16.msra.mxu1 %v7889_v10  ;;  %7250 = vmatpush3.bf16.msra.mxu0 %v7890_v53 }
 0xc04   :  { %7229 = vmatprep.subr.bf16.mxu1 %v7891_v39  ;;  %7251 = vmatprep.subr.bf16.mxu0 %v7892_v11 }
 0xc07   :  { %7230 = vmatpush3.bf16.msra.mxu1 %v7893_v19  ;;  %7252 = vmatpush3.bf16.msra.mxu0 %v7894_v13 }
 0xc08   :  { %7231 = vmatprep.subr.bf16.mxu1 %v7895_v3  ;;  %7253 = vmatprep.subr.bf16.mxu0 %v7896_v20 }
 0xc0b   :  { %7232 = vmatpush3.bf16.msra.mxu1 %v7897_v4  ;;  %7254 = vmatpush3.bf16.msra.mxu0 %v7898_v21 }
 0xc0c   :  { %7233 = vmatprep.subr.bf16.mxu1 %v7899_v22  ;;  %7255 = vmatprep.subr.bf16.mxu0 %v7900_v36 }
 0xc0f   :  { %7234 = vmatpush3.bf16.msra.mxu1 %v7901_v51  ;;  %7256 = vmatpush3.bf16.msra.mxu0 %v7902_v35 }
 0xc10   :  { %7392 = vmatprep.subr.bf16.mxu1 %v8118_v7 }
 0xc12   :  { %6277 = vmatmul.mubr.bf16.vlgmr.msra.gmra.mrb[48].mxu1 %v5584_v34  ;;  %6317 = vmatmul.mubr.bf16.vlgmr.msra.gmra.mrb[48].mxu0 %v5586_v27 }
 0xc13   :  { %7393 = vmatpush3.bf16.msra.mxu1 %v7903_v31  ;;  %7408 = vmatprep.mubr.msk.bf16.mxu1 %vm8119_vm1, %v8118_v7 }
 0xc14   :  { %7394 = vmatprep.subr.bf16.mxu1 %v8118_v7 }
 0xc17   :  { %7395 = vmatpush3.bf16.msra.mxu1 %v7904_v12 }
 0xc18   :  { %7396 = vmatprep.subr.bf16.mxu1 %v8118_v7 }
 0xc1b   :  { %7397 = vmatpush3.bf16.msra.mxu1 %v7905_v60 }
 0xc1c   :  { %7398 = vmatprep.subr.bf16.mxu1 %v8118_v7 }
 0xc1f   :  { %7399 = vmatpush3.bf16.msra.mxu1 %v7906_v28 }
 0xc20   :  { %7400 = vmatprep.subr.bf16.mxu1 %v8118_v7 }
 0xc23   :  { %7401 = vmatpush3.bf16.msra.mxu1 %v7907_v37 }
 0xc24   :  { %7402 = vmatprep.subr.bf16.mxu1 %v8118_v7 }
 0xc27   :  { %7403 = vmatpush3.bf16.msra.mxu1 %v7908_v43 }
 0xc28   :  { %7404 = vmatprep.subr.bf16.mxu1 %v8118_v7 }
 0xc2b   :  { %7405 = vmatpush3.bf16.msra.mxu1 %v7909_v29 }
 0xc2c   :  { %7406 = vmatprep.subr.bf16.mxu1 %v8118_v7 }
 0xc2f   :  { %7407 = vmatpush3.bf16.msra.mxu1 %v7910_v14 }
 0xc32   :  { %7409 = vmatmul.mubr.bf16.vlgmr.msra.gmra.mrb[52].mxu1 %v7938_v50 }
 0xcc5   :  { %v7191_v8 = vpop.f32.mrb[44].mxu1  ;;  %v7213_v26 = vpop.f32.mrb[44].mxu0 }
 0xcc6   :  { %v7192_v52 = vpop.f32.mrb[45].mxu1  ;;  %v7214_v41 = vpop.f32.mrb[45].mxu0 }
 0xcc7   :  { %v7193_v49 = vadd.f32 %v7192_v52, %v7191_v8  ;;  %v7215_v17 = vadd.f32 %v7214_v41, %v7213_v26  ;;  %v7194_v46 = vpop.f32.mrb[46].mxu1  ;;  %v7216_v40 = vpop.f32.mrb[46].mxu0 }
 0xcc8   :  { %v7195_v44 = vpop.f32.mrb[47].mxu1  ;;  %v7217_v54 = vpop.f32.mrb[47].mxu0 }
 0xcc9   :  { %v6239_v56 = vadd.f32 %v7215_v17, %v7193_v49 }
 0xce5   :  { %v7235_v33 = vpop.f32.mrb[48].mxu1  ;;  %v7257_v57 = vpop.f32.mrb[48].mxu0 }
 0xce6   :  { %v7236_v7 = vpop.f32.mrb[49].mxu1  ;;  %v7258_v58 = vpop.f32.mrb[49].mxu0 }
 0xce7   :  { %v7237_v59 = vadd.f32 %v7236_v7, %v7235_v33  ;;  %v7259_v61 = vadd.f32 %v7258_v58, %v7257_v57  ;;  %v7238_v62 = vpop.f32.mrb[50].mxu1  ;;  %v7260_v63 = vpop.f32.mrb[50].mxu0 }
 0xce8   :  { %v7239_v0 = vpop.f32.mrb[51].mxu1  ;;  %v7261_v1 = vpop.f32.mrb[51].mxu0 }
 0xce9   :  { %v6279_v32 = vadd.f32 %v7237_v59, %v6239_v56 }
 0xceb   :  { %v6319_v2 = vadd.f32 %v7259_v61, %v6279_v32 }
 0xd05   :  { %v6358_v5 = vpop.f32.mrb[52].mxu1 }
 0xd06   :  { %v6359_v9 = vadd.f32 %v6358_v5, %v6319_v2  ;;  %v7410_v55 = vpop.f32.mrb[53].mxu1 }
 0xd07   :  { %v6361_v15 = vpop.f32.mrb[54].mxu1 }
 0xd08   :  { %v6367_v18 = vsub.f32 0.0, %v6359_v9  ;;  %v7411_v42 = vpop.f32.mrb[55].mxu1 }
 0xd0a   :  { %v6368_v45 = vmul.f32 1.442695, %v6367_v18 }
 0xd0c   :  { %7933 = vpow2.f32 %v6368_v45 }
 0xd16   :  { %v7934_v47 = vpop.eup %7933 }
 0xd17   :  { %v6370_v38 = vadd.f32 1.0, %v7934_v47 }
 0xd19   :  { %7935 = vrcp.f32 %v6370_v38 }
 0xd23   :  { %v7936_v23 = vpop.eup %7935 }
 0xd24   :  { %v6373_v10 = vsel %vm6366_vm2, %v7936_v23, %v6359_v9 }
 0xd25   :  { %6374 = vst [vmem:[%s8778_s11] sm:$0xff] %v6373_v10 }
 0xd26   :  { %6383 = vsyncpa [#allocation3], 1 }
 0xd27   :  { %6384 = vsyncpa [#allocation5], 1 }
 0xd28   :  { %6385 = vsyncpa [#allocation8], 1 }
 0xd29   :  { %6386 = vsyncpa [#allocation11], 1 }

</bundles_post_ra>
